<compile_context>
chip_gen: v7x
topology: tpu7x:2x2x1
jax: 0.10.0
libtpu: 0.0.40
codegen_flags: <defaults>
</compile_context>

<pallas_src>
import numpy as np
import jax
import jax.numpy as jnp
from jax import lax
from jax.experimental import pallas as pl
from jax.experimental.pallas import tpu as pltpu


_CONST_ORDER = ("w1", "b1", "p1", "w2", "s2", "b2", "p2", "fcmask", "fcb",
                "wd1", "sd1", "bd1", "wd2", "sd2", "bd2", "wd3", "bd3")


# ----------------------- constant spatial-operator tables -----------------------
# Activations inside the kernel are laid out as (channels, H*W): channels on the
# sublane axis, flattened spatial positions on the lane axis.  All spatial
# re-indexing (strided conv windows, maxpool windows, deconv scatter) is expressed
# as multiplication by constant 0/1 matrices, which keeps every in-kernel op a
# plain matmul / elementwise op (robust Mosaic lowering, MXU-friendly).

def _pool_gather(hin, win, ho, wo, stride):
    """(4, hin*win, ho*wo) 0/1 column-gather tables for a 2x2 max pool."""
    mats = np.zeros((4, hin * win, ho * wo), np.float32)
    for dh in range(2):
        for dw in range(2):
            t = dh * 2 + dw
            for i in range(ho):
                for j in range(wo):
                    mats[t, (stride * i + dh) * win + (stride * j + dw), i * wo + j] = 1.0
    return mats


def _conv_scatter(hin, win, ho, wo, k, stride, pad):
    """(k*k, hin*win, ho*wo) per-tap gather tables for a standard conv (zero pad)."""
    s = np.zeros((k * k, hin * win, ho * wo), np.float32)
    for kh in range(k):
        for kw in range(k):
            t = kh * k + kw
            for i in range(ho):
                for j in range(wo):
                    hi = stride * i - pad + kh
                    wi = stride * j - pad + kw
                    if 0 <= hi < hin and 0 <= wi < win:
                        s[t, hi * win + wi, i * wo + j] = 1.0
    return s


def _convT_scatter(hin, win, ho, wo, k, stride, pad):
    """(k*k, hin*win, ho*wo) per-tap scatter tables for ConvTranspose2d.

    Contraction stays over the UNDILATED input positions -> no zero-inserted
    intermediate and no GEMM over ~(1-1/s^2) zeros (review item 2)."""
    s = np.zeros((k * k, hin * win, ho * wo), np.float32)
    for kh in range(k):
        for kw in range(k):
            t = kh * k + kw
            for hi in range(hin):
                for wi in range(win):
                    i = stride * hi - pad + kh
                    j = stride * wi - pad + kw
                    if 0 <= i < ho and 0 <= j < wo:
                        s[t, hi * win + wi, i * wo + j] = 1.0
    return s


# ----------------------------- parameter preparation ----------------------------

def prepare_params(params):
    """PyTorch-convention params -> kernel-ready operands (run once, outside jit).

    encoder and encoder2 are merged: c1 output channels 0..15 = encoder,
    16..31 = encoder2; c2 is the corresponding block-diagonal (groups=2) mix."""
    f32, bf16 = jnp.float32, jnp.bfloat16
    enc, enc2, dec = params["enc"], params["enc2"], params["dec"]

    # c1 (merged 1->32, k3 s3 p1) -- computed on the VPU in-kernel (K = 9).
    w1 = jnp.concatenate([enc["c1_w"].reshape(16, 9), enc2["c1_w"].reshape(16, 9)], axis=0)
    w1_cols = w1.T.reshape(9, 32, 1).astype(f32)                        # per-tap column
    b1 = jnp.concatenate([enc["c1_b"], enc2["c1_b"]]).reshape(32, 1).astype(f32)

    # pool1: MaxPool2d(2, stride=2), 10x10 -> 5x5.
    p1 = jnp.asarray(_pool_gather(10, 10, 5, 5, 2)).astype(bf16)        # (4,100,25)

    # c2 merged (groups=2, Cin 32 -> Cout 16, k3 s2 p1): mix-once weight, row = t*16+co.
    w2m = jnp.zeros((16, 32, 3, 3), f32)
    w2m = w2m.at[:8, :16].set(enc["c2_w"]).at[8:, 16:].set(enc2["c2_w"])
    w2_all = w2m.transpose(2, 3, 0, 1).reshape(144, 32).astype(bf16)    # (9*16, 32)
    b2 = jnp.concatenate([enc["c2_b"], enc2["c2_b"]]).reshape(16, 1).astype(f32)
    s2 = jnp.asarray(_conv_scatter(5, 5, 3, 3, 3, 2, 1)).astype(bf16)   # (9,25,9)

    # pool2: MaxPool2d(2, stride=1), 3x3 -> 2x2.
    p2 = jnp.asarray(_pool_gather(3, 3, 2, 2, 1)).astype(bf16)          # (4,9,4)

    # fc (reads the encoder2 branch = merged channels 8..15); PyTorch view(-1,32)
    # flattens NCHW as c*4 + h*2 + w, which matches lane index h*2 + w here.
    fc_w_flat = params["fc_w"].reshape(32)
    fcmask = jnp.zeros((16, 4), f32).at[8:, :].set(fc_w_flat.reshape(8, 4))
    fcb = params["fc_b"].reshape(1, 1).astype(f32)

    # d1: ConvTranspose2d(8,16,3,s=2,p=0); consumes merged channels 0..7 (zeros else).
    wd1 = jnp.zeros((3, 3, 16, 16), f32).at[:, :, :, :8].set(dec["d1_w"].transpose(2, 3, 1, 0))
    wd1_all = wd1.reshape(144, 16).astype(bf16)                         # row = t*16+co
    bd1 = dec["d1_b"].reshape(16, 1).astype(f32)
    sd1 = jnp.asarray(_convT_scatter(2, 2, 5, 5, 3, 2, 0)).astype(bf16)  # (9,4,25)

    # d2: ConvTranspose2d(16,8,5,s=3,p=1).
    wd2_all = dec["d2_w"].transpose(2, 3, 1, 0).reshape(200, 16).astype(bf16)  # row = t*8+co
    bd2 = dec["d2_b"].reshape(8, 1).astype(f32)
    sd2 = jnp.asarray(_convT_scatter(5, 5, 15, 15, 5, 3, 1)).astype(bf16)  # (25,25,225)

    # d3: ConvTranspose2d(8,1,2,s=2,p=1) -> pure per-phase pointwise conv (4 phases).
    wd3_all = dec["d3_w"].transpose(2, 3, 1, 0).reshape(4, 8).astype(bf16)   # row = kh*2+kw
    bd3 = dec["d3_b"].reshape(1, 1).astype(f32)

    return {"w1": w1_cols, "b1": b1, "p1": p1, "w2": w2_all, "s2": s2, "b2": b2,
            "p2": p2, "fcmask": fcmask, "fcb": fcb, "wd1": wd1_all, "sd1": sd1,
            "bd1": bd1, "wd2": wd2_all, "sd2": sd2, "bd2": bd2, "wd3": wd3_all,
            "bd3": bd3}


# --------------------------------- fused kernel ---------------------------------

def _generator_kernel(patches_ref, w1_ref, b1_ref, p1_ref,
                      w2_ref, s2_ref, b2_ref, p2_ref,
                      fcmask_ref, fcb_ref,
                      wd1_ref, sd1_ref, bd1_ref,
                      wd2_ref, sd2_ref, bd2_ref,
                      wd3_ref, bd3_ref,
                      dec_ref, fc_ref):
    f32, bf16 = jnp.float32, jnp.bfloat16

    # ---- c1 (1->32, k3 s3 p1) on the VPU: 9 outer-product accumulations ----
    patches = patches_ref[0]                                     # (9, 100) f32
    acc1 = jnp.zeros((32, 100), f32)
    for t in range(9):
        acc1 = acc1 + w1_ref[t] * patches[t:t + 1, :]            # (32,1)*(1,100)
    y1 = jnp.maximum(acc1 + b1_ref[...], 0.0).astype(bf16)       # (32,100)

    # ---- pool1 (2x2 s2): max of 4 exact 0/1 column-gather matmuls ----
    a1 = jnp.maximum(
        jnp.maximum(jnp.dot(y1, p1_ref[0], preferred_element_type=f32),
                    jnp.dot(y1, p1_ref[1], preferred_element_type=f32)),
        jnp.maximum(jnp.dot(y1, p1_ref[2], preferred_element_type=f32),
                    jnp.dot(y1, p1_ref[3], preferred_element_type=f32)),
    ).astype(bf16)                                               # (32,25)

    # ---- c2 merged / grouped (32->16, k3 s2 p1): mix once, 9 spatial gathers ----
    mix = jnp.dot(w2_ref[...], a1, preferred_element_type=f32)   # (144,25) f32
    acc = jnp.zeros((16, 9), f32)
    for t in range(9):
        acc = acc + jnp.dot(mix[16 * t:16 * (t + 1), :].astype(bf16), s2_ref[t],
                            preferred_element_type=f32)
    y2 = jnp.maximum(acc + b2_ref[...], 0.0).astype(bf16)        # (16,9)

    # ---- pool2 (2x2 s1) ----
    enc = jnp.maximum(
        jnp.maximum(jnp.dot(y2, p2_ref[0], preferred_element_type=f32),
                    jnp.dot(y2, p2_ref[1], preferred_element_type=f32)),
        jnp.maximum(jnp.dot(y2, p2_ref[2], preferred_element_type=f32),
                    jnp.dot(y2, p2_ref[3], preferred_element_type=f32)),
    )                                                            # (16,4) f32

    # ---- fc + softplus on the encoder2 branch (rows 8..15 via the masked weight) ----
    s = jnp.sum(enc * fcmask_ref[...], axis=1, keepdims=True)    # (16,1)
    s = jnp.sum(s, axis=0, keepdims=True) + fcb_ref[...]         # (1,1)
    fc_ref[0] = jnp.maximum(s, 0.0) + jnp.log(1.0 + jnp.exp(-jnp.abs(s)))

    # ---- decoder d1 (convT 8->16, k3 s2 p0): mix once + 9 scatters ----
    encb = enc.astype(bf16)
    mix = jnp.dot(wd1_ref[...], encb, preferred_element_type=f32)   # (144,4) f32
    acc = jnp.zeros((16, 25), f32)
    for t in range(9):
        acc = acc + jnp.dot(mix[16 * t:16 * (t + 1), :].astype(bf16), sd1_ref[t],
                            preferred_element_type=f32)
    yd1 = jnp.maximum(acc + bd1_ref[...], 0.0).astype(bf16)         # (16,25)

    # ---- d2 (convT 16->8, k5 s3 p1): mix once + 25 scatters (undilated input) ----
    mix = jnp.dot(wd2_ref[...], yd1, preferred_element_type=f32)    # (200,25) f32
    acc = jnp.zeros((8, 225), f32)
    for t in range(25):
        acc = acc + jnp.dot(mix[8 * t:8 * (t + 1), :].astype(bf16), sd2_ref[t],
                            preferred_element_type=f32)
    yd2 = jnp.maximum(acc + bd2_ref[...], 0.0).astype(bf16)         # (8,225)

    # ---- d3 (convT 8->1, k2 s2 p1) = 4 pointwise phases; lane-dense (4,225) out ----
    z3 = jnp.dot(wd3_ref[...], yd2, preferred_element_type=f32) + bd3_ref[...]
    dec_ref[0] = 1.0 / (1.0 + jnp.exp(-z3))                         # exact sigmoid


def _fused_generator(patches, pp):
    n = patches.shape[0]
    consts = [pp[k] for k in _CONST_ORDER]

    def _const_spec(a):
        if a.ndim == 2:
            return pl.BlockSpec(a.shape, lambda i: (0, 0))
        return pl.BlockSpec(a.shape, lambda i: (0, 0, 0))

    flops_per_n = (2 * 32 * 9 * 100                                  # c1 (VPU)
                   + 4 * 2 * 32 * 100 * 25                           # pool1
                   + 2 * 144 * 32 * 25 + 9 * 2 * 16 * 25 * 9         # c2
                   + 4 * 2 * 16 * 9 * 4                              # pool2
                   + 2 * 16 * 4                                      # fc
                   + 2 * 144 * 16 * 4 + 9 * 2 * 16 * 4 * 25          # d1
                   + 2 * 200 * 16 * 25 + 25 * 2 * 8 * 25 * 225       # d2
                   + 2 * 4 * 8 * 225)                                # d3
    bytes_accessed = (int(np.prod(patches.shape)) * 4
                      + sum(int(np.prod(a.shape)) * a.dtype.itemsize for a in consts)
                      + n * (4 * 225 + 1) * 4)

    return pl.pallas_call(
        _generator_kernel,
        grid=(n,),
        in_specs=[pl.BlockSpec((1, 9, 100), lambda i: (i, 0, 0))]
                 + [_const_spec(a) for a in consts],
        out_specs=(pl.BlockSpec((1, 4, 225), lambda i: (i, 0, 0)),
                   pl.BlockSpec((1, 1, 1), lambda i: (i, 0, 0))),
        out_shape=(jax.ShapeDtypeStruct((n, 4, 225), jnp.float32),
                   jax.ShapeDtypeStruct((n, 1, 1), jnp.float32)),
        compiler_params=pltpu.CompilerParams(dimension_semantics=("parallel",)),
        cost_estimate=pl.CostEstimate(flops=int(n * flops_per_n),
                                      transcendentals=int(n * (4 * 225 + 2)),
                                      bytes_accessed=int(bytes_accessed)),
    )(patches, *consts)


# ----------------------------------- forward ------------------------------------

def generator_forward(pp, z):
    """z: (N,1,28,28) f32 -> (decoder(encoder(z)) as (N,1,28,28), softplus(fc(encoder2(z))))."""
    n = z.shape[0]
    x = z.reshape(n, 28, 28).astype(jnp.float32)

    # First-layer im2col (k3 s3 p1) on the raw input -> (N, 9, 100).  Only pre-kernel
    # glue; it replaces reading the raw image which must come from HBM anyway.
    xpad = jnp.pad(x, ((0, 0), (1, 1), (1, 1)))
    taps = [xpad[:, kh:kh + 28:3, kw:kw + 28:3] for kh in range(3) for kw in range(3)]
    patches = jnp.stack(taps, axis=1).reshape(n, 9, 100)

    dec_phases, fc_out = _fused_generator(patches, pp)

    # Depth-to-space for d3 (k2 s2 p1): every output pixel has exactly one source
    # phase -> the kernel emits a lane-dense (4,225) slab; the interleave is tiny
    # wrapper glue on the 6 KB output.
    o = dec_phases.reshape(n, 2, 2, 15, 15)              # (n, kh, kw, hi, wi)
    ee = o[:, 1, 1, 0:14, 0:14]                          # even row, even col
    eo = o[:, 1, 0, 0:14, 1:15]                          # even row, odd  col
    oe = o[:, 0, 1, 1:15, 0:14]                          # odd  row, even col
    oo = o[:, 0, 0, 1:15, 1:15]                          # odd  row, odd  col
    y = jnp.stack([jnp.stack([ee, eo], axis=-1),
                   jnp.stack([oe, oo], axis=-1)], axis=2)        # (N,14,2,14,2)
    return y.reshape(n, 1, 28, 28), fc_out.reshape(n, 1)


# --------------------------- pure-JAX f32 reference ------------------------------

def _ref_conv(x, w, b, stride, pad):
    y = lax.conv_general_dilated(x, w, (stride, stride), [(pad, pad), (pad, pad)],
                                 dimension_numbers=("NCHW", "OIHW", "NCHW"))
    return y + b.reshape(1, -1, 1, 1)


def _ref_convT(x, w, b, stride, pad):
    k = w.shape[2]
    wf = jnp.flip(w, (2, 3)).transpose(1, 0, 2, 3)
    y = lax.conv_general_dilated(x, wf, (1, 1), [(k - 1 - pad, k - 1 - pad)] * 2,
                                 lhs_dilation=(stride, stride),
                                 dimension_numbers=("NCHW", "OIHW", "NCHW"))
    return y + b.reshape(1, -1, 1, 1)


def _ref_maxpool(x, k, stride):
    return lax.reduce_window(x, -jnp.inf, lax.max, (1, 1, k, k), (1, 1, stride, stride), "VALID")


def reference_forward(params, z):
    enc, enc2, dec = params["enc"], params["enc2"], params["dec"]

    def encode(p, x):
        x = _ref_maxpool(jax.nn.relu(_ref_conv(x, p["c1_w"], p["c1_b"], 3, 1)), 2, 2)
        x = _ref_maxpool(jax.nn.relu(_ref_conv(x, p["c2_w"], p["c2_b"], 2, 1)), 2, 1)
        return x

    e1 = encode(enc, z)
    e2 = encode(enc2, z)
    sp = jax.nn.softplus(e2.reshape(z.shape[0], 32) @ params["fc_w"].reshape(32, 1)
                         + params["fc_b"])
    y = jax.nn.relu(_ref_convT(e1, dec["d1_w"], dec["d1_b"], 2, 0))
    y = jax.nn.relu(_ref_convT(y, dec["d2_w"], dec["d2_b"], 3, 1))
    y = jax.nn.sigmoid(_ref_convT(y, dec["d3_w"], dec["d3_b"], 2, 1))
    return y, sp


# ------------------------------ deterministic init -------------------------------

def init_params(key):
    def uinit(k, shape, fan_in):
        bound = 1.0 / jnp.sqrt(jnp.float32(fan_in))
        return jax.random.uniform(k, shape, jnp.float32, -bound, bound)

    keys = jax.random.split(key, 24)
    ki = iter(keys)

    def conv_wb(cout, cin, ksz):
        fan = cin * ksz * ksz
        return uinit(next(ki), (cout, cin, ksz, ksz), fan), uinit(next(ki), (cout,), fan)

    def convT_wb(cin, cout, ksz):
        fan = cout * ksz * ksz
        return uinit(next(ki), (cin, cout, ksz, ksz), fan), uinit(next(ki), (cout,), fan)

    def enc_params():
        c1_w, c1_b = conv_wb(16, 1, 3)
        c2_w, c2_b = conv_wb(8, 16, 3)
        return {"c1_w": c1_w, "c1_b": c1_b, "c2_w": c2_w, "c2_b": c2_b}

    enc = enc_params()
    enc2 = enc_params()
    d1_w, d1_b = convT_wb(8, 16, 3)
    d2_w, d2_b = convT_wb(16, 8, 5)
    d3_w, d3_b = convT_wb(8, 1, 2)
    fc_w = uinit(next(ki), (1, 32), 32)     # PyTorch Linear(32,1).weight layout
    fc_b = uinit(next(ki), (1,), 32)
    return {"enc": enc, "enc2": enc2,
            "dec": {"d1_w": d1_w, "d1_b": d1_b, "d2_w": d2_w, "d2_b": d2_b,
                    "d3_w": d3_w, "d3_b": d3_b},
            "fc_w": fc_w, "fc_b": fc_b}


# ------------------------------------- main ---------------------------------------

if __name__ == "__main__":
    key = jax.random.PRNGKey(0)
    kp, kz = jax.random.split(key)
    params = init_params(kp)
    pp = prepare_params(params)            # one-time weight / operator-table repack

    # MNIST-like input; spatial size 28 is required by the x.view(-1, 32) in forward().
    z = jax.random.uniform(kz, (2, 1, 28, 28), dtype=jnp.float32)

    dec_out, sp_out = jax.jit(generator_forward)(pp, z)
    jax.block_until_ready((dec_out, sp_out))

    assert dec_out.shape == (2, 1, 28, 28), dec_out.shape
    assert sp_out.shape == (2, 1), sp_out.shape
    assert bool(jnp.all(jnp.isfinite(dec_out))) and bool(jnp.all(jnp.isfinite(sp_out)))
    assert bool(jnp.all(dec_out >= 0.0)) and bool(jnp.all(dec_out <= 1.0))   # sigmoid range
    assert bool(jnp.all(sp_out >= 0.0))                                      # softplus range

    # Numeric check against a pure-JAX f32 reference of the PyTorch module
    # (loose tolerance: intermediates are bf16 inside the fused kernel).
    ref_dec, ref_sp = jax.jit(reference_forward)(params, z)
    jax.block_until_ready((ref_dec, ref_sp))
    assert float(jnp.max(jnp.abs(dec_out - ref_dec))) < 0.1
    assert float(jnp.max(jnp.abs(sp_out - ref_sp))) < 0.1

    print("KERNEL_OK")
</pallas_src>

<mosaic_0001>
module attributes {stable_mosaic.version = 11 : i64} {
  func.func @_generator_kernel(%arg0: i32, %arg1: memref<1x9x100xf32, #tpu.memory_space<vmem>>, %arg2: memref<9x32x1xf32, #tpu.memory_space<vmem>>, %arg3: memref<32x1xf32, #tpu.memory_space<vmem>>, %arg4: memref<4x100x25xbf16, #tpu.memory_space<vmem>>, %arg5: memref<144x32xbf16, #tpu.memory_space<vmem>>, %arg6: memref<9x25x9xbf16, #tpu.memory_space<vmem>>, %arg7: memref<16x1xf32, #tpu.memory_space<vmem>>, %arg8: memref<4x9x4xbf16, #tpu.memory_space<vmem>>, %arg9: memref<16x4xf32, #tpu.memory_space<vmem>>, %arg10: memref<1x1xf32, #tpu.memory_space<vmem>>, %arg11: memref<144x16xbf16, #tpu.memory_space<vmem>>, %arg12: memref<9x4x25xbf16, #tpu.memory_space<vmem>>, %arg13: memref<16x1xf32, #tpu.memory_space<vmem>>, %arg14: memref<200x16xbf16, #tpu.memory_space<vmem>>, %arg15: memref<25x25x225xbf16, #tpu.memory_space<vmem>>, %arg16: memref<8x1xf32, #tpu.memory_space<vmem>>, %arg17: memref<4x8xbf16, #tpu.memory_space<vmem>>, %arg18: memref<1x1xf32, #tpu.memory_space<vmem>>, %arg19: memref<1x4x225xf32, #tpu.memory_space<vmem>>, %arg20: memref<1x1x1xf32, #tpu.memory_space<vmem>>) attributes {dimension_semantics = [#tpu.dimension_semantics<parallel>], iteration_bounds = array<i64: 2>, scalar_prefetch = 0 : i64, scratch_operands = 0 : i64, tpu.core_type = #tpu.core_type<tc>, window_params = [{transform_indices = @transform_0, window_bounds = array<i64: 1, 9, 100>}, {pipeline_mode = #tpu.pipeline_mode<synchronous>, transform_indices = @transform_1, window_bounds = array<i64: 9, 32, 1>}, {pipeline_mode = #tpu.pipeline_mode<synchronous>, transform_indices = @transform_2, window_bounds = array<i64: 32, 1>}, {pipeline_mode = #tpu.pipeline_mode<synchronous>, transform_indices = @transform_3, window_bounds = array<i64: 4, 100, 25>}, {pipeline_mode = #tpu.pipeline_mode<synchronous>, transform_indices = @transform_4, window_bounds = array<i64: 144, 32>}, {pipeline_mode = #tpu.pipeline_mode<synchronous>, transform_indices = @transform_5, window_bounds = array<i64: 9, 25, 9>}, {pipeline_mode = #tpu.pipeline_mode<synchronous>, transform_indices = @transform_6, window_bounds = array<i64: 16, 1>}, {pipeline_mode = #tpu.pipeline_mode<synchronous>, transform_indices = @transform_7, window_bounds = array<i64: 4, 9, 4>}, {pipeline_mode = #tpu.pipeline_mode<synchronous>, transform_indices = @transform_8, window_bounds = array<i64: 16, 4>}, {pipeline_mode = #tpu.pipeline_mode<synchronous>, transform_indices = @transform_9, window_bounds = array<i64: 1, 1>}, {pipeline_mode = #tpu.pipeline_mode<synchronous>, transform_indices = @transform_10, window_bounds = array<i64: 144, 16>}, {pipeline_mode = #tpu.pipeline_mode<synchronous>, transform_indices = @transform_11, window_bounds = array<i64: 9, 4, 25>}, {pipeline_mode = #tpu.pipeline_mode<synchronous>, transform_indices = @transform_12, window_bounds = array<i64: 16, 1>}, {pipeline_mode = #tpu.pipeline_mode<synchronous>, transform_indices = @transform_13, window_bounds = array<i64: 200, 16>}, {pipeline_mode = #tpu.pipeline_mode<synchronous>, transform_indices = @transform_14, window_bounds = array<i64: 25, 25, 225>}, {pipeline_mode = #tpu.pipeline_mode<synchronous>, transform_indices = @transform_15, window_bounds = array<i64: 8, 1>}, {pipeline_mode = #tpu.pipeline_mode<synchronous>, transform_indices = @transform_16, window_bounds = array<i64: 4, 8>}, {pipeline_mode = #tpu.pipeline_mode<synchronous>, transform_indices = @transform_17, window_bounds = array<i64: 1, 1>}, {transform_indices = @transform_18, window_bounds = array<i64: 1, 4, 225>}, {transform_indices = @transform_19, window_bounds = array<i64: 1, 1, 1>}]} {
    %c0 = arith.constant 0 : index
    %c0_0 = arith.constant 0 : index
    %c0_1 = arith.constant 0 : index
    %0 = vector.load %arg1[%c0, %c0_0, %c0_1] : memref<1x9x100xf32, #tpu.memory_space<vmem>>, vector<1x9x100xf32>
    %1 = vector.shape_cast %0 : vector<1x9x100xf32> to vector<9x100xf32>
    %cst = arith.constant 0.000000e+00 : f32
    %2 = vector.broadcast %cst : f32 to vector<32x100xf32>
    %c0_2 = arith.constant 0 : index
    %c0_3 = arith.constant 0 : index
    %c0_4 = arith.constant 0 : index
    %3 = vector.load %arg2[%c0_2, %c0_3, %c0_4] : memref<9x32x1xf32, #tpu.memory_space<vmem>>, vector<1x32x1xf32>
    %4 = vector.shape_cast %3 : vector<1x32x1xf32> to vector<32x1xf32>
    %5 = vector.extract_strided_slice %1 {offsets = [0, 0], sizes = [1, 100], strides = [1, 1]} : vector<9x100xf32> to vector<1x100xf32>
    %6 = vector.broadcast %4 : vector<32x1xf32> to vector<32x100xf32>
    %7 = vector.broadcast %5 : vector<1x100xf32> to vector<32x100xf32>
    %8 = arith.mulf %6, %7 : vector<32x100xf32>
    %9 = arith.addf %2, %8 : vector<32x100xf32>
    %c1 = arith.constant 1 : index
    %c0_5 = arith.constant 0 : index
    %c0_6 = arith.constant 0 : index
    %10 = vector.load %arg2[%c1, %c0_5, %c0_6] : memref<9x32x1xf32, #tpu.memory_space<vmem>>, vector<1x32x1xf32>
    %11 = vector.shape_cast %10 : vector<1x32x1xf32> to vector<32x1xf32>
    %12 = vector.extract_strided_slice %1 {offsets = [1, 0], sizes = [1, 100], strides = [1, 1]} : vector<9x100xf32> to vector<1x100xf32>
    %13 = vector.broadcast %11 : vector<32x1xf32> to vector<32x100xf32>
    %14 = vector.broadcast %12 : vector<1x100xf32> to vector<32x100xf32>
    %15 = arith.mulf %13, %14 : vector<32x100xf32>
    %16 = arith.addf %9, %15 : vector<32x100xf32>
    %c2 = arith.constant 2 : index
    %c0_7 = arith.constant 0 : index
    %c0_8 = arith.constant 0 : index
    %17 = vector.load %arg2[%c2, %c0_7, %c0_8] : memref<9x32x1xf32, #tpu.memory_space<vmem>>, vector<1x32x1xf32>
    %18 = vector.shape_cast %17 : vector<1x32x1xf32> to vector<32x1xf32>
    %19 = vector.extract_strided_slice %1 {offsets = [2, 0], sizes = [1, 100], strides = [1, 1]} : vector<9x100xf32> to vector<1x100xf32>
    %20 = vector.broadcast %18 : vector<32x1xf32> to vector<32x100xf32>
    %21 = vector.broadcast %19 : vector<1x100xf32> to vector<32x100xf32>
    %22 = arith.mulf %20, %21 : vector<32x100xf32>
    %23 = arith.addf %16, %22 : vector<32x100xf32>
    %c3 = arith.constant 3 : index
    %c0_9 = arith.constant 0 : index
    %c0_10 = arith.constant 0 : index
    %24 = vector.load %arg2[%c3, %c0_9, %c0_10] : memref<9x32x1xf32, #tpu.memory_space<vmem>>, vector<1x32x1xf32>
    %25 = vector.shape_cast %24 : vector<1x32x1xf32> to vector<32x1xf32>
    %26 = vector.extract_strided_slice %1 {offsets = [3, 0], sizes = [1, 100], strides = [1, 1]} : vector<9x100xf32> to vector<1x100xf32>
    %27 = vector.broadcast %25 : vector<32x1xf32> to vector<32x100xf32>
    %28 = vector.broadcast %26 : vector<1x100xf32> to vector<32x100xf32>
    %29 = arith.mulf %27, %28 : vector<32x100xf32>
    %30 = arith.addf %23, %29 : vector<32x100xf32>
    %c4 = arith.constant 4 : index
    %c0_11 = arith.constant 0 : index
    %c0_12 = arith.constant 0 : index
    %31 = vector.load %arg2[%c4, %c0_11, %c0_12] : memref<9x32x1xf32, #tpu.memory_space<vmem>>, vector<1x32x1xf32>
    %32 = vector.shape_cast %31 : vector<1x32x1xf32> to vector<32x1xf32>
    %33 = vector.extract_strided_slice %1 {offsets = [4, 0], sizes = [1, 100], strides = [1, 1]} : vector<9x100xf32> to vector<1x100xf32>
    %34 = vector.broadcast %32 : vector<32x1xf32> to vector<32x100xf32>
    %35 = vector.broadcast %33 : vector<1x100xf32> to vector<32x100xf32>
    %36 = arith.mulf %34, %35 : vector<32x100xf32>
    %37 = arith.addf %30, %36 : vector<32x100xf32>
    %c5 = arith.constant 5 : index
    %c0_13 = arith.constant 0 : index
    %c0_14 = arith.constant 0 : index
    %38 = vector.load %arg2[%c5, %c0_13, %c0_14] : memref<9x32x1xf32, #tpu.memory_space<vmem>>, vector<1x32x1xf32>
    %39 = vector.shape_cast %38 : vector<1x32x1xf32> to vector<32x1xf32>
    %40 = vector.extract_strided_slice %1 {offsets = [5, 0], sizes = [1, 100], strides = [1, 1]} : vector<9x100xf32> to vector<1x100xf32>
    %41 = vector.broadcast %39 : vector<32x1xf32> to vector<32x100xf32>
    %42 = vector.broadcast %40 : vector<1x100xf32> to vector<32x100xf32>
    %43 = arith.mulf %41, %42 : vector<32x100xf32>
    %44 = arith.addf %37, %43 : vector<32x100xf32>
    %c6 = arith.constant 6 : index
    %c0_15 = arith.constant 0 : index
    %c0_16 = arith.constant 0 : index
    %45 = vector.load %arg2[%c6, %c0_15, %c0_16] : memref<9x32x1xf32, #tpu.memory_space<vmem>>, vector<1x32x1xf32>
    %46 = vector.shape_cast %45 : vector<1x32x1xf32> to vector<32x1xf32>
    %47 = vector.extract_strided_slice %1 {offsets = [6, 0], sizes = [1, 100], strides = [1, 1]} : vector<9x100xf32> to vector<1x100xf32>
    %48 = vector.broadcast %46 : vector<32x1xf32> to vector<32x100xf32>
    %49 = vector.broadcast %47 : vector<1x100xf32> to vector<32x100xf32>
    %50 = arith.mulf %48, %49 : vector<32x100xf32>
    %51 = arith.addf %44, %50 : vector<32x100xf32>
    %c7 = arith.constant 7 : index
    %c0_17 = arith.constant 0 : index
    %c0_18 = arith.constant 0 : index
    %52 = vector.load %arg2[%c7, %c0_17, %c0_18] : memref<9x32x1xf32, #tpu.memory_space<vmem>>, vector<1x32x1xf32>
    %53 = vector.shape_cast %52 : vector<1x32x1xf32> to vector<32x1xf32>
    %54 = vector.extract_strided_slice %1 {offsets = [7, 0], sizes = [1, 100], strides = [1, 1]} : vector<9x100xf32> to vector<1x100xf32>
    %55 = vector.broadcast %53 : vector<32x1xf32> to vector<32x100xf32>
    %56 = vector.broadcast %54 : vector<1x100xf32> to vector<32x100xf32>
    %57 = arith.mulf %55, %56 : vector<32x100xf32>
    %58 = arith.addf %51, %57 : vector<32x100xf32>
    %c8 = arith.constant 8 : index
    %c0_19 = arith.constant 0 : index
    %c0_20 = arith.constant 0 : index
    %59 = vector.load %arg2[%c8, %c0_19, %c0_20] : memref<9x32x1xf32, #tpu.memory_space<vmem>>, vector<1x32x1xf32>
    %60 = vector.shape_cast %59 : vector<1x32x1xf32> to vector<32x1xf32>
    %61 = vector.extract_strided_slice %1 {offsets = [8, 0], sizes = [1, 100], strides = [1, 1]} : vector<9x100xf32> to vector<1x100xf32>
    %62 = vector.broadcast %60 : vector<32x1xf32> to vector<32x100xf32>
    %63 = vector.broadcast %61 : vector<1x100xf32> to vector<32x100xf32>
    %64 = arith.mulf %62, %63 : vector<32x100xf32>
    %65 = arith.addf %58, %64 : vector<32x100xf32>
    %c0_21 = arith.constant 0 : index
    %c0_22 = arith.constant 0 : index
    %66 = vector.load %arg3[%c0_21, %c0_22] : memref<32x1xf32, #tpu.memory_space<vmem>>, vector<32x1xf32>
    %67 = vector.broadcast %66 : vector<32x1xf32> to vector<32x100xf32>
    %68 = arith.addf %65, %67 : vector<32x100xf32>
    %cst_23 = arith.constant 0.000000e+00 : f32
    %69 = vector.broadcast %cst_23 : f32 to vector<32x100xf32>
    %70 = arith.maximumf %68, %69 : vector<32x100xf32>
    %71 = arith.truncf %70 : vector<32x100xf32> to vector<32x100xbf16>
    %c0_24 = arith.constant 0 : index
    %c0_25 = arith.constant 0 : index
    %c0_26 = arith.constant 0 : index
    %72 = vector.load %arg4[%c0_24, %c0_25, %c0_26] : memref<4x100x25xbf16, #tpu.memory_space<vmem>>, vector<1x100x25xbf16>
    %73 = vector.shape_cast %72 : vector<1x100x25xbf16> to vector<100x25xbf16>
    %cst_27 = arith.constant dense<0.000000e+00> : vector<32x25xf32>
    %74 = tpu.matmul %71, %73, %cst_27 {dimension_numbers = #tpu.dot_dimension_numbers<[1], [0], [0], [1], [0, 0, 1, 1], [], []>} : vector<32x100xbf16>, vector<100x25xbf16>, vector<32x25xf32> -> vector<32x25xf32>
    %c1_28 = arith.constant 1 : index
    %c0_29 = arith.constant 0 : index
    %c0_30 = arith.constant 0 : index
    %75 = vector.load %arg4[%c1_28, %c0_29, %c0_30] : memref<4x100x25xbf16, #tpu.memory_space<vmem>>, vector<1x100x25xbf16>
    %76 = vector.shape_cast %75 : vector<1x100x25xbf16> to vector<100x25xbf16>
    %cst_31 = arith.constant dense<0.000000e+00> : vector<32x25xf32>
    %77 = tpu.matmul %71, %76, %cst_31 {dimension_numbers = #tpu.dot_dimension_numbers<[1], [0], [0], [1], [0, 0, 1, 1], [], []>} : vector<32x100xbf16>, vector<100x25xbf16>, vector<32x25xf32> -> vector<32x25xf32>
    %78 = arith.maximumf %74, %77 : vector<32x25xf32>
    %c2_32 = arith.constant 2 : index
    %c0_33 = arith.constant 0 : index
    %c0_34 = arith.constant 0 : index
    %79 = vector.load %arg4[%c2_32, %c0_33, %c0_34] : memref<4x100x25xbf16, #tpu.memory_space<vmem>>, vector<1x100x25xbf16>
    %80 = vector.shape_cast %79 : vector<1x100x25xbf16> to vector<100x25xbf16>
    %cst_35 = arith.constant dense<0.000000e+00> : vector<32x25xf32>
    %81 = tpu.matmul %71, %80, %cst_35 {dimension_numbers = #tpu.dot_dimension_numbers<[1], [0], [0], [1], [0, 0, 1, 1], [], []>} : vector<32x100xbf16>, vector<100x25xbf16>, vector<32x25xf32> -> vector<32x25xf32>
    %c3_36 = arith.constant 3 : index
    %c0_37 = arith.constant 0 : index
    %c0_38 = arith.constant 0 : index
    %82 = vector.load %arg4[%c3_36, %c0_37, %c0_38] : memref<4x100x25xbf16, #tpu.memory_space<vmem>>, vector<1x100x25xbf16>
    %83 = vector.shape_cast %82 : vector<1x100x25xbf16> to vector<100x25xbf16>
    %cst_39 = arith.constant dense<0.000000e+00> : vector<32x25xf32>
    %84 = tpu.matmul %71, %83, %cst_39 {dimension_numbers = #tpu.dot_dimension_numbers<[1], [0], [0], [1], [0, 0, 1, 1], [], []>} : vector<32x100xbf16>, vector<100x25xbf16>, vector<32x25xf32> -> vector<32x25xf32>
    %85 = arith.maximumf %81, %84 : vector<32x25xf32>
    %86 = arith.maximumf %78, %85 : vector<32x25xf32>
    %87 = arith.truncf %86 : vector<32x25xf32> to vector<32x25xbf16>
    %c0_40 = arith.constant 0 : index
    %c0_41 = arith.constant 0 : index
    %88 = vector.load %arg5[%c0_40, %c0_41] : memref<144x32xbf16, #tpu.memory_space<vmem>>, vector<144x32xbf16>
    %cst_42 = arith.constant dense<0.000000e+00> : vector<144x25xf32>
    %89 = tpu.matmul %88, %87, %cst_42 {dimension_numbers = #tpu.dot_dimension_numbers<[1], [0], [0], [1], [0, 0, 1, 1], [], []>} : vector<144x32xbf16>, vector<32x25xbf16>, vector<144x25xf32> -> vector<144x25xf32>
    %cst_43 = arith.constant 0.000000e+00 : f32
    %90 = vector.broadcast %cst_43 : f32 to vector<16x9xf32>
    %91 = vector.extract_strided_slice %89 {offsets = [0, 0], sizes = [16, 25], strides = [1, 1]} : vector<144x25xf32> to vector<16x25xf32>
    %92 = arith.truncf %91 : vector<16x25xf32> to vector<16x25xbf16>
    %c0_44 = arith.constant 0 : index
    %c0_45 = arith.constant 0 : index
    %c0_46 = arith.constant 0 : index
    %93 = vector.load %arg6[%c0_44, %c0_45, %c0_46] : memref<9x25x9xbf16, #tpu.memory_space<vmem>>, vector<1x25x9xbf16>
    %94 = vector.shape_cast %93 : vector<1x25x9xbf16> to vector<25x9xbf16>
    %cst_47 = arith.constant dense<0.000000e+00> : vector<16x9xf32>
    %95 = tpu.matmul %92, %94, %cst_47 {dimension_numbers = #tpu.dot_dimension_numbers<[1], [0], [0], [1], [0, 0, 1, 1], [], []>} : vector<16x25xbf16>, vector<25x9xbf16>, vector<16x9xf32> -> vector<16x9xf32>
    %96 = arith.addf %90, %95 : vector<16x9xf32>
    %97 = vector.extract_strided_slice %89 {offsets = [16, 0], sizes = [16, 25], strides = [1, 1]} : vector<144x25xf32> to vector<16x25xf32>
    %98 = arith.truncf %97 : vector<16x25xf32> to vector<16x25xbf16>
    %c1_48 = arith.constant 1 : index
    %c0_49 = arith.constant 0 : index
    %c0_50 = arith.constant 0 : index
    %99 = vector.load %arg6[%c1_48, %c0_49, %c0_50] : memref<9x25x9xbf16, #tpu.memory_space<vmem>>, vector<1x25x9xbf16>
    %100 = vector.shape_cast %99 : vector<1x25x9xbf16> to vector<25x9xbf16>
    %cst_51 = arith.constant dense<0.000000e+00> : vector<16x9xf32>
    %101 = tpu.matmul %98, %100, %cst_51 {dimension_numbers = #tpu.dot_dimension_numbers<[1], [0], [0], [1], [0, 0, 1, 1], [], []>} : vector<16x25xbf16>, vector<25x9xbf16>, vector<16x9xf32> -> vector<16x9xf32>
    %102 = arith.addf %96, %101 : vector<16x9xf32>
    %103 = vector.extract_strided_slice %89 {offsets = [32, 0], sizes = [16, 25], strides = [1, 1]} : vector<144x25xf32> to vector<16x25xf32>
    %104 = arith.truncf %103 : vector<16x25xf32> to vector<16x25xbf16>
    %c2_52 = arith.constant 2 : index
    %c0_53 = arith.constant 0 : index
    %c0_54 = arith.constant 0 : index
    %105 = vector.load %arg6[%c2_52, %c0_53, %c0_54] : memref<9x25x9xbf16, #tpu.memory_space<vmem>>, vector<1x25x9xbf16>
    %106 = vector.shape_cast %105 : vector<1x25x9xbf16> to vector<25x9xbf16>
    %cst_55 = arith.constant dense<0.000000e+00> : vector<16x9xf32>
    %107 = tpu.matmul %104, %106, %cst_55 {dimension_numbers = #tpu.dot_dimension_numbers<[1], [0], [0], [1], [0, 0, 1, 1], [], []>} : vector<16x25xbf16>, vector<25x9xbf16>, vector<16x9xf32> -> vector<16x9xf32>
    %108 = arith.addf %102, %107 : vector<16x9xf32>
    %109 = vector.extract_strided_slice %89 {offsets = [48, 0], sizes = [16, 25], strides = [1, 1]} : vector<144x25xf32> to vector<16x25xf32>
    %110 = arith.truncf %109 : vector<16x25xf32> to vector<16x25xbf16>
    %c3_56 = arith.constant 3 : index
    %c0_57 = arith.constant 0 : index
    %c0_58 = arith.constant 0 : index
    %111 = vector.load %arg6[%c3_56, %c0_57, %c0_58] : memref<9x25x9xbf16, #tpu.memory_space<vmem>>, vector<1x25x9xbf16>
    %112 = vector.shape_cast %111 : vector<1x25x9xbf16> to vector<25x9xbf16>
    %cst_59 = arith.constant dense<0.000000e+00> : vector<16x9xf32>
    %113 = tpu.matmul %110, %112, %cst_59 {dimension_numbers = #tpu.dot_dimension_numbers<[1], [0], [0], [1], [0, 0, 1, 1], [], []>} : vector<16x25xbf16>, vector<25x9xbf16>, vector<16x9xf32> -> vector<16x9xf32>
    %114 = arith.addf %108, %113 : vector<16x9xf32>
    %115 = vector.extract_strided_slice %89 {offsets = [64, 0], sizes = [16, 25], strides = [1, 1]} : vector<144x25xf32> to vector<16x25xf32>
    %116 = arith.truncf %115 : vector<16x25xf32> to vector<16x25xbf16>
    %c4_60 = arith.constant 4 : index
    %c0_61 = arith.constant 0 : index
    %c0_62 = arith.constant 0 : index
    %117 = vector.load %arg6[%c4_60, %c0_61, %c0_62] : memref<9x25x9xbf16, #tpu.memory_space<vmem>>, vector<1x25x9xbf16>
    %118 = vector.shape_cast %117 : vector<1x25x9xbf16> to vector<25x9xbf16>
    %cst_63 = arith.constant dense<0.000000e+00> : vector<16x9xf32>
    %119 = tpu.matmul %116, %118, %cst_63 {dimension_numbers = #tpu.dot_dimension_numbers<[1], [0], [0], [1], [0, 0, 1, 1], [], []>} : vector<16x25xbf16>, vector<25x9xbf16>, vector<16x9xf32> -> vector<16x9xf32>
    %120 = arith.addf %114, %119 : vector<16x9xf32>
    %121 = vector.extract_strided_slice %89 {offsets = [80, 0], sizes = [16, 25], strides = [1, 1]} : vector<144x25xf32> to vector<16x25xf32>
    %122 = arith.truncf %121 : vector<16x25xf32> to vector<16x25xbf16>
    %c5_64 = arith.constant 5 : index
    %c0_65 = arith.constant 0 : index
    %c0_66 = arith.constant 0 : index
    %123 = vector.load %arg6[%c5_64, %c0_65, %c0_66] : memref<9x25x9xbf16, #tpu.memory_space<vmem>>, vector<1x25x9xbf16>
    %124 = vector.shape_cast %123 : vector<1x25x9xbf16> to vector<25x9xbf16>
    %cst_67 = arith.constant dense<0.000000e+00> : vector<16x9xf32>
    %125 = tpu.matmul %122, %124, %cst_67 {dimension_numbers = #tpu.dot_dimension_numbers<[1], [0], [0], [1], [0, 0, 1, 1], [], []>} : vector<16x25xbf16>, vector<25x9xbf16>, vector<16x9xf32> -> vector<16x9xf32>
    %126 = arith.addf %120, %125 : vector<16x9xf32>
    %127 = vector.extract_strided_slice %89 {offsets = [96, 0], sizes = [16, 25], strides = [1, 1]} : vector<144x25xf32> to vector<16x25xf32>
    %128 = arith.truncf %127 : vector<16x25xf32> to vector<16x25xbf16>
    %c6_68 = arith.constant 6 : index
    %c0_69 = arith.constant 0 : index
    %c0_70 = arith.constant 0 : index
    %129 = vector.load %arg6[%c6_68, %c0_69, %c0_70] : memref<9x25x9xbf16, #tpu.memory_space<vmem>>, vector<1x25x9xbf16>
    %130 = vector.shape_cast %129 : vector<1x25x9xbf16> to vector<25x9xbf16>
    %cst_71 = arith.constant dense<0.000000e+00> : vector<16x9xf32>
    %131 = tpu.matmul %128, %130, %cst_71 {dimension_numbers = #tpu.dot_dimension_numbers<[1], [0], [0], [1], [0, 0, 1, 1], [], []>} : vector<16x25xbf16>, vector<25x9xbf16>, vector<16x9xf32> -> vector<16x9xf32>
    %132 = arith.addf %126, %131 : vector<16x9xf32>
    %133 = vector.extract_strided_slice %89 {offsets = [112, 0], sizes = [16, 25], strides = [1, 1]} : vector<144x25xf32> to vector<16x25xf32>
    %134 = arith.truncf %133 : vector<16x25xf32> to vector<16x25xbf16>
    %c7_72 = arith.constant 7 : index
    %c0_73 = arith.constant 0 : index
    %c0_74 = arith.constant 0 : index
    %135 = vector.load %arg6[%c7_72, %c0_73, %c0_74] : memref<9x25x9xbf16, #tpu.memory_space<vmem>>, vector<1x25x9xbf16>
    %136 = vector.shape_cast %135 : vector<1x25x9xbf16> to vector<25x9xbf16>
    %cst_75 = arith.constant dense<0.000000e+00> : vector<16x9xf32>
    %137 = tpu.matmul %134, %136, %cst_75 {dimension_numbers = #tpu.dot_dimension_numbers<[1], [0], [0], [1], [0, 0, 1, 1], [], []>} : vector<16x25xbf16>, vector<25x9xbf16>, vector<16x9xf32> -> vector<16x9xf32>
    %138 = arith.addf %132, %137 : vector<16x9xf32>
    %139 = vector.extract_strided_slice %89 {offsets = [128, 0], sizes = [16, 25], strides = [1, 1]} : vector<144x25xf32> to vector<16x25xf32>
    %140 = arith.truncf %139 : vector<16x25xf32> to vector<16x25xbf16>
    %c8_76 = arith.constant 8 : index
    %c0_77 = arith.constant 0 : index
    %c0_78 = arith.constant 0 : index
    %141 = vector.load %arg6[%c8_76, %c0_77, %c0_78] : memref<9x25x9xbf16, #tpu.memory_space<vmem>>, vector<1x25x9xbf16>
    %142 = vector.shape_cast %141 : vector<1x25x9xbf16> to vector<25x9xbf16>
    %cst_79 = arith.constant dense<0.000000e+00> : vector<16x9xf32>
    %143 = tpu.matmul %140, %142, %cst_79 {dimension_numbers = #tpu.dot_dimension_numbers<[1], [0], [0], [1], [0, 0, 1, 1], [], []>} : vector<16x25xbf16>, vector<25x9xbf16>, vector<16x9xf32> -> vector<16x9xf32>
    %144 = arith.addf %138, %143 : vector<16x9xf32>
    %c0_80 = arith.constant 0 : index
    %c0_81 = arith.constant 0 : index
    %145 = vector.load %arg7[%c0_80, %c0_81] : memref<16x1xf32, #tpu.memory_space<vmem>>, vector<16x1xf32>
    %146 = vector.broadcast %145 : vector<16x1xf32> to vector<16x9xf32>
    %147 = arith.addf %144, %146 : vector<16x9xf32>
    %cst_82 = arith.constant 0.000000e+00 : f32
    %148 = vector.broadcast %cst_82 : f32 to vector<16x9xf32>
    %149 = arith.maximumf %147, %148 : vector<16x9xf32>
    %150 = arith.truncf %149 : vector<16x9xf32> to vector<16x9xbf16>
    %c0_83 = arith.constant 0 : index
    %c0_84 = arith.constant 0 : index
    %c0_85 = arith.constant 0 : index
    %151 = vector.load %arg8[%c0_83, %c0_84, %c0_85] : memref<4x9x4xbf16, #tpu.memory_space<vmem>>, vector<1x9x4xbf16>
    %152 = vector.shape_cast %151 : vector<1x9x4xbf16> to vector<9x4xbf16>
    %cst_86 = arith.constant dense<0.000000e+00> : vector<16x4xf32>
    %153 = tpu.matmul %150, %152, %cst_86 {dimension_numbers = #tpu.dot_dimension_numbers<[1], [0], [0], [1], [0, 0, 1, 1], [], []>} : vector<16x9xbf16>, vector<9x4xbf16>, vector<16x4xf32> -> vector<16x4xf32>
    %c1_87 = arith.constant 1 : index
    %c0_88 = arith.constant 0 : index
    %c0_89 = arith.constant 0 : index
    %154 = vector.load %arg8[%c1_87, %c0_88, %c0_89] : memref<4x9x4xbf16, #tpu.memory_space<vmem>>, vector<1x9x4xbf16>
    %155 = vector.shape_cast %154 : vector<1x9x4xbf16> to vector<9x4xbf16>
    %cst_90 = arith.constant dense<0.000000e+00> : vector<16x4xf32>
    %156 = tpu.matmul %150, %155, %cst_90 {dimension_numbers = #tpu.dot_dimension_numbers<[1], [0], [0], [1], [0, 0, 1, 1], [], []>} : vector<16x9xbf16>, vector<9x4xbf16>, vector<16x4xf32> -> vector<16x4xf32>
    %157 = arith.maximumf %153, %156 : vector<16x4xf32>
    %c2_91 = arith.constant 2 : index
    %c0_92 = arith.constant 0 : index
    %c0_93 = arith.constant 0 : index
    %158 = vector.load %arg8[%c2_91, %c0_92, %c0_93] : memref<4x9x4xbf16, #tpu.memory_space<vmem>>, vector<1x9x4xbf16>
    %159 = vector.shape_cast %158 : vector<1x9x4xbf16> to vector<9x4xbf16>
    %cst_94 = arith.constant dense<0.000000e+00> : vector<16x4xf32>
    %160 = tpu.matmul %150, %159, %cst_94 {dimension_numbers = #tpu.dot_dimension_numbers<[1], [0], [0], [1], [0, 0, 1, 1], [], []>} : vector<16x9xbf16>, vector<9x4xbf16>, vector<16x4xf32> -> vector<16x4xf32>
    %c3_95 = arith.constant 3 : index
    %c0_96 = arith.constant 0 : index
    %c0_97 = arith.constant 0 : index
    %161 = vector.load %arg8[%c3_95, %c0_96, %c0_97] : memref<4x9x4xbf16, #tpu.memory_space<vmem>>, vector<1x9x4xbf16>
    %162 = vector.shape_cast %161 : vector<1x9x4xbf16> to vector<9x4xbf16>
    %cst_98 = arith.constant dense<0.000000e+00> : vector<16x4xf32>
    %163 = tpu.matmul %150, %162, %cst_98 {dimension_numbers = #tpu.dot_dimension_numbers<[1], [0], [0], [1], [0, 0, 1, 1], [], []>} : vector<16x9xbf16>, vector<9x4xbf16>, vector<16x4xf32> -> vector<16x4xf32>
    %164 = arith.maximumf %160, %163 : vector<16x4xf32>
    %165 = arith.maximumf %157, %164 : vector<16x4xf32>
    %c0_99 = arith.constant 0 : index
    %c0_100 = arith.constant 0 : index
    %166 = vector.load %arg9[%c0_99, %c0_100] : memref<16x4xf32, #tpu.memory_space<vmem>>, vector<16x4xf32>
    %167 = arith.mulf %165, %166 : vector<16x4xf32>
    %cst_101 = arith.constant dense<0.000000e+00> : vector<16xf32>
    %168 = vector.multi_reduction <add>, %167, %cst_101 [1] : vector<16x4xf32> to vector<16xf32>
    %169 = vector.shape_cast %168 : vector<16xf32> to vector<16x1xf32>
    %cst_102 = arith.constant dense<0.000000e+00> : vector<1xf32>
    %170 = vector.multi_reduction <add>, %169, %cst_102 [0] : vector<16x1xf32> to vector<1xf32>
    %171 = vector.shape_cast %170 : vector<1xf32> to vector<1x1xf32>
    %c0_103 = arith.constant 0 : index
    %c0_104 = arith.constant 0 : index
    %172 = vector.load %arg10[%c0_103, %c0_104] : memref<1x1xf32, #tpu.memory_space<vmem>>, vector<1x1xf32>
    %173 = arith.addf %171, %172 : vector<1x1xf32>
    %cst_105 = arith.constant 0.000000e+00 : f32
    %174 = vector.broadcast %cst_105 : f32 to vector<1x1xf32>
    %175 = arith.maximumf %173, %174 : vector<1x1xf32>
    %176 = math.absf %173 : vector<1x1xf32>
    %cst_106 = arith.constant 0.000000e+00 : f32
    %177 = vector.broadcast %cst_106 : f32 to vector<1x1xf32>
    %178 = arith.subf %177, %176 : vector<1x1xf32>
    %179 = math.exp %178 : vector<1x1xf32>
    %cst_107 = arith.constant 1.000000e+00 : f32
    %180 = vector.broadcast %cst_107 : f32 to vector<1x1xf32>
    %181 = arith.addf %180, %179 : vector<1x1xf32>
    %182 = math.log %181 : vector<1x1xf32>
    %183 = arith.addf %175, %182 : vector<1x1xf32>
    %c0_108 = arith.constant 0 : index
    %c0_109 = arith.constant 0 : index
    %c0_110 = arith.constant 0 : index
    %184 = vector.load %arg20[%c0_108, %c0_109, %c0_110] : memref<1x1x1xf32, #tpu.memory_space<vmem>>, vector<1x1x1xf32>
    %185 = vector.shape_cast %184 : vector<1x1x1xf32> to vector<1x1xf32>
    %186 = vector.shape_cast %183 : vector<1x1xf32> to vector<1x1x1xf32>
    tpu.vector_store %arg20[%c0_108, %c0_109, %c0_110], %186 {strides = array<i32>} : memref<1x1x1xf32, #tpu.memory_space<vmem>>, vector<1x1x1xf32>,
    %187 = arith.truncf %165 : vector<16x4xf32> to vector<16x4xbf16>
    %c0_111 = arith.constant 0 : index
    %c0_112 = arith.constant 0 : index
    %188 = vector.load %arg11[%c0_111, %c0_112] : memref<144x16xbf16, #tpu.memory_space<vmem>>, vector<144x16xbf16>
    %cst_113 = arith.constant dense<0.000000e+00> : vector<144x4xf32>
    %189 = tpu.matmul %188, %187, %cst_113 {dimension_numbers = #tpu.dot_dimension_numbers<[1], [0], [0], [1], [0, 0, 1, 1], [], []>} : vector<144x16xbf16>, vector<16x4xbf16>, vector<144x4xf32> -> vector<144x4xf32>
    %cst_114 = arith.constant 0.000000e+00 : f32
    %190 = vector.broadcast %cst_114 : f32 to vector<16x25xf32>
    %191 = vector.extract_strided_slice %189 {offsets = [0, 0], sizes = [16, 4], strides = [1, 1]} : vector<144x4xf32> to vector<16x4xf32>
    %192 = arith.truncf %191 : vector<16x4xf32> to vector<16x4xbf16>
    %c0_115 = arith.constant 0 : index
    %c0_116 = arith.constant 0 : index
    %c0_117 = arith.constant 0 : index
    %193 = vector.load %arg12[%c0_115, %c0_116, %c0_117] : memref<9x4x25xbf16, #tpu.memory_space<vmem>>, vector<1x4x25xbf16>
    %194 = vector.shape_cast %193 : vector<1x4x25xbf16> to vector<4x25xbf16>
    %cst_118 = arith.constant dense<0.000000e+00> : vector<16x25xf32>
    %195 = tpu.matmul %192, %194, %cst_118 {dimension_numbers = #tpu.dot_dimension_numbers<[1], [0], [0], [1], [0, 0, 1, 1], [], []>} : vector<16x4xbf16>, vector<4x25xbf16>, vector<16x25xf32> -> vector<16x25xf32>
    %196 = arith.addf %190, %195 : vector<16x25xf32>
    %197 = vector.extract_strided_slice %189 {offsets = [16, 0], sizes = [16, 4], strides = [1, 1]} : vector<144x4xf32> to vector<16x4xf32>
    %198 = arith.truncf %197 : vector<16x4xf32> to vector<16x4xbf16>
    %c1_119 = arith.constant 1 : index
    %c0_120 = arith.constant 0 : index
    %c0_121 = arith.constant 0 : index
    %199 = vector.load %arg12[%c1_119, %c0_120, %c0_121] : memref<9x4x25xbf16, #tpu.memory_space<vmem>>, vector<1x4x25xbf16>
    %200 = vector.shape_cast %199 : vector<1x4x25xbf16> to vector<4x25xbf16>
    %cst_122 = arith.constant dense<0.000000e+00> : vector<16x25xf32>
    %201 = tpu.matmul %198, %200, %cst_122 {dimension_numbers = #tpu.dot_dimension_numbers<[1], [0], [0], [1], [0, 0, 1, 1], [], []>} : vector<16x4xbf16>, vector<4x25xbf16>, vector<16x25xf32> -> vector<16x25xf32>
    %202 = arith.addf %196, %201 : vector<16x25xf32>
    %203 = vector.extract_strided_slice %189 {offsets = [32, 0], sizes = [16, 4], strides = [1, 1]} : vector<144x4xf32> to vector<16x4xf32>
    %204 = arith.truncf %203 : vector<16x4xf32> to vector<16x4xbf16>
    %c2_123 = arith.constant 2 : index
    %c0_124 = arith.constant 0 : index
    %c0_125 = arith.constant 0 : index
    %205 = vector.load %arg12[%c2_123, %c0_124, %c0_125] : memref<9x4x25xbf16, #tpu.memory_space<vmem>>, vector<1x4x25xbf16>
    %206 = vector.shape_cast %205 : vector<1x4x25xbf16> to vector<4x25xbf16>
    %cst_126 = arith.constant dense<0.000000e+00> : vector<16x25xf32>
    %207 = tpu.matmul %204, %206, %cst_126 {dimension_numbers = #tpu.dot_dimension_numbers<[1], [0], [0], [1], [0, 0, 1, 1], [], []>} : vector<16x4xbf16>, vector<4x25xbf16>, vector<16x25xf32> -> vector<16x25xf32>
    %208 = arith.addf %202, %207 : vector<16x25xf32>
    %209 = vector.extract_strided_slice %189 {offsets = [48, 0], sizes = [16, 4], strides = [1, 1]} : vector<144x4xf32> to vector<16x4xf32>
    %210 = arith.truncf %209 : vector<16x4xf32> to vector<16x4xbf16>
    %c3_127 = arith.constant 3 : index
    %c0_128 = arith.constant 0 : index
    %c0_129 = arith.constant 0 : index
    %211 = vector.load %arg12[%c3_127, %c0_128, %c0_129] : memref<9x4x25xbf16, #tpu.memory_space<vmem>>, vector<1x4x25xbf16>
    %212 = vector.shape_cast %211 : vector<1x4x25xbf16> to vector<4x25xbf16>
    %cst_130 = arith.constant dense<0.000000e+00> : vector<16x25xf32>
    %213 = tpu.matmul %210, %212, %cst_130 {dimension_numbers = #tpu.dot_dimension_numbers<[1], [0], [0], [1], [0, 0, 1, 1], [], []>} : vector<16x4xbf16>, vector<4x25xbf16>, vector<16x25xf32> -> vector<16x25xf32>
    %214 = arith.addf %208, %213 : vector<16x25xf32>
    %215 = vector.extract_strided_slice %189 {offsets = [64, 0], sizes = [16, 4], strides = [1, 1]} : vector<144x4xf32> to vector<16x4xf32>
    %216 = arith.truncf %215 : vector<16x4xf32> to vector<16x4xbf16>
    %c4_131 = arith.constant 4 : index
    %c0_132 = arith.constant 0 : index
    %c0_133 = arith.constant 0 : index
    %217 = vector.load %arg12[%c4_131, %c0_132, %c0_133] : memref<9x4x25xbf16, #tpu.memory_space<vmem>>, vector<1x4x25xbf16>
    %218 = vector.shape_cast %217 : vector<1x4x25xbf16> to vector<4x25xbf16>
    %cst_134 = arith.constant dense<0.000000e+00> : vector<16x25xf32>
    %219 = tpu.matmul %216, %218, %cst_134 {dimension_numbers = #tpu.dot_dimension_numbers<[1], [0], [0], [1], [0, 0, 1, 1], [], []>} : vector<16x4xbf16>, vector<4x25xbf16>, vector<16x25xf32> -> vector<16x25xf32>
    %220 = arith.addf %214, %219 : vector<16x25xf32>
    %221 = vector.extract_strided_slice %189 {offsets = [80, 0], sizes = [16, 4], strides = [1, 1]} : vector<144x4xf32> to vector<16x4xf32>
    %222 = arith.truncf %221 : vector<16x4xf32> to vector<16x4xbf16>
    %c5_135 = arith.constant 5 : index
    %c0_136 = arith.constant 0 : index
    %c0_137 = arith.constant 0 : index
    %223 = vector.load %arg12[%c5_135, %c0_136, %c0_137] : memref<9x4x25xbf16, #tpu.memory_space<vmem>>, vector<1x4x25xbf16>
    %224 = vector.shape_cast %223 : vector<1x4x25xbf16> to vector<4x25xbf16>
    %cst_138 = arith.constant dense<0.000000e+00> : vector<16x25xf32>
    %225 = tpu.matmul %222, %224, %cst_138 {dimension_numbers = #tpu.dot_dimension_numbers<[1], [0], [0], [1], [0, 0, 1, 1], [], []>} : vector<16x4xbf16>, vector<4x25xbf16>, vector<16x25xf32> -> vector<16x25xf32>
    %226 = arith.addf %220, %225 : vector<16x25xf32>
    %227 = vector.extract_strided_slice %189 {offsets = [96, 0], sizes = [16, 4], strides = [1, 1]} : vector<144x4xf32> to vector<16x4xf32>
    %228 = arith.truncf %227 : vector<16x4xf32> to vector<16x4xbf16>
    %c6_139 = arith.constant 6 : index
    %c0_140 = arith.constant 0 : index
    %c0_141 = arith.constant 0 : index
    %229 = vector.load %arg12[%c6_139, %c0_140, %c0_141] : memref<9x4x25xbf16, #tpu.memory_space<vmem>>, vector<1x4x25xbf16>
    %230 = vector.shape_cast %229 : vector<1x4x25xbf16> to vector<4x25xbf16>
    %cst_142 = arith.constant dense<0.000000e+00> : vector<16x25xf32>
    %231 = tpu.matmul %228, %230, %cst_142 {dimension_numbers = #tpu.dot_dimension_numbers<[1], [0], [0], [1], [0, 0, 1, 1], [], []>} : vector<16x4xbf16>, vector<4x25xbf16>, vector<16x25xf32> -> vector<16x25xf32>
    %232 = arith.addf %226, %231 : vector<16x25xf32>
    %233 = vector.extract_strided_slice %189 {offsets = [112, 0], sizes = [16, 4], strides = [1, 1]} : vector<144x4xf32> to vector<16x4xf32>
    %234 = arith.truncf %233 : vector<16x4xf32> to vector<16x4xbf16>
    %c7_143 = arith.constant 7 : index
    %c0_144 = arith.constant 0 : index
    %c0_145 = arith.constant 0 : index
    %235 = vector.load %arg12[%c7_143, %c0_144, %c0_145] : memref<9x4x25xbf16, #tpu.memory_space<vmem>>, vector<1x4x25xbf16>
    %236 = vector.shape_cast %235 : vector<1x4x25xbf16> to vector<4x25xbf16>
    %cst_146 = arith.constant dense<0.000000e+00> : vector<16x25xf32>
    %237 = tpu.matmul %234, %236, %cst_146 {dimension_numbers = #tpu.dot_dimension_numbers<[1], [0], [0], [1], [0, 0, 1, 1], [], []>} : vector<16x4xbf16>, vector<4x25xbf16>, vector<16x25xf32> -> vector<16x25xf32>
    %238 = arith.addf %232, %237 : vector<16x25xf32>
    %239 = vector.extract_strided_slice %189 {offsets = [128, 0], sizes = [16, 4], strides = [1, 1]} : vector<144x4xf32> to vector<16x4xf32>
    %240 = arith.truncf %239 : vector<16x4xf32> to vector<16x4xbf16>
    %c8_147 = arith.constant 8 : index
    %c0_148 = arith.constant 0 : index
    %c0_149 = arith.constant 0 : index
    %241 = vector.load %arg12[%c8_147, %c0_148, %c0_149] : memref<9x4x25xbf16, #tpu.memory_space<vmem>>, vector<1x4x25xbf16>
    %242 = vector.shape_cast %241 : vector<1x4x25xbf16> to vector<4x25xbf16>
    %cst_150 = arith.constant dense<0.000000e+00> : vector<16x25xf32>
    %243 = tpu.matmul %240, %242, %cst_150 {dimension_numbers = #tpu.dot_dimension_numbers<[1], [0], [0], [1], [0, 0, 1, 1], [], []>} : vector<16x4xbf16>, vector<4x25xbf16>, vector<16x25xf32> -> vector<16x25xf32>
    %244 = arith.addf %238, %243 : vector<16x25xf32>
    %c0_151 = arith.constant 0 : index
    %c0_152 = arith.constant 0 : index
    %245 = vector.load %arg13[%c0_151, %c0_152] : memref<16x1xf32, #tpu.memory_space<vmem>>, vector<16x1xf32>
    %246 = vector.broadcast %245 : vector<16x1xf32> to vector<16x25xf32>
    %247 = arith.addf %244, %246 : vector<16x25xf32>
    %cst_153 = arith.constant 0.000000e+00 : f32
    %248 = vector.broadcast %cst_153 : f32 to vector<16x25xf32>
    %249 = arith.maximumf %247, %248 : vector<16x25xf32>
    %250 = arith.truncf %249 : vector<16x25xf32> to vector<16x25xbf16>
    %c0_154 = arith.constant 0 : index
    %c0_155 = arith.constant 0 : index
    %251 = vector.load %arg14[%c0_154, %c0_155] : memref<200x16xbf16, #tpu.memory_space<vmem>>, vector<200x16xbf16>
    %cst_156 = arith.constant dense<0.000000e+00> : vector<200x25xf32>
    %252 = tpu.matmul %251, %250, %cst_156 {dimension_numbers = #tpu.dot_dimension_numbers<[1], [0], [0], [1], [0, 0, 1, 1], [], []>} : vector<200x16xbf16>, vector<16x25xbf16>, vector<200x25xf32> -> vector<200x25xf32>
    %cst_157 = arith.constant 0.000000e+00 : f32
    %253 = vector.broadcast %cst_157 : f32 to vector<8x225xf32>
    %254 = vector.extract_strided_slice %252 {offsets = [0, 0], sizes = [8, 25], strides = [1, 1]} : vector<200x25xf32> to vector<8x25xf32>
    %255 = arith.truncf %254 : vector<8x25xf32> to vector<8x25xbf16>
    %c0_158 = arith.constant 0 : index
    %c0_159 = arith.constant 0 : index
    %c0_160 = arith.constant 0 : index
    %256 = vector.load %arg15[%c0_158, %c0_159, %c0_160] : memref<25x25x225xbf16, #tpu.memory_space<vmem>>, vector<1x25x225xbf16>
    %257 = vector.shape_cast %256 : vector<1x25x225xbf16> to vector<25x225xbf16>
    %cst_161 = arith.constant dense<0.000000e+00> : vector<8x225xf32>
    %258 = tpu.matmul %255, %257, %cst_161 {dimension_numbers = #tpu.dot_dimension_numbers<[1], [0], [0], [1], [0, 0, 1, 1], [], []>} : vector<8x25xbf16>, vector<25x225xbf16>, vector<8x225xf32> -> vector<8x225xf32>
    %259 = arith.addf %253, %258 : vector<8x225xf32>
    %260 = vector.extract_strided_slice %252 {offsets = [8, 0], sizes = [8, 25], strides = [1, 1]} : vector<200x25xf32> to vector<8x25xf32>
    %261 = arith.truncf %260 : vector<8x25xf32> to vector<8x25xbf16>
    %c1_162 = arith.constant 1 : index
    %c0_163 = arith.constant 0 : index
    %c0_164 = arith.constant 0 : index
    %262 = vector.load %arg15[%c1_162, %c0_163, %c0_164] : memref<25x25x225xbf16, #tpu.memory_space<vmem>>, vector<1x25x225xbf16>
    %263 = vector.shape_cast %262 : vector<1x25x225xbf16> to vector<25x225xbf16>
    %cst_165 = arith.constant dense<0.000000e+00> : vector<8x225xf32>
    %264 = tpu.matmul %261, %263, %cst_165 {dimension_numbers = #tpu.dot_dimension_numbers<[1], [0], [0], [1], [0, 0, 1, 1], [], []>} : vector<8x25xbf16>, vector<25x225xbf16>, vector<8x225xf32> -> vector<8x225xf32>
    %265 = arith.addf %259, %264 : vector<8x225xf32>
    %266 = vector.extract_strided_slice %252 {offsets = [16, 0], sizes = [8, 25], strides = [1, 1]} : vector<200x25xf32> to vector<8x25xf32>
    %267 = arith.truncf %266 : vector<8x25xf32> to vector<8x25xbf16>
    %c2_166 = arith.constant 2 : index
    %c0_167 = arith.constant 0 : index
    %c0_168 = arith.constant 0 : index
    %268 = vector.load %arg15[%c2_166, %c0_167, %c0_168] : memref<25x25x225xbf16, #tpu.memory_space<vmem>>, vector<1x25x225xbf16>
    %269 = vector.shape_cast %268 : vector<1x25x225xbf16> to vector<25x225xbf16>
    %cst_169 = arith.constant dense<0.000000e+00> : vector<8x225xf32>
    %270 = tpu.matmul %267, %269, %cst_169 {dimension_numbers = #tpu.dot_dimension_numbers<[1], [0], [0], [1], [0, 0, 1, 1], [], []>} : vector<8x25xbf16>, vector<25x225xbf16>, vector<8x225xf32> -> vector<8x225xf32>
    %271 = arith.addf %265, %270 : vector<8x225xf32>
    %272 = vector.extract_strided_slice %252 {offsets = [24, 0], sizes = [8, 25], strides = [1, 1]} : vector<200x25xf32> to vector<8x25xf32>
    %273 = arith.truncf %272 : vector<8x25xf32> to vector<8x25xbf16>
    %c3_170 = arith.constant 3 : index
    %c0_171 = arith.constant 0 : index
    %c0_172 = arith.constant 0 : index
    %274 = vector.load %arg15[%c3_170, %c0_171, %c0_172] : memref<25x25x225xbf16, #tpu.memory_space<vmem>>, vector<1x25x225xbf16>
    %275 = vector.shape_cast %274 : vector<1x25x225xbf16> to vector<25x225xbf16>
    %cst_173 = arith.constant dense<0.000000e+00> : vector<8x225xf32>
    %276 = tpu.matmul %273, %275, %cst_173 {dimension_numbers = #tpu.dot_dimension_numbers<[1], [0], [0], [1], [0, 0, 1, 1], [], []>} : vector<8x25xbf16>, vector<25x225xbf16>, vector<8x225xf32> -> vector<8x225xf32>
    %277 = arith.addf %271, %276 : vector<8x225xf32>
    %278 = vector.extract_strided_slice %252 {offsets = [32, 0], sizes = [8, 25], strides = [1, 1]} : vector<200x25xf32> to vector<8x25xf32>
    %279 = arith.truncf %278 : vector<8x25xf32> to vector<8x25xbf16>
    %c4_174 = arith.constant 4 : index
    %c0_175 = arith.constant 0 : index
    %c0_176 = arith.constant 0 : index
    %280 = vector.load %arg15[%c4_174, %c0_175, %c0_176] : memref<25x25x225xbf16, #tpu.memory_space<vmem>>, vector<1x25x225xbf16>
    %281 = vector.shape_cast %280 : vector<1x25x225xbf16> to vector<25x225xbf16>
    %cst_177 = arith.constant dense<0.000000e+00> : vector<8x225xf32>
    %282 = tpu.matmul %279, %281, %cst_177 {dimension_numbers = #tpu.dot_dimension_numbers<[1], [0], [0], [1], [0, 0, 1, 1], [], []>} : vector<8x25xbf16>, vector<25x225xbf16>, vector<8x225xf32> -> vector<8x225xf32>
    %283 = arith.addf %277, %282 : vector<8x225xf32>
    %284 = vector.extract_strided_slice %252 {offsets = [40, 0], sizes = [8, 25], strides = [1, 1]} : vector<200x25xf32> to vector<8x25xf32>
    %285 = arith.truncf %284 : vector<8x25xf32> to vector<8x25xbf16>
    %c5_178 = arith.constant 5 : index
    %c0_179 = arith.constant 0 : index
    %c0_180 = arith.constant 0 : index
    %286 = vector.load %arg15[%c5_178, %c0_179, %c0_180] : memref<25x25x225xbf16, #tpu.memory_space<vmem>>, vector<1x25x225xbf16>
    %287 = vector.shape_cast %286 : vector<1x25x225xbf16> to vector<25x225xbf16>
    %cst_181 = arith.constant dense<0.000000e+00> : vector<8x225xf32>
    %288 = tpu.matmul %285, %287, %cst_181 {dimension_numbers = #tpu.dot_dimension_numbers<[1], [0], [0], [1], [0, 0, 1, 1], [], []>} : vector<8x25xbf16>, vector<25x225xbf16>, vector<8x225xf32> -> vector<8x225xf32>
    %289 = arith.addf %283, %288 : vector<8x225xf32>
    %290 = vector.extract_strided_slice %252 {offsets = [48, 0], sizes = [8, 25], strides = [1, 1]} : vector<200x25xf32> to vector<8x25xf32>
    %291 = arith.truncf %290 : vector<8x25xf32> to vector<8x25xbf16>
    %c6_182 = arith.constant 6 : index
    %c0_183 = arith.constant 0 : index
    %c0_184 = arith.constant 0 : index
    %292 = vector.load %arg15[%c6_182, %c0_183, %c0_184] : memref<25x25x225xbf16, #tpu.memory_space<vmem>>, vector<1x25x225xbf16>
    %293 = vector.shape_cast %292 : vector<1x25x225xbf16> to vector<25x225xbf16>
    %cst_185 = arith.constant dense<0.000000e+00> : vector<8x225xf32>
    %294 = tpu.matmul %291, %293, %cst_185 {dimension_numbers = #tpu.dot_dimension_numbers<[1], [0], [0], [1], [0, 0, 1, 1], [], []>} : vector<8x25xbf16>, vector<25x225xbf16>, vector<8x225xf32> -> vector<8x225xf32>
    %295 = arith.addf %289, %294 : vector<8x225xf32>
    %296 = vector.extract_strided_slice %252 {offsets = [56, 0], sizes = [8, 25], strides = [1, 1]} : vector<200x25xf32> to vector<8x25xf32>
    %297 = arith.truncf %296 : vector<8x25xf32> to vector<8x25xbf16>
    %c7_186 = arith.constant 7 : index
    %c0_187 = arith.constant 0 : index
    %c0_188 = arith.constant 0 : index
    %298 = vector.load %arg15[%c7_186, %c0_187, %c0_188] : memref<25x25x225xbf16, #tpu.memory_space<vmem>>, vector<1x25x225xbf16>
    %299 = vector.shape_cast %298 : vector<1x25x225xbf16> to vector<25x225xbf16>
    %cst_189 = arith.constant dense<0.000000e+00> : vector<8x225xf32>
    %300 = tpu.matmul %297, %299, %cst_189 {dimension_numbers = #tpu.dot_dimension_numbers<[1], [0], [0], [1], [0, 0, 1, 1], [], []>} : vector<8x25xbf16>, vector<25x225xbf16>, vector<8x225xf32> -> vector<8x225xf32>
    %301 = arith.addf %295, %300 : vector<8x225xf32>
    %302 = vector.extract_strided_slice %252 {offsets = [64, 0], sizes = [8, 25], strides = [1, 1]} : vector<200x25xf32> to vector<8x25xf32>
    %303 = arith.truncf %302 : vector<8x25xf32> to vector<8x25xbf16>
    %c8_190 = arith.constant 8 : index
    %c0_191 = arith.constant 0 : index
    %c0_192 = arith.constant 0 : index
    %304 = vector.load %arg15[%c8_190, %c0_191, %c0_192] : memref<25x25x225xbf16, #tpu.memory_space<vmem>>, vector<1x25x225xbf16>
    %305 = vector.shape_cast %304 : vector<1x25x225xbf16> to vector<25x225xbf16>
    %cst_193 = arith.constant dense<0.000000e+00> : vector<8x225xf32>
    %306 = tpu.matmul %303, %305, %cst_193 {dimension_numbers = #tpu.dot_dimension_numbers<[1], [0], [0], [1], [0, 0, 1, 1], [], []>} : vector<8x25xbf16>, vector<25x225xbf16>, vector<8x225xf32> -> vector<8x225xf32>
    %307 = arith.addf %301, %306 : vector<8x225xf32>
    %308 = vector.extract_strided_slice %252 {offsets = [72, 0], sizes = [8, 25], strides = [1, 1]} : vector<200x25xf32> to vector<8x25xf32>
    %309 = arith.truncf %308 : vector<8x25xf32> to vector<8x25xbf16>
    %c9 = arith.constant 9 : index
    %c0_194 = arith.constant 0 : index
    %c0_195 = arith.constant 0 : index
    %310 = vector.load %arg15[%c9, %c0_194, %c0_195] : memref<25x25x225xbf16, #tpu.memory_space<vmem>>, vector<1x25x225xbf16>
    %311 = vector.shape_cast %310 : vector<1x25x225xbf16> to vector<25x225xbf16>
    %cst_196 = arith.constant dense<0.000000e+00> : vector<8x225xf32>
    %312 = tpu.matmul %309, %311, %cst_196 {dimension_numbers = #tpu.dot_dimension_numbers<[1], [0], [0], [1], [0, 0, 1, 1], [], []>} : vector<8x25xbf16>, vector<25x225xbf16>, vector<8x225xf32> -> vector<8x225xf32>
    %313 = arith.addf %307, %312 : vector<8x225xf32>
    %314 = vector.extract_strided_slice %252 {offsets = [80, 0], sizes = [8, 25], strides = [1, 1]} : vector<200x25xf32> to vector<8x25xf32>
    %315 = arith.truncf %314 : vector<8x25xf32> to vector<8x25xbf16>
    %c10 = arith.constant 10 : index
    %c0_197 = arith.constant 0 : index
    %c0_198 = arith.constant 0 : index
    %316 = vector.load %arg15[%c10, %c0_197, %c0_198] : memref<25x25x225xbf16, #tpu.memory_space<vmem>>, vector<1x25x225xbf16>
    %317 = vector.shape_cast %316 : vector<1x25x225xbf16> to vector<25x225xbf16>
    %cst_199 = arith.constant dense<0.000000e+00> : vector<8x225xf32>
    %318 = tpu.matmul %315, %317, %cst_199 {dimension_numbers = #tpu.dot_dimension_numbers<[1], [0], [0], [1], [0, 0, 1, 1], [], []>} : vector<8x25xbf16>, vector<25x225xbf16>, vector<8x225xf32> -> vector<8x225xf32>
    %319 = arith.addf %313, %318 : vector<8x225xf32>
    %320 = vector.extract_strided_slice %252 {offsets = [88, 0], sizes = [8, 25], strides = [1, 1]} : vector<200x25xf32> to vector<8x25xf32>
    %321 = arith.truncf %320 : vector<8x25xf32> to vector<8x25xbf16>
    %c11 = arith.constant 11 : index
    %c0_200 = arith.constant 0 : index
    %c0_201 = arith.constant 0 : index
    %322 = vector.load %arg15[%c11, %c0_200, %c0_201] : memref<25x25x225xbf16, #tpu.memory_space<vmem>>, vector<1x25x225xbf16>
    %323 = vector.shape_cast %322 : vector<1x25x225xbf16> to vector<25x225xbf16>
    %cst_202 = arith.constant dense<0.000000e+00> : vector<8x225xf32>
    %324 = tpu.matmul %321, %323, %cst_202 {dimension_numbers = #tpu.dot_dimension_numbers<[1], [0], [0], [1], [0, 0, 1, 1], [], []>} : vector<8x25xbf16>, vector<25x225xbf16>, vector<8x225xf32> -> vector<8x225xf32>
    %325 = arith.addf %319, %324 : vector<8x225xf32>
    %326 = vector.extract_strided_slice %252 {offsets = [96, 0], sizes = [8, 25], strides = [1, 1]} : vector<200x25xf32> to vector<8x25xf32>
    %327 = arith.truncf %326 : vector<8x25xf32> to vector<8x25xbf16>
    %c12 = arith.constant 12 : index
    %c0_203 = arith.constant 0 : index
    %c0_204 = arith.constant 0 : index
    %328 = vector.load %arg15[%c12, %c0_203, %c0_204] : memref<25x25x225xbf16, #tpu.memory_space<vmem>>, vector<1x25x225xbf16>
    %329 = vector.shape_cast %328 : vector<1x25x225xbf16> to vector<25x225xbf16>
    %cst_205 = arith.constant dense<0.000000e+00> : vector<8x225xf32>
    %330 = tpu.matmul %327, %329, %cst_205 {dimension_numbers = #tpu.dot_dimension_numbers<[1], [0], [0], [1], [0, 0, 1, 1], [], []>} : vector<8x25xbf16>, vector<25x225xbf16>, vector<8x225xf32> -> vector<8x225xf32>
    %331 = arith.addf %325, %330 : vector<8x225xf32>
    %332 = vector.extract_strided_slice %252 {offsets = [104, 0], sizes = [8, 25], strides = [1, 1]} : vector<200x25xf32> to vector<8x25xf32>
    %333 = arith.truncf %332 : vector<8x25xf32> to vector<8x25xbf16>
    %c13 = arith.constant 13 : index
    %c0_206 = arith.constant 0 : index
    %c0_207 = arith.constant 0 : index
    %334 = vector.load %arg15[%c13, %c0_206, %c0_207] : memref<25x25x225xbf16, #tpu.memory_space<vmem>>, vector<1x25x225xbf16>
    %335 = vector.shape_cast %334 : vector<1x25x225xbf16> to vector<25x225xbf16>
    %cst_208 = arith.constant dense<0.000000e+00> : vector<8x225xf32>
    %336 = tpu.matmul %333, %335, %cst_208 {dimension_numbers = #tpu.dot_dimension_numbers<[1], [0], [0], [1], [0, 0, 1, 1], [], []>} : vector<8x25xbf16>, vector<25x225xbf16>, vector<8x225xf32> -> vector<8x225xf32>
    %337 = arith.addf %331, %336 : vector<8x225xf32>
    %338 = vector.extract_strided_slice %252 {offsets = [112, 0], sizes = [8, 25], strides = [1, 1]} : vector<200x25xf32> to vector<8x25xf32>
    %339 = arith.truncf %338 : vector<8x25xf32> to vector<8x25xbf16>
    %c14 = arith.constant 14 : index
    %c0_209 = arith.constant 0 : index
    %c0_210 = arith.constant 0 : index
    %340 = vector.load %arg15[%c14, %c0_209, %c0_210] : memref<25x25x225xbf16, #tpu.memory_space<vmem>>, vector<1x25x225xbf16>
    %341 = vector.shape_cast %340 : vector<1x25x225xbf16> to vector<25x225xbf16>
    %cst_211 = arith.constant dense<0.000000e+00> : vector<8x225xf32>
    %342 = tpu.matmul %339, %341, %cst_211 {dimension_numbers = #tpu.dot_dimension_numbers<[1], [0], [0], [1], [0, 0, 1, 1], [], []>} : vector<8x25xbf16>, vector<25x225xbf16>, vector<8x225xf32> -> vector<8x225xf32>
    %343 = arith.addf %337, %342 : vector<8x225xf32>
    %344 = vector.extract_strided_slice %252 {offsets = [120, 0], sizes = [8, 25], strides = [1, 1]} : vector<200x25xf32> to vector<8x25xf32>
    %345 = arith.truncf %344 : vector<8x25xf32> to vector<8x25xbf16>
    %c15 = arith.constant 15 : index
    %c0_212 = arith.constant 0 : index
    %c0_213 = arith.constant 0 : index
    %346 = vector.load %arg15[%c15, %c0_212, %c0_213] : memref<25x25x225xbf16, #tpu.memory_space<vmem>>, vector<1x25x225xbf16>
    %347 = vector.shape_cast %346 : vector<1x25x225xbf16> to vector<25x225xbf16>
    %cst_214 = arith.constant dense<0.000000e+00> : vector<8x225xf32>
    %348 = tpu.matmul %345, %347, %cst_214 {dimension_numbers = #tpu.dot_dimension_numbers<[1], [0], [0], [1], [0, 0, 1, 1], [], []>} : vector<8x25xbf16>, vector<25x225xbf16>, vector<8x225xf32> -> vector<8x225xf32>
    %349 = arith.addf %343, %348 : vector<8x225xf32>
    %350 = vector.extract_strided_slice %252 {offsets = [128, 0], sizes = [8, 25], strides = [1, 1]} : vector<200x25xf32> to vector<8x25xf32>
    %351 = arith.truncf %350 : vector<8x25xf32> to vector<8x25xbf16>
    %c16 = arith.constant 16 : index
    %c0_215 = arith.constant 0 : index
    %c0_216 = arith.constant 0 : index
    %352 = vector.load %arg15[%c16, %c0_215, %c0_216] : memref<25x25x225xbf16, #tpu.memory_space<vmem>>, vector<1x25x225xbf16>
    %353 = vector.shape_cast %352 : vector<1x25x225xbf16> to vector<25x225xbf16>
    %cst_217 = arith.constant dense<0.000000e+00> : vector<8x225xf32>
    %354 = tpu.matmul %351, %353, %cst_217 {dimension_numbers = #tpu.dot_dimension_numbers<[1], [0], [0], [1], [0, 0, 1, 1], [], []>} : vector<8x25xbf16>, vector<25x225xbf16>, vector<8x225xf32> -> vector<8x225xf32>
    %355 = arith.addf %349, %354 : vector<8x225xf32>
    %356 = vector.extract_strided_slice %252 {offsets = [136, 0], sizes = [8, 25], strides = [1, 1]} : vector<200x25xf32> to vector<8x25xf32>
    %357 = arith.truncf %356 : vector<8x25xf32> to vector<8x25xbf16>
    %c17 = arith.constant 17 : index
    %c0_218 = arith.constant 0 : index
    %c0_219 = arith.constant 0 : index
    %358 = vector.load %arg15[%c17, %c0_218, %c0_219] : memref<25x25x225xbf16, #tpu.memory_space<vmem>>, vector<1x25x225xbf16>
    %359 = vector.shape_cast %358 : vector<1x25x225xbf16> to vector<25x225xbf16>
    %cst_220 = arith.constant dense<0.000000e+00> : vector<8x225xf32>
    %360 = tpu.matmul %357, %359, %cst_220 {dimension_numbers = #tpu.dot_dimension_numbers<[1], [0], [0], [1], [0, 0, 1, 1], [], []>} : vector<8x25xbf16>, vector<25x225xbf16>, vector<8x225xf32> -> vector<8x225xf32>
    %361 = arith.addf %355, %360 : vector<8x225xf32>
    %362 = vector.extract_strided_slice %252 {offsets = [144, 0], sizes = [8, 25], strides = [1, 1]} : vector<200x25xf32> to vector<8x25xf32>
    %363 = arith.truncf %362 : vector<8x25xf32> to vector<8x25xbf16>
    %c18 = arith.constant 18 : index
    %c0_221 = arith.constant 0 : index
    %c0_222 = arith.constant 0 : index
    %364 = vector.load %arg15[%c18, %c0_221, %c0_222] : memref<25x25x225xbf16, #tpu.memory_space<vmem>>, vector<1x25x225xbf16>
    %365 = vector.shape_cast %364 : vector<1x25x225xbf16> to vector<25x225xbf16>
    %cst_223 = arith.constant dense<0.000000e+00> : vector<8x225xf32>
    %366 = tpu.matmul %363, %365, %cst_223 {dimension_numbers = #tpu.dot_dimension_numbers<[1], [0], [0], [1], [0, 0, 1, 1], [], []>} : vector<8x25xbf16>, vector<25x225xbf16>, vector<8x225xf32> -> vector<8x225xf32>
    %367 = arith.addf %361, %366 : vector<8x225xf32>
    %368 = vector.extract_strided_slice %252 {offsets = [152, 0], sizes = [8, 25], strides = [1, 1]} : vector<200x25xf32> to vector<8x25xf32>
    %369 = arith.truncf %368 : vector<8x25xf32> to vector<8x25xbf16>
    %c19 = arith.constant 19 : index
    %c0_224 = arith.constant 0 : index
    %c0_225 = arith.constant 0 : index
    %370 = vector.load %arg15[%c19, %c0_224, %c0_225] : memref<25x25x225xbf16, #tpu.memory_space<vmem>>, vector<1x25x225xbf16>
    %371 = vector.shape_cast %370 : vector<1x25x225xbf16> to vector<25x225xbf16>
    %cst_226 = arith.constant dense<0.000000e+00> : vector<8x225xf32>
    %372 = tpu.matmul %369, %371, %cst_226 {dimension_numbers = #tpu.dot_dimension_numbers<[1], [0], [0], [1], [0, 0, 1, 1], [], []>} : vector<8x25xbf16>, vector<25x225xbf16>, vector<8x225xf32> -> vector<8x225xf32>
    %373 = arith.addf %367, %372 : vector<8x225xf32>
    %374 = vector.extract_strided_slice %252 {offsets = [160, 0], sizes = [8, 25], strides = [1, 1]} : vector<200x25xf32> to vector<8x25xf32>
    %375 = arith.truncf %374 : vector<8x25xf32> to vector<8x25xbf16>
    %c20 = arith.constant 20 : index
    %c0_227 = arith.constant 0 : index
    %c0_228 = arith.constant 0 : index
    %376 = vector.load %arg15[%c20, %c0_227, %c0_228] : memref<25x25x225xbf16, #tpu.memory_space<vmem>>, vector<1x25x225xbf16>
    %377 = vector.shape_cast %376 : vector<1x25x225xbf16> to vector<25x225xbf16>
    %cst_229 = arith.constant dense<0.000000e+00> : vector<8x225xf32>
    %378 = tpu.matmul %375, %377, %cst_229 {dimension_numbers = #tpu.dot_dimension_numbers<[1], [0], [0], [1], [0, 0, 1, 1], [], []>} : vector<8x25xbf16>, vector<25x225xbf16>, vector<8x225xf32> -> vector<8x225xf32>
    %379 = arith.addf %373, %378 : vector<8x225xf32>
    %380 = vector.extract_strided_slice %252 {offsets = [168, 0], sizes = [8, 25], strides = [1, 1]} : vector<200x25xf32> to vector<8x25xf32>
    %381 = arith.truncf %380 : vector<8x25xf32> to vector<8x25xbf16>
    %c21 = arith.constant 21 : index
    %c0_230 = arith.constant 0 : index
    %c0_231 = arith.constant 0 : index
    %382 = vector.load %arg15[%c21, %c0_230, %c0_231] : memref<25x25x225xbf16, #tpu.memory_space<vmem>>, vector<1x25x225xbf16>
    %383 = vector.shape_cast %382 : vector<1x25x225xbf16> to vector<25x225xbf16>
    %cst_232 = arith.constant dense<0.000000e+00> : vector<8x225xf32>
    %384 = tpu.matmul %381, %383, %cst_232 {dimension_numbers = #tpu.dot_dimension_numbers<[1], [0], [0], [1], [0, 0, 1, 1], [], []>} : vector<8x25xbf16>, vector<25x225xbf16>, vector<8x225xf32> -> vector<8x225xf32>
    %385 = arith.addf %379, %384 : vector<8x225xf32>
    %386 = vector.extract_strided_slice %252 {offsets = [176, 0], sizes = [8, 25], strides = [1, 1]} : vector<200x25xf32> to vector<8x25xf32>
    %387 = arith.truncf %386 : vector<8x25xf32> to vector<8x25xbf16>
    %c22 = arith.constant 22 : index
    %c0_233 = arith.constant 0 : index
    %c0_234 = arith.constant 0 : index
    %388 = vector.load %arg15[%c22, %c0_233, %c0_234] : memref<25x25x225xbf16, #tpu.memory_space<vmem>>, vector<1x25x225xbf16>
    %389 = vector.shape_cast %388 : vector<1x25x225xbf16> to vector<25x225xbf16>
    %cst_235 = arith.constant dense<0.000000e+00> : vector<8x225xf32>
    %390 = tpu.matmul %387, %389, %cst_235 {dimension_numbers = #tpu.dot_dimension_numbers<[1], [0], [0], [1], [0, 0, 1, 1], [], []>} : vector<8x25xbf16>, vector<25x225xbf16>, vector<8x225xf32> -> vector<8x225xf32>
    %391 = arith.addf %385, %390 : vector<8x225xf32>
    %392 = vector.extract_strided_slice %252 {offsets = [184, 0], sizes = [8, 25], strides = [1, 1]} : vector<200x25xf32> to vector<8x25xf32>
    %393 = arith.truncf %392 : vector<8x25xf32> to vector<8x25xbf16>
    %c23 = arith.constant 23 : index
    %c0_236 = arith.constant 0 : index
    %c0_237 = arith.constant 0 : index
    %394 = vector.load %arg15[%c23, %c0_236, %c0_237] : memref<25x25x225xbf16, #tpu.memory_space<vmem>>, vector<1x25x225xbf16>
    %395 = vector.shape_cast %394 : vector<1x25x225xbf16> to vector<25x225xbf16>
    %cst_238 = arith.constant dense<0.000000e+00> : vector<8x225xf32>
    %396 = tpu.matmul %393, %395, %cst_238 {dimension_numbers = #tpu.dot_dimension_numbers<[1], [0], [0], [1], [0, 0, 1, 1], [], []>} : vector<8x25xbf16>, vector<25x225xbf16>, vector<8x225xf32> -> vector<8x225xf32>
    %397 = arith.addf %391, %396 : vector<8x225xf32>
    %398 = vector.extract_strided_slice %252 {offsets = [192, 0], sizes = [8, 25], strides = [1, 1]} : vector<200x25xf32> to vector<8x25xf32>
    %399 = arith.truncf %398 : vector<8x25xf32> to vector<8x25xbf16>
    %c24 = arith.constant 24 : index
    %c0_239 = arith.constant 0 : index
    %c0_240 = arith.constant 0 : index
    %400 = vector.load %arg15[%c24, %c0_239, %c0_240] : memref<25x25x225xbf16, #tpu.memory_space<vmem>>, vector<1x25x225xbf16>
    %401 = vector.shape_cast %400 : vector<1x25x225xbf16> to vector<25x225xbf16>
    %cst_241 = arith.constant dense<0.000000e+00> : vector<8x225xf32>
    %402 = tpu.matmul %399, %401, %cst_241 {dimension_numbers = #tpu.dot_dimension_numbers<[1], [0], [0], [1], [0, 0, 1, 1], [], []>} : vector<8x25xbf16>, vector<25x225xbf16>, vector<8x225xf32> -> vector<8x225xf32>
    %403 = arith.addf %397, %402 : vector<8x225xf32>
    %c0_242 = arith.constant 0 : index
    %c0_243 = arith.constant 0 : index
    %404 = vector.load %arg16[%c0_242, %c0_243] : memref<8x1xf32, #tpu.memory_space<vmem>>, vector<8x1xf32>
    %405 = vector.broadcast %404 : vector<8x1xf32> to vector<8x225xf32>
    %406 = arith.addf %403, %405 : vector<8x225xf32>
    %cst_244 = arith.constant 0.000000e+00 : f32
    %407 = vector.broadcast %cst_244 : f32 to vector<8x225xf32>
    %408 = arith.maximumf %406, %407 : vector<8x225xf32>
    %409 = arith.truncf %408 : vector<8x225xf32> to vector<8x225xbf16>
    %c0_245 = arith.constant 0 : index
    %c0_246 = arith.constant 0 : index
    %410 = vector.load %arg17[%c0_245, %c0_246] : memref<4x8xbf16, #tpu.memory_space<vmem>>, vector<4x8xbf16>
    %cst_247 = arith.constant dense<0.000000e+00> : vector<4x225xf32>
    %411 = tpu.matmul %410, %409, %cst_247 {dimension_numbers = #tpu.dot_dimension_numbers<[1], [0], [0], [1], [0, 0, 1, 1], [], []>} : vector<4x8xbf16>, vector<8x225xbf16>, vector<4x225xf32> -> vector<4x225xf32>
    %c0_248 = arith.constant 0 : index
    %c0_249 = arith.constant 0 : index
    %412 = vector.load %arg18[%c0_248, %c0_249] : memref<1x1xf32, #tpu.memory_space<vmem>>, vector<1x1xf32>
    %413 = vector.broadcast %412 : vector<1x1xf32> to vector<4x225xf32>
    %414 = arith.addf %411, %413 : vector<4x225xf32>
    %cst_250 = arith.constant 0.000000e+00 : f32
    %415 = vector.broadcast %cst_250 : f32 to vector<4x225xf32>
    %416 = arith.subf %415, %414 : vector<4x225xf32>
    %417 = math.exp %416 : vector<4x225xf32>
    %cst_251 = arith.constant 1.000000e+00 : f32
    %418 = vector.broadcast %cst_251 : f32 to vector<4x225xf32>
    %419 = arith.addf %418, %417 : vector<4x225xf32>
    %cst_252 = arith.constant 1.000000e+00 : f32
    %420 = vector.broadcast %cst_252 : f32 to vector<4x225xf32>
    %421 = arith.divf %420, %419 : vector<4x225xf32>
    %c0_253 = arith.constant 0 : index
    %c0_254 = arith.constant 0 : index
    %c0_255 = arith.constant 0 : index
    %422 = vector.load %arg19[%c0_253, %c0_254, %c0_255] : memref<1x4x225xf32, #tpu.memory_space<vmem>>, vector<1x4x225xf32>
    %423 = vector.shape_cast %422 : vector<1x4x225xf32> to vector<4x225xf32>
    %424 = vector.shape_cast %421 : vector<4x225xf32> to vector<1x4x225xf32>
    tpu.vector_store %arg19[%c0_253, %c0_254, %c0_255], %424 {strides = array<i32>} : memref<1x4x225xf32, #tpu.memory_space<vmem>>, vector<1x4x225xf32>,
    return
  }
  func.func @transform_0(%arg0: i32) -> (i32, i32, i32) {
    %c0_i32 = arith.constant 0 : i32
    %c0_i32_0 = arith.constant 0 : i32
    %c0_i32_1 = arith.constant 0 : i32
    return %arg0, %c0_i32, %c0_i32_0 : i32, i32, i32
  }
  func.func @transform_1(%arg0: i32) -> (i32, i32, i32) {
    %c0_i32 = arith.constant 0 : i32
    %c0_i32_0 = arith.constant 0 : i32
    %c0_i32_1 = arith.constant 0 : i32
    %c0_i32_2 = arith.constant 0 : i32
    return %c0_i32, %c0_i32_0, %c0_i32_1 : i32, i32, i32
  }
  func.func @transform_2(%arg0: i32) -> (i32, i32) {
    %c0_i32 = arith.constant 0 : i32
    %c0_i32_0 = arith.constant 0 : i32
    %c0_i32_1 = arith.constant 0 : i32
    return %c0_i32, %c0_i32_0 : i32, i32
  }
  func.func @transform_3(%arg0: i32) -> (i32, i32, i32) {
    %c0_i32 = arith.constant 0 : i32
    %c0_i32_0 = arith.constant 0 : i32
    %c0_i32_1 = arith.constant 0 : i32
    %c0_i32_2 = arith.constant 0 : i32
    return %c0_i32, %c0_i32_0, %c0_i32_1 : i32, i32, i32
  }
  func.func @transform_4(%arg0: i32) -> (i32, i32) {
    %c0_i32 = arith.constant 0 : i32
    %c0_i32_0 = arith.constant 0 : i32
    %c0_i32_1 = arith.constant 0 : i32
    return %c0_i32, %c0_i32_0 : i32, i32
  }
  func.func @transform_5(%arg0: i32) -> (i32, i32, i32) {
    %c0_i32 = arith.constant 0 : i32
    %c0_i32_0 = arith.constant 0 : i32
    %c0_i32_1 = arith.constant 0 : i32
    %c0_i32_2 = arith.constant 0 : i32
    return %c0_i32, %c0_i32_0, %c0_i32_1 : i32, i32, i32
  }
  func.func @transform_6(%arg0: i32) -> (i32, i32) {
    %c0_i32 = arith.constant 0 : i32
    %c0_i32_0 = arith.constant 0 : i32
    %c0_i32_1 = arith.constant 0 : i32
    return %c0_i32, %c0_i32_0 : i32, i32
  }
  func.func @transform_7(%arg0: i32) -> (i32, i32, i32) {
    %c0_i32 = arith.constant 0 : i32
    %c0_i32_0 = arith.constant 0 : i32
    %c0_i32_1 = arith.constant 0 : i32
    %c0_i32_2 = arith.constant 0 : i32
    return %c0_i32, %c0_i32_0, %c0_i32_1 : i32, i32, i32
  }
  func.func @transform_8(%arg0: i32) -> (i32, i32) {
    %c0_i32 = arith.constant 0 : i32
    %c0_i32_0 = arith.constant 0 : i32
    %c0_i32_1 = arith.constant 0 : i32
    return %c0_i32, %c0_i32_0 : i32, i32
  }
  func.func @transform_9(%arg0: i32) -> (i32, i32) {
    %c0_i32 = arith.constant 0 : i32
    %c0_i32_0 = arith.constant 0 : i32
    %c0_i32_1 = arith.constant 0 : i32
    return %c0_i32, %c0_i32_0 : i32, i32
  }
  func.func @transform_10(%arg0: i32) -> (i32, i32) {
    %c0_i32 = arith.constant 0 : i32
    %c0_i32_0 = arith.constant 0 : i32
    %c0_i32_1 = arith.constant 0 : i32
    return %c0_i32, %c0_i32_0 : i32, i32
  }
  func.func @transform_11(%arg0: i32) -> (i32, i32, i32) {
    %c0_i32 = arith.constant 0 : i32
    %c0_i32_0 = arith.constant 0 : i32
    %c0_i32_1 = arith.constant 0 : i32
    %c0_i32_2 = arith.constant 0 : i32
    return %c0_i32, %c0_i32_0, %c0_i32_1 : i32, i32, i32
  }
  func.func @transform_12(%arg0: i32) -> (i32, i32) {
    %c0_i32 = arith.constant 0 : i32
    %c0_i32_0 = arith.constant 0 : i32
    %c0_i32_1 = arith.constant 0 : i32
    return %c0_i32, %c0_i32_0 : i32, i32
  }
  func.func @transform_13(%arg0: i32) -> (i32, i32) {
    %c0_i32 = arith.constant 0 : i32
    %c0_i32_0 = arith.constant 0 : i32
    %c0_i32_1 = arith.constant 0 : i32
    return %c0_i32, %c0_i32_0 : i32, i32
  }
  func.func @transform_14(%arg0: i32) -> (i32, i32, i32) {
    %c0_i32 = arith.constant 0 : i32
    %c0_i32_0 = arith.constant 0 : i32
    %c0_i32_1 = arith.constant 0 : i32
    %c0_i32_2 = arith.constant 0 : i32
    return %c0_i32, %c0_i32_0, %c0_i32_1 : i32, i32, i32
  }
  func.func @transform_15(%arg0: i32) -> (i32, i32) {
    %c0_i32 = arith.constant 0 : i32
    %c0_i32_0 = arith.constant 0 : i32
    %c0_i32_1 = arith.constant 0 : i32
    return %c0_i32, %c0_i32_0 : i32, i32
  }
  func.func @transform_16(%arg0: i32) -> (i32, i32) {
    %c0_i32 = arith.constant 0 : i32
    %c0_i32_0 = arith.constant 0 : i32
    %c0_i32_1 = arith.constant 0 : i32
    return %c0_i32, %c0_i32_0 : i32, i32
  }
  func.func @transform_17(%arg0: i32) -> (i32, i32) {
    %c0_i32 = arith.constant 0 : i32
    %c0_i32_0 = arith.constant 0 : i32
    %c0_i32_1 = arith.constant 0 : i32
    return %c0_i32, %c0_i32_0 : i32, i32
  }
  func.func @transform_18(%arg0: i32) -> (i32, i32, i32) {
    %c0_i32 = arith.constant 0 : i32
    %c0_i32_0 = arith.constant 0 : i32
    %c0_i32_1 = arith.constant 0 : i32
    return %arg0, %c0_i32, %c0_i32_0 : i32, i32, i32
  }
  func.func @transform_19(%arg0: i32) -> (i32, i32, i32) {
    %c0_i32 = arith.constant 0 : i32
    %c0_i32_0 = arith.constant 0 : i32
    %c0_i32_1 = arith.constant 0 : i32
    return %arg0, %c0_i32, %c0_i32_0 : i32, i32, i32
  }
}

</mosaic_0001>

<bundles_post_ra>
// kernel: generator_forward.1
= control target key start
LH: loop header
LB: loop body
LE: loop exit
PB: predicated region body
PF: predicated region fallthrough
CT: control target
= control target key end

     0   :  { %s8017_s0 = inlined_call_operand.vmem [shape: f32[2,9,100], index: 0, kind: input, shape index: {}]   ;;  %s8018_s1 = inlined_call_operand.vmem [shape: f32[9,32,1], index: 1, kind: input, shape index: {}]   ;;  %s8019_s2 = inlined_call_operand.vmem [shape: f32[32,1], index: 2, kind: input, shape index: {}]   ;;  %s8020_s3 = inlined_call_operand.vmem [shape: bf16[4,100,25], index: 3, kind: input, shape index: {}]   ;;  %s8021_s4 = inlined_call_operand.vmem [shape: bf16[144,32], index: 4, kind: input, shape index: {}]   ;;  %s8022_s5 = inlined_call_operand.vmem [shape: bf16[9,25,9], index: 5, kind: input, shape index: {}]   ;;  %s8023_s6 = inlined_call_operand.vmem [shape: f32[16,1], index: 6, kind: input, shape index: {}]   ;;  %s8024_s7 = inlined_call_operand.vmem [shape: bf16[4,9,4], index: 7, kind: input, shape index: {}]   ;;  %s8025_s8 = inlined_call_operand.vmem [shape: f32[16,4], index: 8, kind: input, shape index: {}]   ;;  %s8026_s9 = inlined_call_operand.<no memory space> [shape: f32[1,1], index: 9, kind: input, shape index: {}]   ;;  %s8027_s10 = inlined_call_operand.vmem [shape: bf16[144,16], index: 10, kind: input, shape index: {}]   ;;  %s8028_s11 = inlined_call_operand.vmem [shape: bf16[9,4,25], index: 11, kind: input, shape index: {}]   ;;  %s8029_s12 = inlined_call_operand.vmem [shape: f32[16,1], index: 12, kind: input, shape index: {}]   ;;  %s8030_s13 = inlined_call_operand.vmem [shape: bf16[200,16], index: 13, kind: input, shape index: {}]   ;;  %s8031_s14 = inlined_call_operand.vmem [shape: bf16[25,25,225], index: 14, kind: input, shape index: {}]   ;;  %s8032_s15 = inlined_call_operand.vmem [shape: f32[8,1], index: 15, kind: input, shape index: {}]   ;;  %s8033_s16 = inlined_call_operand.vmem [shape: bf16[4,8], index: 16, kind: input, shape index: {}]   ;;  %s8034_s18 = inlined_call_operand.vmem [shape: f32[2,4,225], index: 18, kind: output, shape index: {0}]   ;;  %s8035_s19 = inlined_call_operand.vmem [shape: f32[2,1,1], index: 19, kind: output, shape index: {1}]   ;;  %s8036_s17 = inlined_call_operand.<no memory space> [shape: f32[1,1], index: 17, kind: input, shape index: {}]  }
   0x1   :  { %8040 = sst [smem:[#allocation4_spill]] %s8017_s0  ;;  %v25_v0 = vstv %s8026_s9  ;;  %v27_v1 = vstv %s8036_s17 }
   0x2   :  { %8041 = sst [smem:[#allocation5_spill]] %s8018_s1  ;;  %26 = vst [vmem:[#allocation2] sm:$0x1] %v25_v0  ;;  %28 = vst [vmem:[#allocation3] sm:$0x1] %v27_v1  ;;  %s6843_s1 = smov 0  }
   0x3   :  { %8042 = sst [smem:[#allocation6_spill]] %s8019_s2 }
   0x4   :  { %8043 = sst [smem:[#allocation7_spill]] %s8020_s3 }
   0x5 LB: > { %s5489_s22 = sadd.s32 4294967295, %s6731_s1   ;;  %p5493_p0 = scmp.ge.s32.totalorder %s6731_s1, 1  ;;  %s6731_s1 = sphi %s6843_s1, %s34_s1  }
   0x6   : > { %p544_p1 = scmp.lt.s32.totalorder %s6731_s1, 3 }
   0x8   : > { %p545_p2 = pnand %p5493_p0, %p544_p1 }
   0x9   : > { %s8044_s17 = sld [smem:[#allocation5_spill]] (!%p545_p2)  ;;  %v6733_v4 = vmov (!%p545_p2), 0   ;;  %s8045_s26 = sld [smem:[#allocation7_spill]] (!%p545_p2)  ;;  %v2217_v55 = vld [vmem:[%s8023_s6 + $0x8] sm:$0xff] (!%p545_p2)  ;;  %vm1044_vm0 = vcmask (!%p545_p2), 1041408   ;;  %v2216_v58 = vld [vmem:[%s8023_s6] sm:$0xff] (!%p545_p2) }
   0xa   : > { %548 = sbr.rel (%p545_p2) target bundleno = 2568 (0xa08), region = 92  ;;  %6481 = vset.pattern.permute.xlu1 (!%p545_p2), %v6733_v4  ;;  %6480 = vset.pattern.permute.xlu0 (!%p545_p2), %v6733_v4  ;;  %s8046_s29 = sld [smem:[#allocation6_spill]] (!%p545_p2)  ;;  %v3142_v61 = vld [vmem:[%s8029_s12 + $0x8] sm:$0xff] (!%p545_p2)  ;;  %v3141_v62 = vld [vmem:[%s8029_s12] sm:$0xff] (!%p545_p2)  ;;  %vm1037_vm1 = vcmask (!%p545_p2), 818176   ;;  %vm6735_vm2 = vmmov (!%p545_p2), 0  }
   0xb   : > { %v5316_v1 = vld [vmem:[%s8032_s15] sm:$0xff] (!%p545_p2)  ;;  %p603_p3 = scmp.lt.s32.totalorder (!%p545_p2), %s5489_s22, 1  ;;  %s8047_s28 = sld [smem:[#allocation4_spill]] (!%p545_p2)  ;;  %vm1489_vm3 = vcmask (!%p545_p2), 261120   ;;  %vm1648_vm4 = vcmask (!%p545_p2), 1043456   ;;  %vm1649_vm5 = vcmask (!%p545_p2), 1044480  }
   0xc   : > { %vm1644_vm6 = vcmask (!%p545_p2), 203776   ;;  %vm2240_vm7 = vcmask (!%p545_p2), 72704   ;;  %vm2454_vm8 = vcmask (!%p545_p2), 31744   ;;  %vm2545_vm9 = vcmask (!%p545_p2), 130048  }
   0xd   : > { %vm2479_vm10 = vcmask (!%p545_p2), 0   ;;  %vm5339_vm11 = vcmask (!%p545_p2), 64512   ;;  %vm5406_vm12 = vcmask (!%p545_p2), 793604  }
   0xe   : > { %vm5407_vm13 = vmor (!%p545_p2), %vm5406_vm12, %vm1648_vm4 }
   0xf   : > { %v5498_v2 = vld [vmem:[%s8044_s17 + $0x20] sm:$0xff] (!%p545_p2)  ;;  %v5499_v5 = vld [vmem:[%s8044_s17 + $0x28] sm:$0xff] (!%p545_p2)  ;;  %v622_v7 = vld [vmem:[%s8044_s17 + $0x18] sm:$0xff] (!%p545_p2) }
  0x10   : > { %v619_v3 = vld [vmem:[%s8044_s17] sm:$0xff] (!%p545_p2)  ;;  %662 = vperm.xlu1 (!%p545_p2), %6481, %v5498_v2   ;;  %v620_v6 = vld [vmem:[%s8044_s17 + $0x8] sm:$0xff] (!%p545_p2)  ;;  %v621_v8 = vld [vmem:[%s8044_s17 + $0x10] sm:$0xff] (!%p545_p2) }
  0x11   : > { %625 = vperm.xlu0 %6480, %v619_v3   ;;  %v5501_v9 = vld [vmem:[%s8044_s17 + $0x38] sm:$0xff]  ;;  %v5500_v10 = vld [vmem:[%s8044_s17 + $0x30] sm:$0xff]  ;;  %v5503_v11 = vld [vmem:[%s8044_s17 + $0x48] sm:$0xff]  ;;  %s8049_s22 = smov (!%p603_p3, %s5489_s22), 1 }
  0x12   : > { %v5502_v12 = vld [vmem:[%s8044_s17 + $0x40] sm:$0xff]  ;;  %v5505_v13 = vld [vmem:[%s8044_s17 + $0x58] sm:$0xff]  ;;  %v5504_v14 = vld [vmem:[%s8044_s17 + $0x50] sm:$0xff]  ;;  %s5984_s25 = sshll.u32 %s8049_s22, 4  ;;  %s615_s2 = scalar_lea.vmem %s8035_s19, %s8049_s22 }
  0x13   : > { %v5507_v15 = vld [vmem:[%s8044_s17 + $0x68] sm:$0xff]  ;;  %v5506_v16 = vld [vmem:[%s8044_s17 + $0x60] sm:$0xff]  ;;  %v5509_v17 = vld [vmem:[%s8044_s17 + $0x78] sm:$0xff]  ;;  %s7060_s0 = scalar_lea.vmem %s8047_s28, %s5984_s25  ;;  %s5985_s27 = sshll.u32 %s8049_s22, 3 }
  0x14   : > { %667 = vperm.xlu1 %6481, %v5499_v5   ;;  %v5508_v18 = vld [vmem:[%s8044_s17 + $0x70] sm:$0xff]  ;;  %v5511_v19 = vld [vmem:[%s8044_s17 + $0x88] sm:$0xff]  ;;  %v5510_v20 = vld [vmem:[%s8044_s17 + $0x80] sm:$0xff]  ;;  %s612_s30 = scalar_lea.vmem %s8034_s18, %s5985_s27 }
  0x15   : > { %630 = vperm.xlu0 %6480, %v620_v6   ;;  %v5513_v21 = vld [vmem:[%s8044_s17 + $0x98] sm:$0xff]  ;;  %v5512_v22 = vld [vmem:[%s8044_s17 + $0x90] sm:$0xff]  ;;  %v5515_v23 = vld [vmem:[%s8044_s17 + $0xa8] sm:$0xff] }
  0x16   : > { %v5514_v24 = vld [vmem:[%s8044_s17 + $0xa0] sm:$0xff]  ;;  %v5517_v25 = vld [vmem:[%s8044_s17 + $0xb8] sm:$0xff]  ;;  %v5516_v26 = vld [vmem:[%s8044_s17 + $0xb0] sm:$0xff] }
  0x17   : > { %v5519_v27 = vld [vmem:[%s8044_s17 + $0xc8] sm:$0xff]  ;;  %v5518_v28 = vld [vmem:[%s8044_s17 + $0xc0] sm:$0xff]  ;;  %v5521_v29 = vld [vmem:[%s8044_s17 + $0xd8] sm:$0xff] }
  0x18   : > { %640 = vperm.xlu1 %6481, %v622_v7   ;;  %v5520_v30 = vld [vmem:[%s8044_s17 + $0xd0] sm:$0xff]  ;;  %v5523_v31 = vld [vmem:[%s8044_s17 + $0xe8] sm:$0xff]  ;;  %v5522_v32 = vld [vmem:[%s8044_s17 + $0xe0] sm:$0xff] }
  0x19   : > { %635 = vperm.xlu0 %6480, %v621_v8   ;;  %v6482_v33 = vld [vmem:[%s8045_s26] sm:$0xff]   ;;  %v6483_v34 = vld [vmem:[%s8045_s26 + $0x34] sm:$0xff]   ;;  %v6484_v37 = vld [vmem:[%s8045_s26 + $0x8] sm:$0xff]  }
  0x1a   : > { %6110 = vmatprep.subr.bf16.mxu0 %v6482_v33  ;;  %6128 = vmatprep.subr.bf16.mxu1 %v6483_v34  ;;  %v5525_v35 = vld [vmem:[%s8044_s17 + $0xf8] sm:$0xff]  ;;  %v5524_v36 = vld [vmem:[%s8044_s17 + $0xf0] sm:$0xff]  ;;  %v5527_v39 = vld [vmem:[%s8044_s17 + $0x108] sm:$0xff] }
  0x1b   : > { %6111 = vmatpush3.bf16.msra.mxu0 %v6482_v33  ;;  %6129 = vmatpush3.bf16.msra.mxu1 %v6483_v34  ;;  %v6485_v38 = vld [vmem:[%s8045_s26 + $0x3c] sm:$0xff]   ;;  %v6486_v41 = vld [vmem:[%s8045_s26 + $0x10] sm:$0xff]   ;;  %v6487_v42 = vld [vmem:[%s8045_s26 + $0x44] sm:$0xff]  }
  0x1c   : > { %677 = vperm.xlu1 %6481, %v5501_v9   ;;  %6112 = vmatprep.subr.bf16.mxu0 %v6484_v37  ;;  %v5526_v40 = vld [vmem:[%s8044_s17 + $0x100] sm:$0xff]  ;;  %v5529_v43 = vld [vmem:[%s8044_s17 + $0x118] sm:$0xff]  ;;  %v5528_v44 = vld [vmem:[%s8044_s17 + $0x110] sm:$0xff] }
  0x1d   : > { %672 = vperm.xlu0 %6480, %v5500_v10   ;;  %6130 = vmatprep.subr.bf16.mxu1 %v6485_v38  ;;  %v6488_v45 = vld [vmem:[%s8045_s26 + $0x18] sm:$0xff]   ;;  %v6489_v46 = vld [vmem:[%s8045_s26 + $0x4c] sm:$0xff]   ;;  %v951_v48 = vld [vmem:[%s8046_s29] sm:$0xff] }
  0x1e   : > { %v952_v47 = vld [vmem:[%s8046_s29 + $0x8] sm:$0xff]  ;;  %v6490_v49 = vld [vmem:[%s8045_s26 + $0x20] sm:$0xff]   ;;  %v6491_v50 = vld [vmem:[%s8045_s26 + $0x54] sm:$0xff]  }
  0x1f   : > { %6113 = vmatpush3.bf16.msra.mxu0 %v6484_v37  ;;  %6131 = vmatpush3.bf16.msra.mxu1 %v6485_v38  ;;  %v954_v51 = vld [vmem:[%s8046_s29 + $0x18] sm:$0xff]  ;;  %v953_v52 = vld [vmem:[%s8046_s29 + $0x10] sm:$0xff]  ;;  %v6492_v53 = vld [vmem:[%s8045_s26 + $0x28] sm:$0xff]  }
  0x20   : > { %704 = vperm.xlu1 %6481, %v5503_v11   ;;  %6114 = vmatprep.subr.bf16.mxu0 %v6486_v41  ;;  %v6493_v54 = vld [vmem:[%s8045_s26 + $0x5c] sm:$0xff]   ;;  %v6494_v56 = vld [vmem:[%s8045_s26 + $0x30] ss:$0 sps:$4 sm:$0x33]   ;;  %v7034_v63 = vld [vmem:[%s8045_s26 + $0x68] sm:$0xff]  }
  0x21   : > { %699 = vperm.xlu0 %6480, %v5502_v12   ;;  %6132 = vmatprep.subr.bf16.mxu1 %v6487_v42  ;;  %v6495_v57 = vld [vmem:[%s8045_s26 + $0x64] ss:$0 sps:$4 sm:$0x33]   ;;  %v1046_v59 = vsel %vm1044_vm0, %v6494_v56, 0  ;;  %v7039_v0 = vld [vmem:[%s8045_s26 + $0x9c] sm:$0xff]  }
  0x22   : > { %v1151_v60 = vsel %vm1044_vm0, %v6495_v57, 0 }
  0x23   : > { %6115 = vmatpush3.bf16.msra.mxu0 %v6486_v41  ;;  %6133 = vmatpush3.bf16.msra.mxu1 %v6487_v42 }
  0x24   : > { %714 = vperm.xlu1 %6481, %v5505_v13   ;;  %6116 = vmatprep.subr.bf16.mxu0 %v6488_v45 }
  0x25   : > { %709 = vperm.xlu0 %6480, %v5504_v14   ;;  %6134 = vmatprep.subr.bf16.mxu1 %v6489_v46 }
  0x27   : > { %6117 = vmatpush3.bf16.msra.mxu0 %v6488_v45  ;;  %6135 = vmatpush3.bf16.msra.mxu1 %v6489_v46 }
  0x28   : > { %741 = vperm.xlu1 %6481, %v5507_v15   ;;  %6118 = vmatprep.subr.bf16.mxu0 %v6490_v49 }
  0x29   : > { %736 = vperm.xlu0 %6480, %v5506_v16   ;;  %6136 = vmatprep.subr.bf16.mxu1 %v6491_v50 }
  0x2b   : > { %6119 = vmatpush3.bf16.msra.mxu0 %v6490_v49  ;;  %6137 = vmatpush3.bf16.msra.mxu1 %v6491_v50 }
  0x2c   : > { %751 = vperm.xlu1 %6481, %v5509_v17   ;;  %6120 = vmatprep.subr.bf16.mxu0 %v6492_v53 }
  0x2d   : > { %746 = vperm.xlu0 %6480, %v5508_v18   ;;  %6138 = vmatprep.subr.bf16.mxu1 %v6493_v54 }
  0x2f   : > { %6121 = vmatpush3.bf16.msra.mxu0 %v6492_v53  ;;  %6139 = vmatpush3.bf16.msra.mxu1 %v6493_v54 }
  0x30   : > { %778 = vperm.xlu1 %6481, %v5511_v19   ;;  %6464 = vmatprep.subr.msk.bf16.mxu0 %vm1044_vm0, %v6494_v56 }
  0x31   : > { %773 = vperm.xlu0 %6480, %v5510_v20   ;;  %6465 = vmatprep.subr.msk.bf16.mxu1 %vm1044_vm0, %v6495_v57 }
  0x33   : > { %6123 = vmatpush3.bf16.msra.mxu0 %v1046_v59  ;;  %6141 = vmatpush3.bf16.msra.mxu1 %v1151_v60 }
  0x34   : > { %788 = vperm.xlu1 %6481, %v5513_v21   ;;  %6146 = vmatprep.subr.bf16.mxu0 %v7034_v63 }
  0x35   : > { %783 = vperm.xlu0 %6480, %v5512_v22   ;;  %6164 = vmatprep.subr.bf16.mxu1 %v7039_v0 }
  0x38   : > { %815 = vperm.xlu1 %6481, %v5515_v23   ;;  %v643_v23 = vlaneseq }
  0x39   : > { %810 = vperm.xlu0 %6480, %v5514_v24  }
  0x3c   : > { %825 = vperm.xlu1 %6481, %v5517_v25  }
  0x3d   : > { %820 = vperm.xlu0 %6480, %v5516_v26   ;;  %v644_v26 = vshrl.u32 %v643_v23, 7 }
  0x3f   : > { %v756_v33 = vsub.s32 3, %v644_v26  ;;  %v867_v42 = vsub.s32 6, %v644_v26  ;;  %v904_v45 = vsub.s32 7, %v644_v26 }
  0x40   : > { %852 = vperm.xlu1 %6481, %v5519_v27  }
  0x41   : > { %847 = vperm.xlu0 %6480, %v5518_v28  }
  0x44   : > { %862 = vperm.xlu1 %6481, %v5521_v29   ;;  %v682_v29 = vsub.s32 1, %v644_v26 }
  0x45   : > { %857 = vperm.xlu0 %6480, %v5520_v30   ;;  %v645_v30 = vsub.s32 0, %v644_v26 }
  0x48   : > { %889 = vperm.xlu1 %6481, %v5523_v31   ;;  %v617_v31 = vld [vmem:[%s7060_s0] sm:$0xff] }
  0x49   : > { %884 = vperm.xlu0 %6480, %v5522_v32   ;;  %v719_v32 = vsub.s32 2, %v644_v26  ;;  %v646_v37 = vrot.slane %v617_v31, %v645_v30  ;;  %v757_v41 = vrot.slane %v617_v31, %v756_v33  ;;  %v868_v56 = vrot.slane %v617_v31, %v867_v42  ;;  %v5530_v42 = vld [vmem:[%s7060_s0 + $0x8] ss:$0 sm:$0xff] }
  0x4b   : > { %v720_v38 = vrot.slane %v617_v31, %v719_v32 }
  0x4c   : > { %899 = vperm.xlu1 %6481, %v5525_v35  }
  0x4d   : > { %894 = vperm.xlu0 %6480, %v5524_v36   ;;  %v683_v36 = vrot.slane %v617_v31, %v682_v29 }
  0x50   : > { %926 = vperm.xlu1 %6481, %v5527_v39   ;;  %v793_v39 = vsub.s32 4, %v644_v26 }
  0x51   : > { %921 = vperm.xlu0 %6480, %v5526_v40   ;;  %v830_v40 = vsub.s32 5, %v644_v26 }
  0x53   : > { %v831_v53 = vrot.slane %v617_v31, %v830_v40 }
  0x54   : > { %936 = vperm.xlu1 %6481, %v5529_v43  }
  0x55   : > { %931 = vperm.xlu0 %6480, %v5528_v44  }
  0x58   : > { %962 = vperm.xlu1 %6481, %v952_v47  }
  0x59   : > { %957 = vperm.xlu0 %6480, %v951_v48  }
  0x5c   : > { %972 = vperm.xlu1 %6481, %v954_v51  }
  0x5d   : > { %967 = vperm.xlu0 %6480, %v953_v52   ;;  %v794_v52 = vrot.slane %v617_v31, %v793_v39 }
  0x60   : > { %2225 = vperm.xlu1 %6481, %v2217_v55  }
  0x61   : > { %2220 = vperm.xlu0 %6480, %v2216_v58   ;;  %v905_v58 = vrot.slane %v617_v31, %v904_v45 }
  0x64   : > { %3150 = vperm.xlu1 %6481, %v3142_v61  }
  0x65   : > { %3145 = vperm.xlu0 %6480, %v3141_v62  }
  0x69   : > { %5319 = vperm.xlu0 %6480, %v5316_v1  }
  0x8f   : > { %v663_v2 = vpop.permute.xlu1 %662 }
  0x90   : > { %v626_v3 = vpop.permute.xlu0 %625  ;;  %v684_v46 = vmul.f32 %v683_v36, %v663_v2 }
  0x91   : > { %v647_v47 = vmul.f32 %v646_v37, %v626_v3 }
  0x93   : > { %v668_v5 = vpop.permute.xlu1 %667  ;;  %v688_v60 = vadd.f32 %v684_v46, %v647_v47 }
  0x94   : > { %v631_v6 = vpop.permute.xlu0 %630  ;;  %v685_v48 = vmul.f32 %v683_v36, %v668_v5 }
  0x95   : > { %v648_v49 = vmul.f32 %v646_v37, %v631_v6 }
  0x97   : > { %v641_v7 = vpop.permute.xlu1 %640  ;;  %v689_v61 = vadd.f32 %v685_v48, %v648_v49 }
  0x98   : > { %v636_v8 = vpop.permute.xlu0 %635  ;;  %v650_v23 = vmul.f32 %v646_v37, %v641_v7 }
  0x99   : > { %v649_v26 = vmul.f32 %v646_v37, %v636_v8 }
  0x9b   : > { %v678_v9 = vpop.permute.xlu1 %677 }
  0x9c   : > { %v673_v10 = vpop.permute.xlu0 %672  ;;  %v687_v54 = vmul.f32 %v683_v36, %v678_v9 }
  0x9d   : > { %v686_v55 = vmul.f32 %v683_v36, %v673_v10 }
  0x9e   : > { %v691_v29 = vadd.f32 %v687_v54, %v650_v23 }
  0x9f   : > { %v705_v11 = vpop.permute.xlu1 %704  ;;  %v690_v30 = vadd.f32 %v686_v55, %v649_v26 }
  0xa0   : > { %v700_v12 = vpop.permute.xlu0 %699  ;;  %v722_v50 = vmul.f32 %v720_v38, %v705_v11 }
  0xa1   : > { %v721_v51 = vmul.f32 %v720_v38, %v700_v12 }
  0xa2   : > { %v726_v5 = vadd.f32 %v722_v50, %v689_v61 }
  0xa3   : > { %v715_v13 = vpop.permute.xlu1 %714  ;;  %v725_v6 = vadd.f32 %v721_v51, %v688_v60 }
  0xa4   : > { %v710_v14 = vpop.permute.xlu0 %709  ;;  %v724_v2 = vmul.f32 %v720_v38, %v715_v13 }
  0xa5   : > { %v723_v3 = vmul.f32 %v720_v38, %v710_v14 }
  0xa7   : > { %v742_v15 = vpop.permute.xlu1 %741  ;;  %v727_v7 = vadd.f32 %v723_v3, %v690_v30 }
  0xa8   : > { %v737_v16 = vpop.permute.xlu0 %736  ;;  %v759_v62 = vmul.f32 %v757_v41, %v742_v15 }
  0xa9   : > { %v758_v1 = vmul.f32 %v757_v41, %v737_v16  ;;  %v728_v16 = vadd.f32 %v724_v2, %v691_v29 }
  0xaa   : > { %v763_v31 = vadd.f32 %v759_v62, %v726_v5 }
  0xab   : > { %v752_v17 = vpop.permute.xlu1 %751  ;;  %v762_v36 = vadd.f32 %v758_v1, %v725_v6 }
  0xac   : > { %v747_v18 = vpop.permute.xlu0 %746  ;;  %v761_v9 = vmul.f32 %v757_v41, %v752_v17 }
  0xad   : > { %v760_v10 = vmul.f32 %v757_v41, %v747_v18 }
  0xae   : > { %v765_v38 = vadd.f32 %v761_v9, %v728_v16  ;;  %v6500_v16 = vld [vmem:[%s8045_s26 + $0x78] sm:$0xff]  }
  0xaf   : > { %v779_v19 = vpop.permute.xlu1 %778  ;;  %v764_v17 = vadd.f32 %v760_v10, %v727_v7  ;;  %v6501_v7 = vld [vmem:[%s8045_s26 + $0xac] sm:$0xff]  }
  0xb0   : > { %v774_v20 = vpop.permute.xlu0 %773  ;;  %v796_v11 = vmul.f32 %v794_v52, %v779_v19 }
  0xb1   : > { %v795_v12 = vmul.f32 %v794_v52, %v774_v20 }
  0xb2   : > { %v800_v14 = vadd.f32 %v796_v11, %v763_v31 }
  0xb3   : > { %v7052_v21 = vpop.permute.xlu1 %788  ;;  %v799_v19 = vadd.f32 %v795_v12, %v762_v36 }
  0xb4   : > { %v7054_v22 = vpop.permute.xlu0 %783  ;;  %v798_v8 = vmul.f32 %v794_v52, %v7052_v21 }
  0xb5   : > { %v797_v13 = vmul.f32 %v794_v52, %v7054_v22 }
  0xb6   : > { %v802_v21 = vadd.f32 %v798_v8, %v765_v38  ;;  %v6504_v8 = vld [vmem:[%s8045_s26 + $0x88] sm:$0xff]  }
  0xb7   : > { %v816_v24 = vpop.permute.xlu1 %815  ;;  %v801_v48 = vadd.f32 %v797_v13, %v764_v17  ;;  %v6505_v13 = vld [vmem:[%s8045_s26 + $0xbc] sm:$0xff]  }
  0xb8   : > { %v811_v25 = vpop.permute.xlu0 %810  ;;  %v833_v39 = vmul.f32 %v831_v53, %v816_v24 }
  0xb9   : > { %v832_v15 = vmul.f32 %v831_v53, %v811_v25 }
  0xba   : > { %v837_v25 = vadd.f32 %v833_v39, %v800_v14  ;;  %v6498_v39 = vld [vmem:[%s8045_s26 + $0x70] sm:$0xff]  }
  0xbb   : > { %v7062_v27 = vpop.permute.xlu1 %825  ;;  %v836_v45 = vadd.f32 %v832_v15, %v799_v19  ;;  %v6499_v15 = vld [vmem:[%s8045_s26 + $0xa4] sm:$0xff]   ;;  %v6506_v14 = vld [vmem:[%s8045_s26 + $0x90] sm:$0xff]  }
  0xbc   : > { %v7064_v28 = vpop.permute.xlu0 %820  ;;  %v835_v18 = vmul.f32 %v831_v53, %v7062_v27  ;;  %v6507_v19 = vld [vmem:[%s8045_s26 + $0xc4] sm:$0xff]  }
  0xbd   : > { %v834_v40 = vmul.f32 %v831_v53, %v7064_v28 }
  0xbe   : > { %v839_v52 = vadd.f32 %v835_v18, %v802_v21  ;;  %v6734_v18 = vmov 0.0  }
  0xbf   : > { %v853_v34 = vpop.permute.xlu1 %852  ;;  %v838_v54 = vadd.f32 %v834_v40, %v801_v48 }
  0xc0   : > { %v848_v35 = vpop.permute.xlu0 %847  ;;  %v870_v20 = vmul.f32 %v868_v56, %v853_v34 }
  0xc1   : > { %v869_v37 = vmul.f32 %v868_v56, %v848_v35 }
  0xc2   : > { %v874_v50 = vadd.f32 %v870_v20, %v837_v25  ;;  %v6508_v20 = vld [vmem:[%s8045_s26 + $0x98] ss:$0 sps:$4 sm:$0x33]  }
  0xc3   : > { %v863_v43 = vpop.permute.xlu1 %862  ;;  %v873_v34 = vadd.f32 %v869_v37, %v836_v45  ;;  %v6509_v37 = vld [vmem:[%s8045_s26 + $0xcc] ss:$0 sps:$4 sm:$0x33]   ;;  %v1260_v38 = vsel %vm1044_vm0, %v6508_v20, 0 }
  0xc4   : > { %v858_v44 = vpop.permute.xlu0 %857  ;;  %v872_v22 = vmul.f32 %v868_v56, %v863_v43  ;;  %v1365_v17 = vsel %vm1044_vm0, %v6509_v37, 0 }
  0xc5   : > { %v871_v49 = vmul.f32 %v868_v56, %v858_v44 }
  0xc6   : > { %v876_v62 = vadd.f32 %v872_v22, %v839_v52 }
  0xc7   : > { %v890_v57 = vpop.permute.xlu1 %889  ;;  %v875_v1 = vadd.f32 %v871_v49, %v838_v54 }
  0xc8   : > { %v885_v59 = vpop.permute.xlu0 %884  ;;  %v907_v46 = vmul.f32 %v905_v58, %v890_v57 }
  0xc9   : > { %v906_v47 = vmul.f32 %v905_v58, %v885_v59 }
  0xca   : > { %v911_v28 = vadd.f32 %v907_v46, %v874_v50 }
  0xcb   : > { %v900_v32 = vpop.permute.xlu1 %899  ;;  %v910_v53 = vadd.f32 %v906_v47, %v873_v34 }
  0xcc   : > { %v895_v33 = vpop.permute.xlu0 %894  ;;  %v909_v60 = vmul.f32 %v905_v58, %v900_v32 }
  0xcd   : > { %v908_v61 = vmul.f32 %v905_v58, %v895_v33 }
  0xce   : > { %v913_v56 = vadd.f32 %v909_v60, %v876_v62 }
  0xcf   : > { %v927_v41 = vpop.permute.xlu1 %926  ;;  %v912_v2 = vadd.f32 %v908_v61, %v875_v1 }
  0xd0   : > { %v922_v24 = vpop.permute.xlu0 %921  ;;  %v944_v35 = vmul.f32 %v5530_v42, %v927_v41 }
  0xd1   : > { %v943_v51 = vmul.f32 %v5530_v42, %v922_v24 }
  0xd2   : > { %v948_v23 = vadd.f32 %v944_v35, %v911_v28 }
  0xd3   : > { %v937_v27 = vpop.permute.xlu1 %936  ;;  %v947_v26 = vadd.f32 %v943_v51, %v910_v53 }
  0xd4   : > { %v932_v55 = vpop.permute.xlu0 %931  ;;  %v946_v57 = vmul.f32 %v5530_v42, %v937_v27 }
  0xd5   : > { %v945_v59 = vmul.f32 %v5530_v42, %v932_v55 }
  0xd6   : > { %v950_v12 = vadd.f32 %v946_v57, %v913_v56  ;;  %v6512_v56 = vld [vmem:[%s8021_s4 + $0x10] sm:$0xff]  }
  0xd7   : > { %v963_v43 = vpop.permute.xlu1 %962  ;;  %v949_v29 = vadd.f32 %v945_v59, %v912_v2  ;;  %v6513_v2 = vld [vmem:[%s8021_s4 + $0x18] sm:$0xff]  }
  0xd8   : > { %v958_v44 = vpop.permute.xlu0 %957  ;;  %v976_v3 = vadd.f32 %v963_v43, %v948_v23  ;;  %v6510_v43 = vld [vmem:[%s8021_s4] sm:$0xff]  }
  0xd9   : > { %v975_v5 = vadd.f32 %v958_v44, %v947_v26  ;;  %v6511_v44 = vld [vmem:[%s8021_s4 + $0x8] sm:$0xff]  }
  0xda   : > { %v980_v6 = vmax.f32 %v976_v3, 0.0  ;;  %v6514_v3 = vld [vmem:[%s8021_s4 + $0x20] sm:$0xff]  }
  0xdb   : > { %v979_v11 = vmax.f32 %v975_v5, 0.0  ;;  %v973_v30 = vpop.permute.xlu1 %972  ;;  %v6515_v5 = vld [vmem:[%s8021_s4 + $0x28] sm:$0xff]  }
  0xdc   : > { %v968_v9 = vpop.permute.xlu0 %967  ;;  %v978_v10 = vadd.f32 %v973_v30, %v950_v12  ;;  %v6518_v12 = vld [vmem:[%s8021_s4 + $0x40] sm:$0xff]   ;;  %v6520_v30 = vld [vmem:[%s8022_s5 + $0x18] sm:$0x1f]  }
  0xdd   : > { %v983_v58 = vpack.c.bf16 %v980_v6, %v979_v11  ;;  %v977_v32 = vadd.f32 %v968_v9, %v949_v29  ;;  %v6516_v6 = vld [vmem:[%s8021_s4 + $0x30] sm:$0xff]   ;;  %v6517_v11 = vld [vmem:[%s8021_s4 + $0x38] sm:$0xff]   ;;  %v6736_v9 = vmov 65535  }
  0xde   : > { %v982_v33 = vmax.f32 %v978_v10, 0.0  ;;  %v6519_v29 = vld [vmem:[%s8022_s5 + $0x10] sm:$0xff]  }
  0xdf   : > { %v981_v31 = vmax.f32 %v977_v32, 0.0  ;;  %6124 = vmatprep.mubr.msk.bf16.mxu0 %vm1037_vm1, %v983_v58  ;;  %6142 = vmatprep.mubr.msk.bf16.mxu1 %vm1037_vm1, %v983_v58 }
  0xe1   : > { %v984_v36 = vpack.c.bf16 %v982_v33, %v981_v31 }
  0xe3   : > { %6125 = vmatmul.mubr.msk.bf16.vlgmr.msra.gmra.mrb[0].mxu0 %vm1037_vm1, %v984_v36  ;;  %6143 = vmatmul.mubr.msk.bf16.vlgmr.msra.gmra.mrb[0].mxu1 %vm1037_vm1, %v984_v36 }
  0xe4   : > { %6147 = vmatpush3.bf16.msra.mxu0 %v7034_v63  ;;  %6165 = vmatpush3.bf16.msra.mxu1 %v7039_v0  ;;  %v6502_v63 = vld [vmem:[%s8045_s26 + $0x80] sm:$0xff]   ;;  %v6503_v0 = vld [vmem:[%s8045_s26 + $0xb4] sm:$0xff]  }
  0xe5   : > { %6160 = vmatprep.mubr.msk.bf16.mxu0 %vm1037_vm1, %v983_v58  ;;  %6178 = vmatprep.mubr.msk.bf16.mxu1 %vm1037_vm1, %v983_v58  ;;  %v1650_v58 = vsel %vm1648_vm4, 4294967295, %v6736_v9 }
  0xe6   : > { %6148 = vmatprep.subr.bf16.mxu0 %v6498_v39  ;;  %6166 = vmatprep.subr.bf16.mxu1 %v6499_v15  ;;  %v7192_v10 = vsel %vm1649_vm5, %v1650_v58, 0 }
  0xe7   : > { %v1653_v32 = vand.u32 %v6520_v30, %v7192_v10  ;;  %v6534_v30 = vld [vmem:[%s8022_s5 + $0x78] sm:$0x1f]  }
  0xe8   : > { %6149 = vmatpush3.bf16.msra.mxu0 %v6498_v39  ;;  %6167 = vmatpush3.bf16.msra.mxu1 %v6499_v15 }
  0xe9   : > { %6150 = vmatprep.subr.bf16.mxu0 %v6500_v16  ;;  %6168 = vmatprep.subr.bf16.mxu1 %v6501_v7 }
  0xec   : > { %6151 = vmatpush3.bf16.msra.mxu0 %v6500_v16  ;;  %6169 = vmatpush3.bf16.msra.mxu1 %v6501_v7 }
  0xed   : > { %6152 = vmatprep.subr.bf16.mxu0 %v6502_v63  ;;  %6170 = vmatprep.subr.bf16.mxu1 %v6503_v0 }
  0xf0   : > { %6153 = vmatpush3.bf16.msra.mxu0 %v6502_v63  ;;  %6171 = vmatpush3.bf16.msra.mxu1 %v6503_v0  ;;  %v6521_v0 = vld [vmem:[%s8022_s5] sm:$0xff]  }
  0xf1   : > { %6154 = vmatprep.subr.bf16.mxu0 %v6504_v8  ;;  %6172 = vmatprep.subr.bf16.mxu1 %v6505_v13 }
  0xf4   : > { %6155 = vmatpush3.bf16.msra.mxu0 %v6504_v8  ;;  %6173 = vmatpush3.bf16.msra.mxu1 %v6505_v13  ;;  %v6522_v8 = vld [vmem:[%s8022_s5 + $0x8] sm:$0x1f]  }
  0xf5   : > { %6156 = vmatprep.subr.bf16.mxu0 %v6506_v14  ;;  %6174 = vmatprep.subr.bf16.mxu1 %v6507_v19 }
  0xf8   : > { %6157 = vmatpush3.bf16.msra.mxu0 %v6506_v14  ;;  %6175 = vmatpush3.bf16.msra.mxu1 %v6507_v19  ;;  %v1711_v19 = vand.u32 %v6522_v8, %v7192_v10  ;;  %v6538_v8 = vld [vmem:[%s8024_s7 + $0x8] sm:$0x1f]  }
  0xf9   : > { %6466 = vmatprep.subr.msk.bf16.mxu0 %vm1044_vm0, %v6508_v20  ;;  %6467 = vmatprep.subr.msk.bf16.mxu1 %vm1044_vm0, %v6509_v37 }
  0xfc   : > { %6159 = vmatpush3.bf16.msra.mxu0 %v1260_v38  ;;  %6177 = vmatpush3.bf16.msra.mxu1 %v1365_v17  ;;  %v6523_v38 = vld [vmem:[%s8022_s5 + $0x20] sm:$0xff]  }
  0xfd   : > { %6182 = vmatprep.subr.bf16.mxu0 %v6734_v18  ;;  %6222 = vmatprep.subr.bf16.mxu1 %v6734_v18 }
  0xff   : > { %6161 = vmatmul.mubr.msk.bf16.vlgmr.msra.gmra.mrb[4].mxu0 %vm1037_vm1, %v984_v36  ;;  %6179 = vmatmul.mubr.msk.bf16.vlgmr.msra.gmra.mrb[4].mxu1 %vm1037_vm1, %v984_v36 }
 0x100   : > { %6186 = vmatprep.mubr.msk.bf16.mxu0 %vm6735_vm2, %v6734_v18  ;;  %6226 = vmatprep.mubr.msk.bf16.mxu1 %vm6735_vm2, %v6734_v18 }
 0x101   : > { %6223 = vmatpush3.bf16.msra.mxu1 %v6519_v29 }
 0x102   : > { %6224 = vmatprep.subr.bf16.mxu1 %v6734_v18 }
 0x105   : > { %6225 = vmatpush3.bf16.msra.mxu1 %v1653_v32  ;;  %v2105_v32 = vand.u32 %v6534_v30, %v7192_v10 }
 0x106   : > { %6230 = vmatprep.subr.bf16.mxu1 %v6734_v18 }
 0x1b6   : > { %v6126_v40 = vpop.f32.mrb[0].mxu0  ;;  %v6144_v41 = vpop.f32.mrb[0].mxu1 }
 0x1b7   : > { %v1204_v42 = vmax.f32 %v6126_v40, %v6144_v41  ;;  %v1082_v24 = vpop.f32.mrb[1].mxu0  ;;  %v1187_v25 = vpop.f32.mrb[1].mxu1  ;;  %v6524_v40 = vld [vmem:[%s8022_s5 + $0x28] sm:$0x1f]  }
 0x1b8   : > { %v1202_v45 = vmax.f32 %v1082_v24, %v1187_v25  ;;  %v6127_v46 = vpop.f32.mrb[2].mxu0  ;;  %v6145_v47 = vpop.f32.mrb[2].mxu1  ;;  %v1775_v24 = vand.u32 %v6524_v40, %v7192_v10 }
 0x1b9   : > { %v1205_v21 = vmax.f32 %v6127_v46, %v6145_v47  ;;  %v1085_v48 = vpop.f32.mrb[3].mxu0  ;;  %v1190_v22 = vpop.f32.mrb[3].mxu1  ;;  %v6525_v46 = vld [vmem:[%s8022_s5 + $0x30] sm:$0xff]  }
 0x1ba   : > { %v1203_v49 = vmax.f32 %v1085_v48, %v1190_v22 }
 0x1d2   : > { %v6162_v50 = vpop.f32.mrb[4].mxu0  ;;  %v6180_v34 = vpop.f32.mrb[4].mxu1 }
 0x1d3   : > { %v1418_v35 = vmax.f32 %v6162_v50, %v6180_v34  ;;  %v1296_v51 = vpop.f32.mrb[5].mxu0  ;;  %v1401_v52 = vpop.f32.mrb[5].mxu1 }
 0x1d4   : > { %v1416_v54 = vmax.f32 %v1296_v51, %v1401_v52  ;;  %v6163_v27 = vpop.f32.mrb[6].mxu0  ;;  %v6181_v55 = vpop.f32.mrb[6].mxu1  ;;  %v6528_v52 = vld [vmem:[%s8022_s5 + $0x48] sm:$0x1f]  }
 0x1d5   : > { %v1422_v28 = vmax.f32 %v1204_v42, %v1418_v35  ;;  %v1419_v53 = vmax.f32 %v6163_v27, %v6181_v55  ;;  %v1299_v60 = vpop.f32.mrb[7].mxu0  ;;  %v1404_v61 = vpop.f32.mrb[7].mxu1  ;;  %v6527_v35 = vld [vmem:[%s8022_s5 + $0x40] sm:$0xff]   ;;  %v1907_v55 = vand.u32 %v6528_v52, %v7192_v10 }
 0x1d6   : > { %v1420_v62 = vmax.f32 %v1202_v45, %v1416_v54  ;;  %v1417_v1 = vmax.f32 %v1299_v60, %v1404_v61  ;;  %v6529_v60 = vld [vmem:[%s8022_s5 + $0x50] sm:$0xff]  }
 0x1d7   : > { %v1423_v57 = vmax.f32 %v1205_v21, %v1419_v53  ;;  %v6526_v21 = vld [vmem:[%s8022_s5 + $0x38] sm:$0x1f]  }
 0x1d8   : > { %v1421_v59 = vmax.f32 %v1203_v49, %v1417_v1  ;;  %v1841_v49 = vand.u32 %v6526_v21, %v7192_v10 }
 0x1d9   : > { %v1425_v23 = vpack.c.bf16 %v1423_v57, %v1422_v28 }
 0x1da   : > { %v1424_v26 = vpack.c.bf16 %v1421_v59, %v1420_v62  ;;  %v6530_v62 = vld [vmem:[%s8022_s5 + $0x58] sm:$0x1f]  }
 0x1db   : > { %v1973_v59 = vand.u32 %v6530_v62, %v7192_v10 }
 0x1dc   : > { %6183 = vmatpush3.bf16.msra.mxu0 %v1424_v26 }
 0x1dd   : > { %6184 = vmatprep.subr.bf16.mxu0 %v6734_v18 }
 0x1e0   : > { %6185 = vmatpush3.bf16.msra.mxu0 %v1425_v23 }
 0x1e1   : > { %6294 = vmatprep.subr.bf16.mxu0 %v6734_v18 }
 0x1e3   : > { %6187 = vmatmul.mubr.msk.bf16.vlgmr.msra.gmra.mrb[8].mxu0 %vm1489_vm3, %v6510_v43  ;;  %v6531_v43 = vld [vmem:[%s8022_s5 + $0x60] sm:$0xff]  }
 0x1e4   : > { %6190 = vmatprep.mubr.msk.bf16.mxu0 %vm6735_vm2, %v6734_v18 }
 0x1eb   : > { %6191 = vmatmul.mubr.msk.bf16.gmra.mrb[12].mxu0 %vm1489_vm3, %v6511_v44 }
 0x1ec   : > { %6194 = vmatprep.mubr.msk.bf16.mxu0 %vm6735_vm2, %v6734_v18 }
 0x1f3   : > { %6195 = vmatmul.mubr.msk.bf16.gmra.mrb[16].mxu0 %vm1489_vm3, %v6512_v56  ;;  %v6532_v56 = vld [vmem:[%s8022_s5 + $0x68] sm:$0x1f]  }
 0x1f4   : > { %6198 = vmatprep.mubr.msk.bf16.mxu0 %vm6735_vm2, %v6734_v18 }
 0x1fb   : > { %6199 = vmatmul.mubr.msk.bf16.gmra.mrb[20].mxu0 %vm1489_vm3, %v6513_v2 }
 0x1fc   : > { %6202 = vmatprep.mubr.msk.bf16.mxu0 %vm6735_vm2, %v6734_v18 }
 0x203   : > { %6203 = vmatmul.mubr.msk.bf16.gmra.mrb[24].mxu0 %vm1489_vm3, %v6514_v3 }
 0x204   : > { %6206 = vmatprep.mubr.msk.bf16.mxu0 %vm6735_vm2, %v6734_v18 }
 0x20b   : > { %6207 = vmatmul.mubr.msk.bf16.gmra.mrb[28].mxu0 %vm1489_vm3, %v6515_v5  ;;  %v2039_v5 = vand.u32 %v6532_v56, %v7192_v10 }
 0x20c   : > { %6210 = vmatprep.mubr.msk.bf16.mxu0 %vm6735_vm2, %v6734_v18 }
 0x213   : > { %6211 = vmatmul.mubr.msk.bf16.gmra.mrb[32].mxu0 %vm1489_vm3, %v6516_v6 }
 0x214   : > { %6214 = vmatprep.mubr.msk.bf16.mxu0 %vm6735_vm2, %v6734_v18 }
 0x21b   : > { %6215 = vmatmul.mubr.msk.bf16.gmra.mrb[36].mxu0 %vm1489_vm3, %v6517_v11 }
 0x21c   : > { %6218 = vmatprep.mubr.msk.bf16.mxu0 %vm6735_vm2, %v6734_v18 }
 0x223   : > { %6219 = vmatmul.mubr.msk.bf16.gmra.mrb[40].mxu0 %vm1489_vm3, %v6518_v12  ;;  %v6533_v12 = vld [vmem:[%s8022_s5 + $0x70] sm:$0xff]  }
 0x224   : > { %6296 = vmatprep.mubr.msk.bf16.mxu0 %vm6735_vm2, %v6734_v18 }
 0x2b6   : > { %v1551_v33 = vpop.f32.mrb[8].mxu0 }
 0x2b7   : > { %v6188_v31 = vpop.f32.mrb[9].mxu0 }
 0x2b8   : > { %v1554_v36 = vpop.f32.mrb[10].mxu0 }
 0x2b9   : > { %v1622_v39 = vpack.c.bf16 %v1554_v36, %v1551_v33  ;;  %v6189_v15 = vpop.f32.mrb[11].mxu0  ;;  %v6535_v36 = vld [vmem:[%s8022_s5 + $0x80] sm:$0xff]  }
 0x2ba   : > { %v6536_v15 = vld [vmem:[%s8022_s5 + $0x88] sm:$0x1f]  }
 0x2be   : > { %v1559_v16 = vpop.f32.mrb[12].mxu0 }
 0x2bf   : > { %v6192_v7 = vpop.f32.mrb[13].mxu0 }
 0x2c0   : > { %v1562_v63 = vpop.f32.mrb[14].mxu0 }
 0x2c1   : > { %v1627_v13 = vpack.c.bf16 %v1562_v63, %v1559_v16  ;;  %v6193_v14 = vpop.f32.mrb[15].mxu0  ;;  %v2171_v63 = vand.u32 %v6536_v15, %v7192_v10 }
 0x2c2   : > { %v2297_v14 = vand.u32 %v6538_v8, %v7192_v10 }
 0x2c3   : > { %6227 = vmatmul.mubr.msk.bf16.vlgmr.msra.gmra.mrb[8].mxu1 %vm1644_vm6, %v1627_v13 }
 0x2c4   : > { %6231 = vmatpush3.bf16.msra.mxu1 %v6521_v0  ;;  %6234 = vmatprep.mubr.msk.bf16.mxu1 %vm6735_vm2, %v6734_v18  ;;  %v6537_v0 = vld [vmem:[%s8024_s7] sm:$0x1f]  }
 0x2c5   : > { %6232 = vmatprep.subr.bf16.mxu1 %v6734_v18  ;;  %v2245_v13 = vand.u32 %v6537_v0, %v7192_v10 }
 0x2c6   : > { %v1567_v20 = vpop.f32.mrb[16].mxu0 }
 0x2c7   : > { %v6196_v37 = vpop.f32.mrb[17].mxu0  ;;  %6295 = vmatpush3.bf16.msra.mxu0 %v2245_v13 }
 0x2c8   : > { %6233 = vmatpush3.bf16.msra.mxu1 %v1711_v19  ;;  %v1570_v17 = vpop.f32.mrb[18].mxu0  ;;  %6306 = vmatprep.subr.bf16.mxu0 %v6734_v18 }
 0x2c9   : > { %6238 = vmatprep.subr.bf16.mxu1 %v6734_v18  ;;  %v1754_v41 = vpack.c.bf16 %v1570_v17, %v1567_v20  ;;  %v6197_v42 = vpop.f32.mrb[19].mxu0 }
 0x2cb   : > { %6235 = vmatmul.mubr.msk.bf16.vlgmr.msra.gmra.mrb[12].mxu1 %vm1644_vm6, %v1622_v39 }
 0x2cc   : > { %6239 = vmatpush3.bf16.msra.mxu1 %v6523_v38  ;;  %6242 = vmatprep.mubr.msk.bf16.mxu1 %vm6735_vm2, %v6734_v18 }
 0x2cd   : > { %6240 = vmatprep.subr.bf16.mxu1 %v6734_v18 }
 0x2ce   : > { %v1575_v25 = vpop.f32.mrb[20].mxu0 }
 0x2cf   : > { %v6200_v45 = vpop.f32.mrb[21].mxu0 }
 0x2d0   : > { %6241 = vmatpush3.bf16.msra.mxu1 %v1775_v24  ;;  %v1578_v47 = vpop.f32.mrb[22].mxu0 }
 0x2d1   : > { %6246 = vmatprep.subr.bf16.mxu1 %v6734_v18  ;;  %v1820_v48 = vpack.c.bf16 %v1578_v47, %v1575_v25  ;;  %v6201_v22 = vpop.f32.mrb[23].mxu0 }
 0x2d3   : > { %6243 = vmatmul.mubr.msk.bf16.vlgmr.msra.gmra.mrb[16].mxu1 %vm1644_vm6, %v1754_v41 }
 0x2d4   : > { %6247 = vmatpush3.bf16.msra.mxu1 %v6525_v46  ;;  %6250 = vmatprep.mubr.msk.bf16.mxu1 %vm6735_vm2, %v6734_v18 }
 0x2d5   : > { %6248 = vmatprep.subr.bf16.mxu1 %v6734_v18 }
 0x2d6   : > { %v1583_v50 = vpop.f32.mrb[24].mxu0 }
 0x2d7   : > { %v6204_v34 = vpop.f32.mrb[25].mxu0 }
 0x2d8   : > { %6249 = vmatpush3.bf16.msra.mxu1 %v1841_v49  ;;  %v1586_v51 = vpop.f32.mrb[26].mxu0 }
 0x2d9   : > { %6254 = vmatprep.subr.bf16.mxu1 %v6734_v18  ;;  %v1886_v54 = vpack.c.bf16 %v1586_v51, %v1583_v50  ;;  %v6205_v27 = vpop.f32.mrb[27].mxu0 }
 0x2db   : > { %6251 = vmatmul.mubr.msk.bf16.vlgmr.msra.gmra.mrb[20].mxu1 %vm1644_vm6, %v1820_v48 }
 0x2dc   : > { %6255 = vmatpush3.bf16.msra.mxu1 %v6527_v35  ;;  %6258 = vmatprep.mubr.msk.bf16.mxu1 %vm6735_vm2, %v6734_v18 }
 0x2dd   : > { %6256 = vmatprep.subr.bf16.mxu1 %v6734_v18 }
 0x2de   : > { %v1591_v28 = vpop.f32.mrb[28].mxu0 }
 0x2df   : > { %v6208_v53 = vpop.f32.mrb[29].mxu0 }
 0x2e0   : > { %6257 = vmatpush3.bf16.msra.mxu1 %v1907_v55  ;;  %v1594_v61 = vpop.f32.mrb[30].mxu0 }
 0x2e1   : > { %6262 = vmatprep.subr.bf16.mxu1 %v6734_v18  ;;  %v1952_v1 = vpack.c.bf16 %v1594_v61, %v1591_v28  ;;  %v6209_v57 = vpop.f32.mrb[31].mxu0 }
 0x2e3   : > { %6259 = vmatmul.mubr.msk.bf16.vlgmr.msra.gmra.mrb[24].mxu1 %vm1644_vm6, %v1886_v54 }
 0x2e4   : > { %6263 = vmatpush3.bf16.msra.mxu1 %v6529_v60  ;;  %6266 = vmatprep.mubr.msk.bf16.mxu1 %vm6735_vm2, %v6734_v18 }
 0x2e5   : > { %6264 = vmatprep.subr.bf16.mxu1 %v6734_v18 }
 0x2e6   : > { %v1599_v23 = vpop.f32.mrb[32].mxu0 }
 0x2e7   : > { %v6212_v26 = vpop.f32.mrb[33].mxu0 }
 0x2e8   : > { %6265 = vmatpush3.bf16.msra.mxu1 %v1973_v59  ;;  %v1602_v44 = vpop.f32.mrb[34].mxu0 }
 0x2e9   : > { %6270 = vmatprep.subr.bf16.mxu1 %v6734_v18  ;;  %v2018_v2 = vpack.c.bf16 %v1602_v44, %v1599_v23  ;;  %v6213_v3 = vpop.f32.mrb[35].mxu0 }
 0x2eb   : > { %6267 = vmatmul.mubr.msk.bf16.vlgmr.msra.gmra.mrb[28].mxu1 %vm1644_vm6, %v1952_v1 }
 0x2ec   : > { %6271 = vmatpush3.bf16.msra.mxu1 %v6531_v43  ;;  %6274 = vmatprep.mubr.msk.bf16.mxu1 %vm6735_vm2, %v6734_v18 }
 0x2ed   : > { %6272 = vmatprep.subr.bf16.mxu1 %v6734_v18 }
 0x2ee   : > { %v1607_v6 = vpop.f32.mrb[36].mxu0 }
 0x2ef   : > { %v6216_v11 = vpop.f32.mrb[37].mxu0 }
 0x2f0   : > { %6273 = vmatpush3.bf16.msra.mxu1 %v2039_v5  ;;  %v1610_v29 = vpop.f32.mrb[38].mxu0 }
 0x2f1   : > { %6278 = vmatprep.subr.bf16.mxu1 %v6734_v18  ;;  %v2084_v9 = vpack.c.bf16 %v1610_v29, %v1607_v6  ;;  %v6217_v58 = vpop.f32.mrb[39].mxu0 }
 0x2f3   : > { %6275 = vmatmul.mubr.msk.bf16.vlgmr.msra.gmra.mrb[32].mxu1 %vm1644_vm6, %v2018_v2 }
 0x2f4   : > { %6279 = vmatpush3.bf16.msra.mxu1 %v6533_v12  ;;  %6282 = vmatprep.mubr.msk.bf16.mxu1 %vm6735_vm2, %v6734_v18 }
 0x2f5   : > { %6280 = vmatprep.subr.bf16.mxu1 %v6734_v18 }
 0x2f6   : > { %v1615_v33 = vpop.f32.mrb[40].mxu0 }
 0x2f7   : > { %v6220_v31 = vpop.f32.mrb[41].mxu0 }
 0x2f8   : > { %6281 = vmatpush3.bf16.msra.mxu1 %v2105_v32  ;;  %v1618_v39 = vpop.f32.mrb[42].mxu0 }
 0x2f9   : > { %6286 = vmatprep.subr.bf16.mxu1 %v6734_v18  ;;  %v2150_v16 = vpack.c.bf16 %v1618_v39, %v1615_v33  ;;  %v6221_v7 = vpop.f32.mrb[43].mxu0  ;;  %v2221_v33 = vpop.permute.xlu0 %2220 }
 0x2fa   : > { %v6539_v7 = vld [vmem:[%s8024_s7 + $0x10] sm:$0x1f]  }
 0x2fb   : > { %6283 = vmatmul.mubr.msk.bf16.vlgmr.msra.gmra.mrb[36].mxu1 %vm1644_vm6, %v2084_v9 }
 0x2fc   : > { %6287 = vmatpush3.bf16.msra.mxu1 %v6535_v36  ;;  %6290 = vmatprep.mubr.msk.bf16.mxu1 %vm6735_vm2, %v6734_v18 }
 0x2fd   : > { %6288 = vmatprep.subr.bf16.mxu1 %v6734_v18 }
 0x300   : > { %6289 = vmatpush3.bf16.msra.mxu1 %v2171_v63  ;;  %v6540_v63 = vld [vmem:[%s8024_s7 + $0x18] sm:$0x1f]  }
 0x301   : > { %6300 = vmatprep.subr.bf16.mxu1 %v6734_v18 }
 0x303   : > { %6291 = vmatmul.mubr.msk.bf16.vlgmr.msra.gmra.mrb[40].mxu1 %vm1644_vm6, %v2150_v16  ;;  %v2226_v16 = vpop.permute.xlu1 %2225 }
 0x304   : > { %6302 = vmatprep.mubr.msk.bf16.mxu1 %vm6735_vm2, %v6734_v18  ;;  %6301 = vmatpush3.bf16.msra.mxu1 %v2297_v14  ;;  %v2351_v14 = vand.u32 %v6539_v7, %v7192_v10 }
 0x305   : > { %6312 = vmatprep.subr.bf16.mxu1 %v6734_v18 }
 0x396   : > { %v1689_v19 = vpop.f32.mrb[8].mxu1 }
 0x397   : > { %v6228_v20 = vpop.f32.mrb[9].mxu1 }
 0x398   : > { %v1692_v37 = vpop.f32.mrb[10].mxu1 }
 0x399   : > { %v6229_v38 = vpop.f32.mrb[11].mxu1 }
 0x39e   : > { %v1747_v17 = vpop.f32.mrb[12].mxu1 }
 0x39f   : > { %v1748_v40 = vadd.f32 %v1747_v17, %v1689_v19  ;;  %v6236_v41 = vpop.f32.mrb[13].mxu1  ;;  %v2403_v19 = vand.u32 %v6540_v63, %v7192_v10 }
 0x3a0   : > { %v1750_v42 = vpop.f32.mrb[14].mxu1 }
 0x3a1   : > { %v1751_v24 = vadd.f32 %v1750_v42, %v1692_v37  ;;  %v6237_v25 = vpop.f32.mrb[15].mxu1 }
 0x3a6   : > { %v1811_v45 = vpop.f32.mrb[16].mxu1 }
 0x3a7   : > { %v1818_v46 = vadd.f32 %v1811_v45, %v1748_v40  ;;  %v6244_v47 = vpop.f32.mrb[17].mxu1 }
 0x3a8   : > { %v1814_v21 = vpop.f32.mrb[18].mxu1 }
 0x3a9   : > { %v1819_v48 = vadd.f32 %v1814_v21, %v1751_v24  ;;  %v6245_v22 = vpop.f32.mrb[19].mxu1 }
 0x3ae   : > { %v1877_v49 = vpop.f32.mrb[20].mxu1 }
 0x3af   : > { %v1884_v50 = vadd.f32 %v1877_v49, %v1818_v46  ;;  %v6252_v34 = vpop.f32.mrb[21].mxu1 }
 0x3b0   : > { %v1880_v35 = vpop.f32.mrb[22].mxu1 }
 0x3b1   : > { %v1885_v51 = vadd.f32 %v1880_v35, %v1819_v48  ;;  %v6253_v52 = vpop.f32.mrb[23].mxu1  ;;  %v2450_v35 = vld [vmem:[%s8025_s8] sm:$0xff] }
 0x3b6   : > { %v1943_v54 = vpop.f32.mrb[24].mxu1 }
 0x3b7   : > { %v1950_v27 = vadd.f32 %v1943_v54, %v1884_v50  ;;  %v6260_v55 = vpop.f32.mrb[25].mxu1 }
 0x3b8   : > { %v1946_v28 = vpop.f32.mrb[26].mxu1  ;;  %v2451_v55 = vld [vmem:[%s8025_s8 + $0x8] sm:$0xff] }
 0x3b9   : > { %v1951_v53 = vadd.f32 %v1946_v28, %v1885_v51  ;;  %v6261_v60 = vpop.f32.mrb[27].mxu1 }
 0x3be   : > { %v2009_v61 = vpop.f32.mrb[28].mxu1 }
 0x3bf   : > { %v2016_v62 = vadd.f32 %v2009_v61, %v1950_v27  ;;  %v6268_v1 = vpop.f32.mrb[29].mxu1 }
 0x3c0   : > { %v2012_v57 = vpop.f32.mrb[30].mxu1  ;;  %v6541_v1 = vld [vmem:[%s8027_s10] sm:$0xff]  }
 0x3c1   : > { %v2017_v59 = vadd.f32 %v2012_v57, %v1951_v53  ;;  %v6269_v23 = vpop.f32.mrb[31].mxu1 }
 0x3c2   : > { %v6543_v23 = vld [vmem:[%s8027_s10 + $0x10] sm:$0xff]  }
 0x3c6   : > { %v2075_v26 = vpop.f32.mrb[32].mxu1 }
 0x3c7   : > { %v2082_v43 = vadd.f32 %v2075_v26, %v2016_v62  ;;  %v6276_v44 = vpop.f32.mrb[33].mxu1  ;;  %v5979_v26 = vld [vmem:[#allocation3] ss:$0 sm:$0xff] }
 0x3c8   : > { %v2078_v56 = vpop.f32.mrb[34].mxu1  ;;  %v6545_v44 = vld [vmem:[%s8027_s10 + $0x20] sm:$0xff]  }
 0x3c9   : > { %v2083_v2 = vadd.f32 %v2078_v56, %v2017_v59  ;;  %v6277_v3 = vpop.f32.mrb[35].mxu1  ;;  %v6542_v59 = vld [vmem:[%s8027_s10 + $0x8] sm:$0xff]  }
 0x3ca   : > { %v6546_v56 = vld [vmem:[%s8027_s10 + $0x28] sm:$0xff]   ;;  %v6548_v3 = vld [vmem:[%s8027_s10 + $0x38] sm:$0xff]  }
 0x3ce   : > { %v2141_v5 = vpop.f32.mrb[36].mxu1 }
 0x3cf   : > { %v2148_v6 = vadd.f32 %v2141_v5, %v2082_v43  ;;  %v6284_v11 = vpop.f32.mrb[37].mxu1  ;;  %v6544_v43 = vld [vmem:[%s8027_s10 + $0x18] sm:$0xff]   ;;  %v6549_v5 = vld [vmem:[%s8027_s10 + $0x40] sm:$0xff]  }
 0x3d0   : > { %v2144_v12 = vpop.f32.mrb[38].mxu1 }
 0x3d1   : > { %v2149_v29 = vadd.f32 %v2144_v12, %v2083_v2  ;;  %v6285_v30 = vpop.f32.mrb[39].mxu1  ;;  %v6547_v2 = vld [vmem:[%s8027_s10 + $0x30] sm:$0xff]   ;;  %v7391_v12 = vpop.permute.xlu0 %3145 }
 0x3d5   : > { %v7395_v30 = vpop.permute.xlu0 %5319 }
 0x3d6   : > { %v2207_v9 = vpop.f32.mrb[40].mxu1 }
 0x3d7   : > { %v2214_v58 = vadd.f32 %v2207_v9, %v2148_v6  ;;  %v6292_v32 = vpop.f32.mrb[41].mxu1  ;;  %v5715_v6 = vld [vmem:[%s8028_s11 + $0x2] sm:$0x3] }
 0x3d8   : > { %v2210_v31 = vpop.f32.mrb[42].mxu1  ;;  %v2687_v11 = vsel %vm1044_vm0, %v5715_v6, 0 }
 0x3d9   : > { %v2228_v36 = vadd.f32 %v2221_v33, %v2214_v58  ;;  %v2215_v39 = vadd.f32 %v2210_v31, %v2149_v29  ;;  %v6293_v15 = vpop.f32.mrb[43].mxu1  ;;  %v7393_v29 = vpop.permute.xlu1 %3150 }
 0x3db   : > { %v2229_v0 = vadd.f32 %v2226_v16, %v2215_v39  ;;  %v2230_v8 = vmax.f32 %v2228_v36, 0.0  ;;  %v2468_v16 = vld [vmem:[#allocation2] sm:$0x1] }
 0x3dd   : > { %v2231_v13 = vmax.f32 %v2229_v0, 0.0 }
 0x3df   : > { %v2232_v20 = vpack.c.bf16 %v2231_v13, %v2230_v8 }
 0x3e1   : > { %6297 = vmatmul.mubr.msk.bf16.vlgmr.msra.gmra.mrb[44].mxu0 %vm2240_vm7, %v2232_v20  ;;  %6303 = vmatmul.mubr.msk.bf16.vlgmr.msra.gmra.mrb[44].mxu1 %vm2240_vm7, %v2232_v20 }
 0x3e2   : > { %6307 = vmatpush3.bf16.msra.mxu0 %v2351_v14  ;;  %6313 = vmatpush3.bf16.msra.mxu1 %v2403_v19 }
 0x3e3   : > { %6308 = vmatprep.mubr.msk.bf16.mxu0 %vm6735_vm2, %v6734_v18  ;;  %6314 = vmatprep.mubr.msk.bf16.mxu1 %vm6735_vm2, %v6734_v18 }
 0x3e4   : > { %6318 = vmatprep.subr.bf16.mxu0 %v6734_v18  ;;  %6356 = vmatprep.subr.bf16.mxu1 %v6734_v18 }
 0x3e9   : > { %6309 = vmatmul.mubr.msk.bf16.vlgmr.msra.gmra.mrb[48].mxu0 %vm2240_vm7, %v2232_v20  ;;  %6315 = vmatmul.mubr.msk.bf16.vlgmr.msra.gmra.mrb[48].mxu1 %vm2240_vm7, %v2232_v20 }
 0x3ea   : > { %6320 = vmatprep.mubr.msk.bf16.mxu0 %vm6735_vm2, %v6734_v18  ;;  %6358 = vmatprep.mubr.msk.bf16.mxu1 %vm6735_vm2, %v6734_v18 }
 0x3eb   : > { %6357 = vmatpush3.bf16.msra.mxu1 %v2687_v11 }
 0x3ec   : > { %6362 = vmatprep.subr.bf16.mxu1 %v6734_v18 }
 0x4b4   : > { %v2281_v37 = vpop.f32.mrb[44].mxu0  ;;  %v2333_v38 = vpop.f32.mrb[44].mxu1 }
 0x4b5   : > { %v2340_v17 = vmax.f32 %v2281_v37, %v2333_v38  ;;  %v6298_v40 = vpop.f32.mrb[45].mxu0  ;;  %v6304_v41 = vpop.f32.mrb[45].mxu1 }
 0x4b6   : > { %v2284_v42 = vpop.f32.mrb[46].mxu0  ;;  %v2336_v24 = vpop.f32.mrb[46].mxu1 }
 0x4b7   : > { %v2341_v25 = vmax.f32 %v2284_v42, %v2336_v24  ;;  %v6299_v45 = vpop.f32.mrb[47].mxu0  ;;  %v6305_v46 = vpop.f32.mrb[47].mxu1 }
 0x4b8   : > { %v2679_v46 = vld [vmem:[%s8028_s11] sm:$0x3] }
 0x4bc   : > { %v2387_v47 = vpop.f32.mrb[48].mxu0  ;;  %v2439_v21 = vpop.f32.mrb[48].mxu1 }
 0x4bd   : > { %v2446_v48 = vmax.f32 %v2387_v47, %v2439_v21  ;;  %v6310_v22 = vpop.f32.mrb[49].mxu0  ;;  %v6316_v49 = vpop.f32.mrb[49].mxu1 }
 0x4be   : > { %v2390_v50 = vpop.f32.mrb[50].mxu0  ;;  %v2442_v34 = vpop.f32.mrb[50].mxu1  ;;  %v2734_v49 = vsel %vm1044_vm0, %v2679_v46, 0 }
 0x4bf   : > { %v2448_v51 = vmax.f32 %v2340_v17, %v2446_v48  ;;  %v2447_v52 = vmax.f32 %v2390_v50, %v2442_v34  ;;  %v6311_v54 = vpop.f32.mrb[51].mxu0  ;;  %v6317_v27 = vpop.f32.mrb[51].mxu1  ;;  %v5718_v34 = vld [vmem:[%s8028_s11 + $0x4] sm:$0x3] }
 0x4c0   : > { %v2784_v27 = vsel %vm1044_vm0, %v5718_v34, 0 }
 0x4c1   : > { %v2449_v28 = vmax.f32 %v2341_v25, %v2447_v52  ;;  %v2452_v53 = vmul.f32 %v2450_v35, %v2448_v51 }
 0x4c3   : > { %v2481_v60 = vpack.c.bf16 %v2449_v28, %v2448_v51  ;;  %v2455_v61 = vsel %vm2454_vm8, %v2452_v53, 0.0  ;;  %v2453_v62 = vmul.f32 %v2451_v55, %v2449_v28  ;;  %v5720_v28 = vld [vmem:[%s8028_s11 + $0x6] sm:$0x3] }
 0x4c4   : > { %2456 = vadd.xlane.f32.xlu1 %v2455_v61 }
 0x4c5   : > { %6319 = vmatpush3.bf16.msra.mxu0 %v2481_v60  ;;  %v2458_v57 = vsel %vm2454_vm8, %v2453_v62, 0.0 }
 0x4c6   : > { %2459 = vadd.xlane.f32.xlu0 %v2458_v57  ;;  %6410 = vmatprep.subr.bf16.mxu0 %v6734_v18 }
 0x4c8   : > { %6321 = vmatmul.mubr.msk.bf16.vlgmr.msra.gmra.mrb[52].mxu0 %vm2545_vm9, %v6541_v1  ;;  %v2836_v1 = vsel %vm1044_vm0, %v5720_v28, 0 }
 0x4c9   : > { %6324 = vmatprep.mubr.msk.bf16.mxu0 %vm6735_vm2, %v6734_v18 }
 0x4d0   : > { %6325 = vmatmul.mubr.msk.bf16.gmra.mrb[56].mxu0 %vm2545_vm9, %v6542_v59  ;;  %v5722_v59 = vld [vmem:[%s8028_s11 + $0x8] sm:$0x3] }
 0x4d1   : > { %6328 = vmatprep.mubr.msk.bf16.mxu0 %vm6735_vm2, %v6734_v18 }
 0x4d8   : > { %6329 = vmatmul.mubr.msk.bf16.gmra.mrb[60].mxu0 %vm2545_vm9, %v6543_v23 }
 0x4d9   : > { %6332 = vmatprep.mubr.msk.bf16.mxu0 %vm6735_vm2, %v6734_v18 }
 0x4dc   : > { %5336 = vperm.xlu0 %6480, %v5979_v26  }
 0x4e0   : > { %6333 = vmatmul.mubr.msk.bf16.gmra.mrb[64].mxu0 %vm2545_vm9, %v6544_v43 }
 0x4e1   : > { %6336 = vmatprep.mubr.msk.bf16.mxu0 %vm6735_vm2, %v6734_v18 }
 0x4e8   : > { %6337 = vmatmul.mubr.msk.bf16.gmra.mrb[68].mxu0 %vm2545_vm9, %v6545_v44 }
 0x4e9   : > { %6340 = vmatprep.mubr.msk.bf16.mxu0 %vm6735_vm2, %v6734_v18 }
 0x4f0   : > { %6341 = vmatmul.mubr.msk.bf16.gmra.mrb[72].mxu0 %vm2545_vm9, %v6546_v56  ;;  %v2888_v56 = vsel %vm1044_vm0, %v5722_v59, 0 }
 0x4f1   : > { %6344 = vmatprep.mubr.msk.bf16.mxu0 %vm6735_vm2, %v6734_v18 }
 0x4f8   : > { %6345 = vmatmul.mubr.msk.bf16.gmra.mrb[76].mxu0 %vm2545_vm9, %v6547_v2 }
 0x4f9   : > { %6348 = vmatprep.mubr.msk.bf16.mxu0 %vm6735_vm2, %v6734_v18 }
 0x500   : > { %6349 = vmatmul.mubr.msk.bf16.gmra.mrb[80].mxu0 %vm2545_vm9, %v6548_v3  ;;  %v5724_v3 = vld [vmem:[%s8028_s11 + $0xa] sm:$0x3] }
 0x501   : > { %6352 = vmatprep.mubr.msk.bf16.mxu0 %vm6735_vm2, %v6734_v18 }
 0x508   : > { %6353 = vmatmul.mubr.msk.bf16.gmra.mrb[84].mxu0 %vm2545_vm9, %v6549_v5 }
 0x509   : > { %6412 = vmatprep.mubr.msk.bf16.mxu0 %vm6735_vm2, %v6734_v18 }
 0x551   : > { %v2457_v9 = vpop.xlane.xlu1 %2456 }
 0x553   : > { %v2460_v58 = vpop.xlane.xlu0 %2459 }
 0x554   : > { %v2461_v32 = vadd.f32 %v2460_v58, %v2457_v9  ;;  %v2940_v58 = vsel %vm1044_vm0, %v5724_v3, 0 }
 0x556   : > { %v2462_v33 = vrot.slane %v2461_v32, 4 }
 0x558   : > { %v2463_v31 = vadd.f32 %v2462_v33, %v2461_v32  ;;  %v5726_v33 = vld [vmem:[%s8028_s11 + $0xc] sm:$0x3] }
 0x55a   : > { %v2464_v36 = vrot.slane %v2463_v31, 2 }
 0x55c   : > { %v2465_v39 = vadd.f32 %v2464_v36, %v2463_v31 }
 0x55e   : > { %v2466_v15 = vrot.slane %v2465_v39, 1 }
 0x560   : > { %v2467_v7 = vadd.f32 %v2466_v15, %v2465_v39 }
 0x562   : > { %v2469_v63 = vadd.f32 %v2468_v16, %v2467_v7  ;;  %v2992_v16 = vsel %vm1044_vm0, %v5726_v33, 0 }
 0x564   : > { %v2471_v0 = vand.u32 2147483647, %v2469_v63  ;;  %v2470_v37 = vmax.f32 %v2469_v63, 0.0  ;;  %v5728_v63 = vld [vmem:[%s8028_s11 + $0xe] sm:$0x3] }
 0x566   : > { %v2472_v8 = vsub.f32 0.0, %v2471_v0 }
 0x568   : > { %v2473_v13 = vmul.f32 1.442695, %v2472_v8 }
 0x56a   : > { %6713 = vpow2.f32 %v2473_v13 }
 0x574   : > { %v6714_v14 = vpop.eup %6713 }
 0x575   : > { %v2475_v19 = vadd.f32 1.0, %v6714_v14 }
 0x577   : > { %6715 = vlog2.f32 %v2475_v19  ;;  %v3044_v19 = vsel %vm1044_vm0, %v5728_v63, 0 }
 0x581   : > { %v6716_v20 = vpop.eup %6715 }
 0x582   : > { %v2477_v38 = vmul.f32 0.6931472, %v6716_v20 }
 0x584   : > { %v2478_v17 = vadd.f32 %v2477_v38, %v2470_v37  ;;  %v5730_v37 = vld [vmem:[%s8028_s11 + $0x10] sm:$0x3] }
 0x586   : > { %2480 = vst.msk [vmem:[%s615_s2] sm:$0x1] %vm2479_vm10, %v2478_v17 }
 0x59b   : > { %v2607_v40 = vpop.f32.mrb[52].mxu0 }
 0x59c   : > { %v6322_v41 = vpop.f32.mrb[53].mxu0 }
 0x59d   : > { %v2610_v42 = vpop.f32.mrb[54].mxu0 }
 0x59e   : > { %v2678_v24 = vpack.c.bf16 %v2610_v42, %v2607_v40  ;;  %v6323_v25 = vpop.f32.mrb[55].mxu0  ;;  %v3096_v42 = vsel %vm1044_vm0, %v5730_v37, 0 }
 0x5a3   : > { %v2615_v45 = vpop.f32.mrb[56].mxu0 }
 0x5a4   : > { %v6326_v47 = vpop.f32.mrb[57].mxu0 }
 0x5a5   : > { %v2618_v21 = vpop.f32.mrb[58].mxu0 }
 0x5a6   : > { %v2680_v48 = vpack.c.bf16 %v2618_v21, %v2615_v45  ;;  %v6327_v22 = vpop.f32.mrb[59].mxu0 }
 0x5a8   : > { %6359 = vmatmul.mubr.msk.bf16.vlgmr.msra.gmra.mrb[52].mxu1 %vm2454_vm8, %v2680_v48 }
 0x5a9   : > { %6363 = vmatpush3.bf16.msra.mxu1 %v2734_v49  ;;  %6364 = vmatprep.mubr.msk.bf16.mxu1 %vm6735_vm2, %v6734_v18 }
 0x5aa   : > { %6368 = vmatprep.subr.bf16.mxu1 %v6734_v18 }
 0x5ab   : > { %v2623_v50 = vpop.f32.mrb[60].mxu0 }
 0x5ac   : > { %v6330_v35 = vpop.f32.mrb[61].mxu0 }
 0x5ad   : > { %v2626_v51 = vpop.f32.mrb[62].mxu0 }
 0x5ae   : > { %v2777_v52 = vpack.c.bf16 %v2626_v51, %v2623_v50  ;;  %v6331_v54 = vpop.f32.mrb[63].mxu0 }
 0x5b0   : > { %6365 = vmatmul.mubr.msk.bf16.vlgmr.msra.gmra.mrb[56].mxu1 %vm2454_vm8, %v2678_v24 }
 0x5b1   : > { %6369 = vmatpush3.bf16.msra.mxu1 %v2784_v27  ;;  %6370 = vmatprep.mubr.msk.bf16.mxu1 %vm6735_vm2, %v6734_v18 }
 0x5b2   : > { %6374 = vmatprep.subr.bf16.mxu1 %v6734_v18 }
 0x5b3   : > { %v2631_v55 = vpop.f32.mrb[64].mxu0 }
 0x5b4   : > { %v6334_v53 = vpop.f32.mrb[65].mxu0 }
 0x5b5   : > { %v2634_v60 = vpop.f32.mrb[66].mxu0 }
 0x5b6   : > { %v2829_v61 = vpack.c.bf16 %v2634_v60, %v2631_v55  ;;  %v6335_v62 = vpop.f32.mrb[67].mxu0 }
 0x5b8   : > { %6371 = vmatmul.mubr.msk.bf16.vlgmr.msra.gmra.mrb[60].mxu1 %vm2454_vm8, %v2777_v52 }
 0x5b9   : > { %6375 = vmatpush3.bf16.msra.mxu1 %v2836_v1  ;;  %6376 = vmatprep.mubr.msk.bf16.mxu1 %vm6735_vm2, %v6734_v18 }
 0x5ba   : > { %6380 = vmatprep.subr.bf16.mxu1 %v6734_v18 }
 0x5bb   : > { %v2639_v57 = vpop.f32.mrb[68].mxu0 }
 0x5bc   : > { %v6338_v23 = vpop.f32.mrb[69].mxu0 }
 0x5bd   : > { %v2642_v26 = vpop.f32.mrb[70].mxu0 }
 0x5be   : > { %v2881_v43 = vpack.c.bf16 %v2642_v26, %v2639_v57  ;;  %v6339_v44 = vpop.f32.mrb[71].mxu0 }
 0x5c0   : > { %6377 = vmatmul.mubr.msk.bf16.vlgmr.msra.gmra.mrb[64].mxu1 %vm2454_vm8, %v2829_v61 }
 0x5c1   : > { %6381 = vmatpush3.bf16.msra.mxu1 %v2888_v56  ;;  %6382 = vmatprep.mubr.msk.bf16.mxu1 %vm6735_vm2, %v6734_v18 }
 0x5c2   : > { %6386 = vmatprep.subr.bf16.mxu1 %v6734_v18 }
 0x5c3   : > { %v2647_v2 = vpop.f32.mrb[72].mxu0 }
 0x5c4   : > { %v6342_v5 = vpop.f32.mrb[73].mxu0 }
 0x5c5   : > { %v2650_v6 = vpop.f32.mrb[74].mxu0 }
 0x5c6   : > { %v2933_v11 = vpack.c.bf16 %v2650_v6, %v2647_v2  ;;  %v6343_v9 = vpop.f32.mrb[75].mxu0 }
 0x5c7   : > { %v6565_v9 = vld [vmem:[%s8031_s14 + $0x24] ss:$8 sps:$4 sm:$0xff]  }
 0x5c8   : > { %6383 = vmatmul.mubr.msk.bf16.vlgmr.msra.gmra.mrb[68].mxu1 %vm2454_vm8, %v2881_v43 }
 0x5c9   : > { %6387 = vmatpush3.bf16.msra.mxu1 %v2940_v58  ;;  %6388 = vmatprep.mubr.msk.bf16.mxu1 %vm6735_vm2, %v6734_v18 }
 0x5ca   : > { %6392 = vmatprep.subr.bf16.mxu1 %v6734_v18 }
 0x5cb   : > { %v2655_v32 = vpop.f32.mrb[76].mxu0 }
 0x5cc   : > { %v6346_v31 = vpop.f32.mrb[77].mxu0 }
 0x5cd   : > { %v2658_v36 = vpop.f32.mrb[78].mxu0 }
 0x5ce   : > { %v2985_v39 = vpack.c.bf16 %v2658_v36, %v2655_v32  ;;  %v6347_v15 = vpop.f32.mrb[79].mxu0 }
 0x5d0   : > { %6389 = vmatmul.mubr.msk.bf16.vlgmr.msra.gmra.mrb[72].mxu1 %vm2454_vm8, %v2933_v11  ;;  %v6563_v11 = vld [vmem:[%s8031_s14 + $0x20] ss:$8 sps:$4 sm:$0xff]  }
 0x5d1   : > { %6393 = vmatpush3.bf16.msra.mxu1 %v2992_v16  ;;  %6394 = vmatprep.mubr.msk.bf16.mxu1 %vm6735_vm2, %v6734_v18 }
 0x5d2   : > { %6398 = vmatprep.subr.bf16.mxu1 %v6734_v18 }
 0x5d3   : > { %v2663_v7 = vpop.f32.mrb[80].mxu0 }
 0x5d4   : > { %v6350_v0 = vpop.f32.mrb[81].mxu0 }
 0x5d5   : > { %v2666_v8 = vpop.f32.mrb[82].mxu0 }
 0x5d6   : > { %v3037_v13 = vpack.c.bf16 %v2666_v8, %v2663_v7  ;;  %v6351_v14 = vpop.f32.mrb[83].mxu0 }
 0x5d8   : > { %6395 = vmatmul.mubr.msk.bf16.vlgmr.msra.gmra.mrb[76].mxu1 %vm2454_vm8, %v2985_v39 }
 0x5d9   : > { %6399 = vmatpush3.bf16.msra.mxu1 %v3044_v19  ;;  %6400 = vmatprep.mubr.msk.bf16.mxu1 %vm6735_vm2, %v6734_v18 }
 0x5da   : > { %6404 = vmatprep.subr.bf16.mxu1 %v6734_v18 }
 0x5db   : > { %v2671_v20 = vpop.f32.mrb[84].mxu0 }
 0x5dc   : > { %v6354_v38 = vpop.f32.mrb[85].mxu0 }
 0x5dd   : > { %v2674_v17 = vpop.f32.mrb[86].mxu0 }
 0x5de   : > { %v3089_v40 = vpack.c.bf16 %v2674_v17, %v2671_v20  ;;  %v6355_v41 = vpop.f32.mrb[87].mxu0 }
 0x5e0   : > { %6401 = vmatmul.mubr.msk.bf16.vlgmr.msra.gmra.mrb[80].mxu1 %vm2454_vm8, %v3037_v13 }
 0x5e1   : > { %6405 = vmatpush3.bf16.msra.mxu1 %v3096_v42  ;;  %6406 = vmatprep.mubr.msk.bf16.mxu1 %vm6735_vm2, %v6734_v18 }
 0x5e2   : > { %3459 = vmatprep.subr.bf16.mxu1 %v6565_v9 }
 0x5e8   : > { %6407 = vmatmul.mubr.msk.bf16.vlgmr.msra.gmra.mrb[84].mxu1 %vm2454_vm8, %v3089_v40 }
 0x5e9   : > { %3491 = vmatprep.mubr.bf16.mxu1 %v6733_v4  ;;  %3460 = vmatpush1.bf16.msra.mxu1 %v6563_v11  ;;  %v6580_v11 = vld [vmem:[%s8031_s14 + $0x54] ss:$8 sps:$4 sm:$0x1f]  }
 0x67b   : > { %v2723_v24 = vpop.f32.mrb[52].mxu1 }
 0x67c   : > { %v6360_v25 = vpop.f32.mrb[53].mxu1 }
 0x67d   : > { %v2726_v45 = vpop.f32.mrb[54].mxu1  ;;  %v6550_v25 = vld [vmem:[%s8030_s13] sm:$0xff]  }
 0x67e   : > { %v6361_v46 = vpop.f32.mrb[55].mxu1 }
 0x67f   : > { %v6554_v46 = vld [vmem:[%s8030_s13 + $0x20] sm:$0xff]  }
 0x683   : > { %v2770_v47 = vpop.f32.mrb[56].mxu1 }
 0x684   : > { %v2771_v21 = vadd.f32 %v2770_v47, %v2723_v24  ;;  %v6366_v48 = vpop.f32.mrb[57].mxu1  ;;  %v6555_v47 = vld [vmem:[%s8030_s13 + $0x28] sm:$0xff]  }
 0x685   : > { %v2773_v22 = vpop.f32.mrb[58].mxu1  ;;  %v6557_v48 = vld [vmem:[%s8030_s13 + $0x38] sm:$0xff]  }
 0x686   : > { %v2774_v49 = vadd.f32 %v2773_v22, %v2726_v45  ;;  %v6367_v50 = vpop.f32.mrb[59].mxu1  ;;  %v6553_v45 = vld [vmem:[%s8030_s13 + $0x18] sm:$0xff]   ;;  %v6558_v22 = vld [vmem:[%s8030_s13 + $0x40] sm:$0xff]  }
 0x687   : > { %v6560_v50 = vld [vmem:[%s8030_s13 + $0x50] sm:$0xff]  }
 0x68b   : > { %v2820_v34 = vpop.f32.mrb[60].mxu1 }
 0x68c   : > { %v2827_v35 = vadd.f32 %v2820_v34, %v2771_v21  ;;  %v6372_v51 = vpop.f32.mrb[61].mxu1  ;;  %v6556_v21 = vld [vmem:[%s8030_s13 + $0x30] sm:$0xff]  }
 0x68d   : > { %v2823_v52 = vpop.f32.mrb[62].mxu1  ;;  %v6568_v34 = vld [vmem:[%s8031_s14 + $0x34] ss:$8 sps:$4 sm:$0x1f]  }
 0x68e   : > { %v2828_v54 = vadd.f32 %v2823_v52, %v2774_v49  ;;  %v6373_v27 = vpop.f32.mrb[63].mxu1  ;;  %v6559_v49 = vld [vmem:[%s8030_s13 + $0x48] sm:$0xff]   ;;  %v3457_v51 = vand.u32 %v6568_v34, %v7192_v10 }
 0x68f   : > { %v6571_v27 = vld [vmem:[%s8031_s14 + $0x4] ss:$8 sps:$4 sm:$0xff]  }
 0x690   : > { %3461 = vmatprep.subr.bf16.mxu1 %v3457_v51  ;;  %v6596_v51 = vld [vmem:[%s8031_s14 + $0xb0] ss:$8 sps:$4 sm:$0x1f]  }
 0x693   : > { %v2872_v55 = vpop.f32.mrb[64].mxu1 }
 0x694   : > { %v2879_v28 = vadd.f32 %v2872_v55, %v2827_v35  ;;  %v6378_v53 = vpop.f32.mrb[65].mxu1  ;;  %v6566_v35 = vld [vmem:[%s8031_s14 + $0x30] ss:$8 sps:$4 sm:$0x1f]   ;;  %v6562_v55 = vld [vmem:[%s8030_s13 + $0x60] ss:$0 sps:$4 sm:$0xff]  }
 0x695   : > { %v2875_v60 = vpop.f32.mrb[66].mxu1  ;;  %v3454_v52 = vand.u32 %v6566_v35, %v7192_v10  ;;  %v6622_v53 = vld [vmem:[%s8031_s14 + $0x1a4] ss:$8 sps:$4 sm:$0xff]   ;;  %v6593_v35 = vld [vmem:[%s8031_s14 + $0xa0] ss:$8 sps:$4 sm:$0xff]  }
 0x696   : > { %v2880_v61 = vadd.f32 %v2875_v60, %v2828_v54  ;;  %v6379_v62 = vpop.f32.mrb[67].mxu1  ;;  %v6561_v54 = vld [vmem:[%s8030_s13 + $0x58] sm:$0xff]  }
 0x697   : > { %3462 = vmatpush1.bf16.msra.mxu1 %v3454_v52  ;;  %v6644_v60 = vld [vmem:[%s8031_s14 + $0x1b0] ss:$8 sps:$4 sm:$0x1f]  }
 0x698   : > { %3527 = vmatprep.subr.bf16.mxu1 %v6571_v27  ;;  %v4432_v62 = vand.u32 %v6644_v60, %v7192_v10 }
 0x69b   : > { %v2924_v1 = vpop.f32.mrb[68].mxu1 }
 0x69c   : > { %v2931_v57 = vadd.f32 %v2924_v1, %v2879_v28  ;;  %v6384_v59 = vpop.f32.mrb[69].mxu1  ;;  %v6620_v28 = vld [vmem:[%s8031_s14 + $0x1a0] ss:$8 sps:$4 sm:$0xff]   ;;  %v6652_v1 = vld [vmem:[%s8031_s14 + $0x1e4] ss:$8 sps:$4 sm:$0xff]  }
 0x69d   : > { %v2927_v23 = vpop.f32.mrb[70].mxu1 }
 0x69e   : > { %v2932_v26 = vadd.f32 %v2927_v23, %v2880_v61  ;;  %v6385_v43 = vpop.f32.mrb[71].mxu1 }
 0x69f   : > { %v6569_v43 = vld [vmem:[%s8031_s14] ss:$8 sps:$4 sm:$0xff]  }
 0x6a3   : > { %v2976_v44 = vpop.f32.mrb[72].mxu1 }
 0x6a4   : > { %v2983_v56 = vadd.f32 %v2976_v44, %v2931_v57  ;;  %v6390_v2 = vpop.f32.mrb[73].mxu1  ;;  %v6574_v57 = vld [vmem:[%s8031_s14 + $0x14] ss:$8 sps:$4 sm:$0x1f]  }
 0x6a5   : > { %v2979_v3 = vpop.f32.mrb[74].mxu1  ;;  %v6572_v44 = vld [vmem:[%s8031_s14 + $0x10] ss:$8 sps:$4 sm:$0x1f]   ;;  %v3525_v2 = vand.u32 %v6574_v57, %v7192_v10 }
 0x6a6   : > { %v2984_v5 = vadd.f32 %v2979_v3, %v2932_v26  ;;  %v6391_v6 = vpop.f32.mrb[75].mxu1 }
 0x6a7   : > { %v6577_v6 = vld [vmem:[%s8031_s14 + $0x44] ss:$8 sps:$4 sm:$0xff]  }
 0x6ab   : > { %v3028_v58 = vpop.f32.mrb[76].mxu1 }
 0x6ac   : > { %v3035_v32 = vadd.f32 %v3028_v58, %v2983_v56  ;;  %v6396_v33 = vpop.f32.mrb[77].mxu1 }
 0x6ad   : > { %v3031_v31 = vpop.f32.mrb[78].mxu1  ;;  %v6578_v33 = vld [vmem:[%s8031_s14 + $0x50] ss:$8 sps:$4 sm:$0x1f]  }
 0x6ae   : > { %v3036_v36 = vadd.f32 %v3031_v31, %v2984_v5  ;;  %v6397_v39 = vpop.f32.mrb[79].mxu1  ;;  %v3522_v5 = vand.u32 %v6572_v44, %v7192_v10  ;;  %v6610_v44 = vld [vmem:[%s8031_s14 + $0xf4] ss:$8 sps:$4 sm:$0x1f]  }
 0x6af   : > { %v3599_v39 = vand.u32 %v6580_v11, %v7192_v10  ;;  %v6608_v11 = vld [vmem:[%s8031_s14 + $0xf0] ss:$8 sps:$4 sm:$0x1f]  }
 0x6b3   : > { %v3080_v15 = vpop.f32.mrb[80].mxu1 }
 0x6b4   : > { %v3087_v16 = vadd.f32 %v3080_v15, %v3035_v32  ;;  %v6402_v7 = vpop.f32.mrb[81].mxu1  ;;  %v6575_v32 = vld [vmem:[%s8031_s14 + $0x40] ss:$8 sps:$4 sm:$0xff]  }
 0x6b5   : > { %v3083_v63 = vpop.f32.mrb[82].mxu1  ;;  %v6583_v7 = vld [vmem:[%s8031_s14 + $0x64] ss:$8 sps:$4 sm:$0xff]  }
 0x6b6   : > { %v3088_v0 = vadd.f32 %v3083_v63, %v3036_v36  ;;  %v6403_v8 = vpop.f32.mrb[83].mxu1  ;;  %v6586_v63 = vld [vmem:[%s8031_s14 + $0x74] ss:$8 sps:$4 sm:$0x1f]  }
 0x6bb   : > { %v3132_v13 = vpop.f32.mrb[84].mxu1 }
 0x6bc   : > { %v3139_v14 = vadd.f32 %v3132_v13, %v3087_v16  ;;  %v6408_v19 = vpop.f32.mrb[85].mxu1  ;;  %v3596_v16 = vand.u32 %v6578_v33, %v7192_v10  ;;  %v6650_v33 = vld [vmem:[%s8031_s14 + $0x1e0] ss:$8 sps:$4 sm:$0xff]  }
 0x6bd   : > { %v3135_v20 = vpop.f32.mrb[86].mxu1  ;;  %v6584_v19 = vld [vmem:[%s8031_s14 + $0x70] ss:$8 sps:$4 sm:$0x1f]  }
 0x6be   : > { %v3153_v37 = vadd.f32 %v7391_v12, %v3139_v14  ;;  %v3140_v38 = vadd.f32 %v3135_v20, %v3088_v0  ;;  %v6409_v17 = vpop.f32.mrb[87].mxu1  ;;  %v6551_v12 = vld [vmem:[%s8030_s13 + $0x8] sm:$0xff]  }
 0x6bf   : > { %v6581_v14 = vld [vmem:[%s8031_s14 + $0x60] ss:$8 sps:$4 sm:$0xff]   ;;  %v3672_v17 = vand.u32 %v6584_v19, %v7192_v10 }
 0x6c0   : > { %v3154_v40 = vadd.f32 %v7393_v29, %v3140_v38  ;;  %v3155_v41 = vmax.f32 %v3153_v37, 0.0  ;;  %v6552_v29 = vld [vmem:[%s8030_s13 + $0x10] sm:$0xff]   ;;  %v3675_v37 = vand.u32 %v6586_v63, %v7192_v10  ;;  %v6611_v19 = vld [vmem:[%s8031_s14 + $0x100] ss:$8 sps:$4 sm:$0xff]  }
 0x6c2   : > { %v3156_v42 = vmax.f32 %v3154_v40, 0.0  ;;  %v6589_v40 = vld [vmem:[%s8031_s14 + $0x84] ss:$8 sps:$4 sm:$0xff]  }
 0x6c4   : > { %v3157_v24 = vpack.c.bf16 %v3156_v42, %v3155_v41  ;;  %v6592_v41 = vld [vmem:[%s8031_s14 + $0x94] ss:$8 sps:$4 sm:$0x1f]  }
 0x6c6   : > { %6411 = vmatpush3.bf16.msra.mxu0 %v3157_v24 }
 0x6c7   : > { %4437 = vmatprep.subr.bf16.mxu0 %v6622_v53  ;;  %v6604_v53 = vld [vmem:[%s8031_s14 + $0xd4] ss:$8 sps:$4 sm:$0x1f]  }
 0x6c9   : > { %6413 = vmatmul.mubr.msk.bf16.vlgmr.msra.gmra.mrb[88].mxu0 %vm2545_vm9, %v6550_v25  ;;  %v6587_v25 = vld [vmem:[%s8031_s14 + $0x80] ss:$8 sps:$4 sm:$0xff]  }
 0x6ca   : > { %6416 = vmatprep.mubr.msk.bf16.mxu0 %vm6735_vm2, %v6734_v18  ;;  %4438 = vmatpush1.bf16.msra.mxu0 %v6620_v28  ;;  %v6601_v28 = vld [vmem:[%s8031_s14 + $0xc4] ss:$8 sps:$4 sm:$0xff]  }
 0x6d1   : > { %6417 = vmatmul.mubr.msk.bf16.gmra.mrb[92].mxu0 %vm2545_vm9, %v6551_v12  ;;  %v6590_v12 = vld [vmem:[%s8031_s14 + $0x90] ss:$8 sps:$4 sm:$0x1f]  }
 0x6d2   : > { %6420 = vmatprep.mubr.msk.bf16.mxu0 %vm6735_vm2, %v6734_v18 }
 0x6d9   : > { %6421 = vmatmul.mubr.msk.bf16.gmra.mrb[96].mxu0 %vm2545_vm9, %v6552_v29 }
 0x6da   : > { %6424 = vmatprep.mubr.msk.bf16.mxu0 %vm6735_vm2, %v6734_v18 }
 0x6e1   : > { %6425 = vmatmul.mubr.msk.bf16.gmra.mrb[100].mxu0 %vm2545_vm9, %v6553_v45 }
 0x6e2   : > { %6428 = vmatprep.mubr.msk.bf16.mxu0 %vm6735_vm2, %v6734_v18 }
 0x6e9   : > { %6429 = vmatmul.mubr.msk.bf16.gmra.mrb[104].mxu0 %vm2545_vm9, %v6554_v46  ;;  %v3751_v46 = vand.u32 %v6592_v41, %v7192_v10 }
 0x6ea   : > { %6432 = vmatprep.mubr.msk.bf16.mxu0 %vm6735_vm2, %v6734_v18 }
 0x6f1   : > { %6433 = vmatmul.mubr.msk.bf16.gmra.mrb[108].mxu0 %vm2545_vm9, %v6555_v47 }
 0x6f2   : > { %6436 = vmatprep.mubr.msk.bf16.mxu0 %vm6735_vm2, %v6734_v18 }
 0x6f9   : > { %6437 = vmatmul.mubr.msk.bf16.gmra.mrb[112].mxu0 %vm2545_vm9, %v6556_v21  ;;  %v3748_v21 = vand.u32 %v6590_v12, %v7192_v10 }
 0x6fa   : > { %6440 = vmatprep.mubr.msk.bf16.mxu0 %vm6735_vm2, %v6734_v18 }
 0x701   : > { %6441 = vmatmul.mubr.msk.bf16.gmra.mrb[116].mxu0 %vm2545_vm9, %v6557_v48  ;;  %v6595_v48 = vld [vmem:[%s8031_s14 + $0xa4] ss:$8 sps:$4 sm:$0xff]  }
 0x702   : > { %6444 = vmatprep.mubr.msk.bf16.mxu0 %vm6735_vm2, %v6734_v18 }
 0x709   : > { %6445 = vmatmul.mubr.msk.bf16.gmra.mrb[120].mxu0 %vm2545_vm9, %v6558_v22  ;;  %v6598_v22 = vld [vmem:[%s8031_s14 + $0xb4] ss:$8 sps:$4 sm:$0x1f]  }
 0x70a   : > { %6448 = vmatprep.mubr.msk.bf16.mxu0 %vm6735_vm2, %v6734_v18 }
 0x711   : > { %6449 = vmatmul.mubr.msk.bf16.gmra.mrb[124].mxu0 %vm2545_vm9, %v6559_v49 }
 0x712   : > { %6452 = vmatprep.mubr.msk.bf16.mxu0 %vm6735_vm2, %v6734_v18 }
 0x719   : > { %6453 = vmatmul.mubr.msk.bf16.gmra.mrb[128].mxu0 %vm2545_vm9, %v6560_v50 }
 0x71a   : > { %6456 = vmatprep.mubr.msk.bf16.mxu0 %vm6735_vm2, %v6734_v18 }
 0x721   : > { %6457 = vmatmul.mubr.msk.bf16.gmra.mrb[132].mxu0 %vm2545_vm9, %v6561_v54  ;;  %v3827_v54 = vand.u32 %v6598_v22, %v7192_v10  ;;  %v6676_v22 = vld [vmem:[%s8031_s14 + $0x264] ss:$8 sps:$4 sm:$0xff]  }
 0x722   : > { %6460 = vmatprep.mubr.msk.bf16.mxu0 %vm6735_vm2, %v6734_v18  ;;  %v6646_v18 = vld [vmem:[%s8031_s14 + $0x1b4] ss:$8 sps:$4 sm:$0x1f]  }
 0x723   : > { %v4435_v61 = vand.u32 %v6646_v18, %v7192_v10 }
 0x725   : > { %4439 = vmatprep.subr.bf16.mxu0 %v4435_v61  ;;  %v6599_v61 = vld [vmem:[%s8031_s14 + $0xc0] ss:$8 sps:$4 sm:$0xff]  }
 0x726   : > { %4440 = vmatpush1.bf16.msra.mxu0 %v4432_v62  ;;  %v6602_v62 = vld [vmem:[%s8031_s14 + $0xd0] ss:$8 sps:$4 sm:$0x1f]  }
 0x727   : > { %4589 = vmatprep.subr.bf16.mxu0 %v6652_v1 }
 0x729   : > { %6461 = vmatmul.mubr.msk.bf16.gmra.mrb[136].mxu0 %vm2545_vm9, %v6562_v55  ;;  %v3824_v55 = vand.u32 %v6596_v51, %v7192_v10 }
 0x72a   : > { %4469 = vmatprep.mubr.bf16.mxu0 %v6733_v4 }
 0x79c   : > { %v3319_v59 = vpop.f32.mrb[88].mxu0 }
 0x79d   : > { %v6414_v23 = vpop.f32.mrb[89].mxu0  ;;  %v3421_v36 = vpack.c.bf16 %v3319_v59, %v3319_v59  ;;  %v3903_v59 = vand.u32 %v6604_v53, %v7192_v10 }
 0x79e   : > { %v3322_v26 = vpop.f32.mrb[90].mxu0 }
 0x79f   : > { %v3426_v56 = vpack.c.bf16 %v3322_v26, %v3322_v26  ;;  %v6415_v3 = vpop.f32.mrb[91].mxu0  ;;  %v3900_v26 = vand.u32 %v6602_v62, %v7192_v10  ;;  %v6631_v62 = vld [vmem:[%s8031_s14 + $0x154] ss:$8 sps:$4 sm:$0x1f]  }
 0x7a1   : > { %5766 = vmatmul.mubr.msk.bf16.vlgmr.msra.gmra.mrb[88].mxu1 %vm1644_vm6, %v3426_v56 }
 0x7a2   : > { %3528 = vmatpush1.bf16.msra.mxu1 %v6569_v43  ;;  %3559 = vmatprep.mubr.bf16.mxu1 %v6733_v4  ;;  %v6607_v43 = vld [vmem:[%s8031_s14 + $0xe4] ss:$8 sps:$4 sm:$0xff]  }
 0x7a3   : > { %3529 = vmatprep.subr.bf16.mxu1 %v3525_v2  ;;  %v6658_v2 = vld [vmem:[%s8031_s14 + $0x1f4] ss:$8 sps:$4 sm:$0x1f]  }
 0x7a4   : > { %v3327_v9 = vpop.f32.mrb[92].mxu0 }
 0x7a5   : > { %v6418_v58 = vpop.f32.mrb[93].mxu0  ;;  %v3568_v8 = vpack.c.bf16 %v3327_v9, %v3327_v9 }
 0x7a6   : > { %3530 = vmatpush1.bf16.msra.mxu1 %v3522_v5  ;;  %v3330_v31 = vpop.f32.mrb[94].mxu0  ;;  %v3979_v58 = vand.u32 %v6610_v44, %v7192_v10  ;;  %v6626_v44 = vld [vmem:[%s8031_s14 + $0x140] ss:$8 sps:$4 sm:$0xff]  }
 0x7a7   : > { %3601 = vmatprep.subr.bf16.mxu1 %v6577_v6  ;;  %v6419_v15 = vpop.f32.mrb[95].mxu0  ;;  %v3644_v45 = vpack.c.bf16 %v3330_v31, %v3330_v31  ;;  %v6605_v6 = vld [vmem:[%s8031_s14 + $0xe0] ss:$8 sps:$4 sm:$0xff]  }
 0x7a8   : > { %v3976_v15 = vand.u32 %v6608_v11, %v7192_v10 }
 0x7a9   : > { %5771 = vmatmul.mubr.msk.bf16.vlgmr.msra.gmra.mrb[92].mxu1 %vm1644_vm6, %v3421_v36  ;;  %v6656_v36 = vld [vmem:[%s8031_s14 + $0x1f0] ss:$8 sps:$4 sm:$0x1f]  }
 0x7aa   : > { %3602 = vmatpush1.bf16.msra.mxu1 %v6575_v32  ;;  %3633 = vmatprep.mubr.bf16.mxu1 %v6733_v4  ;;  %v4584_v63 = vand.u32 %v6656_v36, %v7192_v10  ;;  %v6637_v36 = vld [vmem:[%s8031_s14 + $0x174] ss:$8 sps:$4 sm:$0x1f]  }
 0x7ab   : > { %3603 = vmatprep.subr.bf16.mxu1 %v3599_v39  ;;  %v4587_v39 = vand.u32 %v6658_v2, %v7192_v10  ;;  %v6629_v2 = vld [vmem:[%s8031_s14 + $0x150] ss:$8 sps:$4 sm:$0x1f]  }
 0x7ac   : > { %v3335_v0 = vpop.f32.mrb[96].mxu0 }
 0x7ad   : > { %v6422_v13 = vpop.f32.mrb[97].mxu0  ;;  %v3720_v50 = vpack.c.bf16 %v3335_v0, %v3335_v0 }
 0x7ae   : > { %3604 = vmatpush1.bf16.msra.mxu1 %v3596_v16  ;;  %v3338_v20 = vpop.f32.mrb[98].mxu0  ;;  %v6613_v16 = vld [vmem:[%s8031_s14 + $0x104] ss:$8 sps:$4 sm:$0xff]  }
 0x7af   : > { %3677 = vmatprep.subr.bf16.mxu1 %v6583_v7  ;;  %v6423_v38 = vpop.f32.mrb[99].mxu0  ;;  %v3796_v57 = vpack.c.bf16 %v3338_v20, %v3338_v20  ;;  %v6616_v7 = vld [vmem:[%s8031_s14 + $0x114] ss:$8 sps:$4 sm:$0x1f]  }
 0x7b0   : > { %v6614_v20 = vld [vmem:[%s8031_s14 + $0x110] ss:$8 sps:$4 sm:$0x1f]  }
 0x7b1   : > { %5780 = vmatmul.mubr.msk.bf16.vlgmr.msra.gmra.mrb[96].mxu1 %vm1644_vm6, %v3568_v8  ;;  %v6664_v8 = vld [vmem:[%s8031_s14 + $0x224] ss:$8 sps:$4 sm:$0xff]   ;;  %v4052_v12 = vand.u32 %v6614_v20, %v7192_v10 }
 0x7b2   : > { %3678 = vmatpush1.bf16.msra.mxu1 %v6581_v14  ;;  %3709 = vmatprep.mubr.bf16.mxu1 %v6733_v4  ;;  %v6670_v14 = vld [vmem:[%s8031_s14 + $0x234] ss:$8 sps:$4 sm:$0x1f]  }
 0x7b3   : > { %3679 = vmatprep.subr.bf16.mxu1 %v3675_v37 }
 0x7b4   : > { %v7630_v42 = vpop.f32.mrb[100].mxu0 }
 0x7b5   : > { %v6426_v24 = vpop.f32.mrb[101].mxu0  ;;  %v3872_v3 = vpack.c.bf16 %v7630_v42, %v7630_v42  ;;  %v6662_v42 = vld [vmem:[%s8031_s14 + $0x220] ss:$8 sps:$4 sm:$0xff]  }
 0x7b6   : > { %3680 = vmatpush1.bf16.msra.mxu1 %v3672_v17  ;;  %v7638_v29 = vpop.f32.mrb[102].mxu0  ;;  %v4055_v17 = vand.u32 %v6616_v7, %v7192_v10  ;;  %v6668_v24 = vld [vmem:[%s8031_s14 + $0x230] ss:$8 sps:$4 sm:$0x1f]  }
 0x7b7   : > { %3753 = vmatprep.subr.bf16.mxu1 %v6589_v40  ;;  %v6427_v47 = vpop.f32.mrb[103].mxu0  ;;  %v3948_v38 = vpack.c.bf16 %v7638_v29, %v7638_v29  ;;  %v6619_v29 = vld [vmem:[%s8031_s14 + $0x124] ss:$8 sps:$4 sm:$0xff]  }
 0x7b8   : > { %v4736_v47 = vand.u32 %v6668_v24, %v7192_v10  ;;  %v6643_v24 = vld [vmem:[%s8031_s14 + $0x194] ss:$8 sps:$4 sm:$0x1f]  }
 0x7b9   : > { %5789 = vmatmul.mubr.msk.bf16.vlgmr.msra.gmra.mrb[100].mxu1 %vm1644_vm6, %v3644_v45  ;;  %v6625_v45 = vld [vmem:[%s8031_s14 + $0x134] ss:$8 sps:$4 sm:$0x1f]  }
 0x7ba   : > { %3754 = vmatpush1.bf16.msra.mxu1 %v6587_v25  ;;  %3785 = vmatprep.mubr.bf16.mxu1 %v6733_v4  ;;  %v4739_v25 = vand.u32 %v6670_v14, %v7192_v10  ;;  %v4131_v51 = vand.u32 %v6625_v45, %v7192_v10  ;;  %v6635_v14 = vld [vmem:[%s8031_s14 + $0x170] ss:$8 sps:$4 sm:$0x1f]   ;;  %v6638_v45 = vld [vmem:[%s8031_s14 + $0x180] ss:$8 sps:$4 sm:$0xff]  }
 0x7bb   : > { %3755 = vmatprep.subr.bf16.mxu1 %v3751_v46 }
 0x7bc   : > { %v7650_v49 = vpop.f32.mrb[104].mxu0 }
 0x7bd   : > { %v6430_v34 = vpop.f32.mrb[105].mxu0 }
 0x7be   : > { %3756 = vmatpush1.bf16.msra.mxu1 %v3748_v21  ;;  %v7658_v52 = vpop.f32.mrb[106].mxu0  ;;  %v4024_v21 = vpack.c.bf16 %v7650_v49, %v7650_v49  ;;  %v6617_v34 = vld [vmem:[%s8031_s14 + $0x120] ss:$8 sps:$4 sm:$0xff]  }
 0x7bf   : > { %3829 = vmatprep.subr.bf16.mxu1 %v6595_v48  ;;  %v6431_v27 = vpop.f32.mrb[107].mxu0 }
 0x7c1   : > { %5798 = vmatmul.mubr.msk.bf16.vlgmr.msra.gmra.mrb[104].mxu1 %vm1644_vm6, %v3720_v50  ;;  %v6682_v50 = vld [vmem:[%s8031_s14 + $0x274] ss:$8 sps:$4 sm:$0x1f]  }
 0x7c2   : > { %3830 = vmatpush1.bf16.msra.mxu1 %v6593_v35  ;;  %3861 = vmatprep.mubr.bf16.mxu1 %v6733_v4  ;;  %v6623_v35 = vld [vmem:[%s8031_s14 + $0x130] ss:$8 sps:$4 sm:$0x1f]   ;;  %v4891_v53 = vand.u32 %v6682_v50, %v7192_v10 }
 0x7c3   : > { %3831 = vmatprep.subr.bf16.mxu1 %v3827_v54 }
 0x7c4   : > { %v7670_v18 = vpop.f32.mrb[108].mxu0 }
 0x7c5   : > { %v6434_v60 = vpop.f32.mrb[109].mxu0 }
 0x7c6   : > { %3832 = vmatpush1.bf16.msra.mxu1 %v3824_v55  ;;  %v7678_v1 = vpop.f32.mrb[110].mxu0  ;;  %v6674_v55 = vld [vmem:[%s8031_s14 + $0x260] ss:$8 sps:$4 sm:$0xff]   ;;  %v4128_v60 = vand.u32 %v6623_v35, %v7192_v10 }
 0x7c7   : > { %3905 = vmatprep.subr.bf16.mxu1 %v6601_v28  ;;  %v6435_v23 = vpop.f32.mrb[111].mxu0  ;;  %v6680_v28 = vld [vmem:[%s8031_s14 + $0x270] ss:$8 sps:$4 sm:$0x1f]  }
 0x7c9   : > { %5807 = vmatmul.mubr.msk.bf16.vlgmr.msra.gmra.mrb[108].mxu1 %vm1644_vm6, %v3796_v57 }
 0x7ca   : > { %3906 = vmatpush1.bf16.msra.mxu1 %v6599_v61  ;;  %3937 = vmatprep.mubr.bf16.mxu1 %v6733_v4  ;;  %v6628_v61 = vld [vmem:[%s8031_s14 + $0x144] ss:$8 sps:$4 sm:$0xff]  }
 0x7cb   : > { %3907 = vmatprep.subr.bf16.mxu1 %v3903_v59  ;;  %v4888_v59 = vand.u32 %v6680_v28, %v7192_v10  ;;  %v6653_v28 = vld [vmem:[%s8031_s14 + $0x1d0] ss:$8 sps:$4 sm:$0x1f]  }
 0x7cc   : > { %v7690_v56 = vpop.f32.mrb[112].mxu0 }
 0x7cd   : > { %v6438_v5 = vpop.f32.mrb[113].mxu0 }
 0x7ce   : > { %3908 = vmatpush1.bf16.msra.mxu1 %v3900_v26  ;;  %v3370_v9 = vpop.f32.mrb[114].mxu0  ;;  %v6688_v26 = vld [vmem:[%s8031_s14 + $0x2a4] ss:$8 sps:$4 sm:$0xff]   ;;  %v4100_v5 = vpack.c.bf16 %v7658_v52, %v7658_v52  ;;  %v4204_v52 = vand.u32 %v6629_v2, %v7192_v10 }
 0x7cf   : > { %3981 = vmatprep.subr.bf16.mxu1 %v6607_v43  ;;  %v4404_v32 = vpack.c.bf16 %v3370_v9, %v3370_v9  ;;  %v6439_v31 = vpop.f32.mrb[115].mxu0  ;;  %v6694_v43 = vld [vmem:[%s8031_s14 + $0x2b4] ss:$8 sps:$4 sm:$0x1f]  }
 0x7d0   : > { %v6634_v31 = vld [vmem:[%s8031_s14 + $0x164] ss:$8 sps:$4 sm:$0xff]  }
 0x7d1   : > { %5816 = vmatmul.mubr.msk.bf16.vlgmr.msra.gmra.mrb[112].mxu1 %vm1644_vm6, %v3872_v3  ;;  %5879 = vmatmul.mubr.msk.bf16.vlgmr.msra.gmra.mrb[140].mxu0 %vm1644_vm6, %v4404_v32  ;;  %v6692_v32 = vld [vmem:[%s8031_s14 + $0x2b0] ss:$8 sps:$4 sm:$0x1f]  }
 0x7d2   : > { %3982 = vmatpush1.bf16.msra.mxu1 %v6605_v6  ;;  %4013 = vmatprep.mubr.bf16.mxu1 %v6733_v4  ;;  %v4207_v6 = vand.u32 %v6631_v62, %v7192_v10  ;;  %v6661_v62 = vld [vmem:[%s8031_s14 + $0x204] ss:$8 sps:$4 sm:$0xff]  }
 0x7d3   : > { %3983 = vmatprep.subr.bf16.mxu1 %v3979_v58  ;;  %4590 = vmatpush1.bf16.msra.mxu0 %v6650_v33  ;;  %v6686_v58 = vld [vmem:[%s8031_s14 + $0x2a0] ss:$8 sps:$4 sm:$0xff]   ;;  %v5043_v33 = vand.u32 %v6694_v43, %v7192_v10  ;;  %v6665_v43 = vld [vmem:[%s8031_s14 + $0x210] ss:$8 sps:$4 sm:$0x1f]  }
 0x7d4   : > { %v7722_v0 = vpop.f32.mrb[116].mxu0  ;;  %4591 = vmatprep.subr.bf16.mxu0 %v4587_v39  ;;  %4621 = vmatprep.mubr.bf16.mxu0 %v6733_v4  ;;  %v4660_v2 = vand.u32 %v6665_v43, %v7192_v10 }
 0x7d5   : > { %v6442_v13 = vpop.f32.mrb[117].mxu0 }
 0x7d6   : > { %3984 = vmatpush1.bf16.msra.mxu1 %v3976_v15  ;;  %v3378_v37 = vpop.f32.mrb[118].mxu0  ;;  %v5040_v15 = vand.u32 %v6692_v32, %v7192_v10  ;;  %v6632_v13 = vld [vmem:[%s8031_s14 + $0x160] ss:$8 sps:$4 sm:$0xff]   ;;  %v6691_v32 = vld [vmem:[%s8031_s14 + $0x294] ss:$8 sps:$4 sm:$0x1f]  }
 0x7d7   : > { %4057 = vmatprep.subr.bf16.mxu1 %v6613_v16  ;;  %v4556_v40 = vpack.c.bf16 %v3378_v37, %v3378_v37  ;;  %4592 = vmatpush1.bf16.msra.mxu0 %v4584_v63  ;;  %v6443_v41 = vpop.f32.mrb[119].mxu0  ;;  %v4176_v16 = vpack.c.bf16 %v7670_v18, %v7670_v18  ;;  %v6700_v63 = vld [vmem:[%s8031_s14 + $0x2e4] ss:$8 sps:$4 sm:$0xff]  }
 0x7d8   : > { %4741 = vmatprep.subr.bf16.mxu0 %v6664_v8  ;;  %v6706_v8 = vld [vmem:[%s8031_s14 + $0x2f4] ss:$8 sps:$4 sm:$0x1f]   ;;  %v4280_v41 = vand.u32 %v6635_v14, %v7192_v10 }
 0x7d9   : > { %5825 = vmatmul.mubr.msk.bf16.vlgmr.msra.gmra.mrb[116].mxu1 %vm1644_vm6, %v3948_v38  ;;  %v6698_v38 = vld [vmem:[%s8031_s14 + $0x2e0] ss:$8 sps:$4 sm:$0xff]  }
 0x7da   : > { %4058 = vmatpush1.bf16.msra.mxu1 %v6611_v19  ;;  %4089 = vmatprep.mubr.bf16.mxu1 %v6733_v4  ;;  %v4283_v19 = vand.u32 %v6637_v36, %v7192_v10  ;;  %v4967_v36 = vand.u32 %v6691_v32, %v7192_v10 }
 0x7db   : > { %4059 = vmatprep.subr.bf16.mxu1 %v4055_v17  ;;  %5897 = vmatmul.mubr.msk.bf16.vlgmr.msra.gmra.mrb[144].mxu0 %vm1644_vm6, %v4556_v40  ;;  %v6704_v17 = vld [vmem:[%s8031_s14 + $0x2f0] ss:$8 sps:$4 sm:$0x1f]   ;;  %v5195_v40 = vand.u32 %v6706_v8, %v7192_v10 }
 0x7dc   : > { %4742 = vmatpush1.bf16.msra.mxu0 %v6662_v42  ;;  %v7757_v46 = vpop.f32.mrb[120].mxu0  ;;  %4773 = vmatprep.mubr.bf16.mxu0 %v6733_v4  ;;  %v6640_v42 = vld [vmem:[%s8031_s14 + $0x184] ss:$8 sps:$4 sm:$0xff]   ;;  %v6701_v8 = vld [vmem:[%s8031_s14 + $0x2d0] ss:$8 sps:$4 sm:$0x1f]  }
 0x7dd   : > { %v6446_v48 = vpop.f32.mrb[121].mxu0  ;;  %4743 = vmatprep.subr.bf16.mxu0 %v4739_v25  ;;  %v5116_v14 = vand.u32 %v6701_v8, %v7192_v10 }
 0x7de   : > { %4060 = vmatpush1.bf16.msra.mxu1 %v4052_v12  ;;  %v3386_v49 = vpop.f32.mrb[122].mxu0  ;;  %v5192_v12 = vand.u32 %v6704_v17, %v7192_v10  ;;  %v4252_v48 = vpack.c.bf16 %v7678_v1, %v7678_v1  ;;  %v6655_v1 = vld [vmem:[%s8031_s14 + $0x1d4] ss:$8 sps:$4 sm:$0x1f]  }
 0x7df   : > { %4133 = vmatprep.subr.bf16.mxu1 %v6619_v29  ;;  %v4708_v54 = vpack.c.bf16 %v3386_v49, %v3386_v49  ;;  %v6447_v27 = vpop.f32.mrb[123].mxu0  ;;  %v6649_v49 = vld [vmem:[%s8031_s14 + $0x1c4] ss:$8 sps:$4 sm:$0xff]  }
 0x7e0   : > { %4744 = vmatpush1.bf16.msra.mxu0 %v4736_v47  ;;  %v6641_v47 = vld [vmem:[%s8031_s14 + $0x190] ss:$8 sps:$4 sm:$0x1f]  }
 0x7e1   : > { %5834 = vmatmul.mubr.msk.bf16.vlgmr.msra.gmra.mrb[120].mxu1 %vm1644_vm6, %v4024_v21  ;;  %4893 = vmatprep.subr.bf16.mxu0 %v6676_v22  ;;  %v4359_v22 = vand.u32 %v6643_v24, %v7192_v10  ;;  %v4356_v35 = vand.u32 %v6641_v47, %v7192_v10 }
 0x7e2   : > { %4134 = vmatpush1.bf16.msra.mxu1 %v6617_v34  ;;  %4165 = vmatprep.mubr.bf16.mxu1 %v6733_v4 }
 0x7e3   : > { %4135 = vmatprep.subr.bf16.mxu1 %v4131_v51  ;;  %5915 = vmatmul.mubr.msk.bf16.vlgmr.msra.gmra.mrb[148].mxu0 %vm1644_vm6, %v4708_v54  ;;  %v4328_v54 = vpack.c.bf16 %v7690_v56, %v7690_v56  ;;  %v4508_v56 = vand.u32 %v6653_v28, %v7192_v10 }
 0x7e4   : > { %4894 = vmatpush1.bf16.msra.mxu0 %v6674_v55  ;;  %v7793_v57 = vpop.f32.mrb[124].mxu0  ;;  %4925 = vmatprep.mubr.bf16.mxu0 %v6733_v4  ;;  %v6647_v55 = vld [vmem:[%s8031_s14 + $0x1c0] ss:$8 sps:$4 sm:$0xff]  }
 0x7e5   : > { %v6450_v23 = vpop.f32.mrb[125].mxu0  ;;  %4895 = vmatprep.subr.bf16.mxu0 %v4891_v53 }
 0x7e6   : > { %4136 = vmatpush1.bf16.msra.mxu1 %v4128_v60  ;;  %v3394_v3 = vpop.f32.mrb[126].mxu0  ;;  %v4511_v60 = vand.u32 %v6655_v1, %v7192_v10  ;;  %v4480_v23 = vpack.c.bf16 %v7722_v0, %v7722_v0  ;;  %v6673_v0 = vld [vmem:[%s8031_s14 + $0x244] ss:$8 sps:$4 sm:$0xff]  }
 0x7e7   : > { %4209 = vmatprep.subr.bf16.mxu1 %v6628_v61  ;;  %v4860_v11 = vpack.c.bf16 %v3394_v3, %v3394_v3  ;;  %v6451_v9 = vpop.f32.mrb[127].mxu0  ;;  %v6679_v3 = vld [vmem:[%s8031_s14 + $0x254] ss:$8 sps:$4 sm:$0x1f]  }
 0x7e8   : > { %4896 = vmatpush1.bf16.msra.mxu0 %v4888_v59  ;;  %v6667_v59 = vld [vmem:[%s8031_s14 + $0x214] ss:$8 sps:$4 sm:$0x1f]   ;;  %v4815_v9 = vand.u32 %v6679_v3, %v7192_v10 }
 0x7e9   : > { %5843 = vmatmul.mubr.msk.bf16.vlgmr.msra.gmra.mrb[124].mxu1 %vm1644_vm6, %v4100_v5  ;;  %5045 = vmatprep.subr.bf16.mxu0 %v6688_v26  ;;  %v6659_v26 = vld [vmem:[%s8031_s14 + $0x200] ss:$8 sps:$4 sm:$0xff]   ;;  %v4632_v5 = vpack.c.bf16 %v7757_v46, %v7757_v46  ;;  %v6685_v46 = vld [vmem:[%s8031_s14 + $0x284] ss:$8 sps:$4 sm:$0xff]  }
 0x7ea   : > { %4210 = vmatpush1.bf16.msra.mxu1 %v6626_v44  ;;  %4241 = vmatprep.mubr.bf16.mxu1 %v6733_v4  ;;  %v4663_v44 = vand.u32 %v6667_v59, %v7192_v10 }
 0x7eb   : > { %4211 = vmatprep.subr.bf16.mxu1 %v4207_v6  ;;  %5933 = vmatmul.mubr.msk.bf16.vlgmr.msra.gmra.mrb[152].mxu0 %vm1644_vm6, %v4860_v11  ;;  %v6671_v6 = vld [vmem:[%s8031_s14 + $0x240] ss:$8 sps:$4 sm:$0xff]   ;;  %v6677_v11 = vld [vmem:[%s8031_s14 + $0x250] ss:$8 sps:$4 sm:$0x1f]  }
 0x7ec   : > { %5046 = vmatpush1.bf16.msra.mxu0 %v6686_v58  ;;  %v7829_v39 = vpop.f32.mrb[128].mxu0  ;;  %5077 = vmatprep.mubr.bf16.mxu0 %v6733_v4  ;;  %v4812_v58 = vand.u32 %v6677_v11, %v7192_v10 }
 0x7ed   : > { %v6454_v7 = vpop.f32.mrb[129].mxu0  ;;  %5047 = vmatprep.subr.bf16.mxu0 %v5043_v33  ;;  %v4784_v33 = vpack.c.bf16 %v7793_v57, %v7793_v57  ;;  %v6697_v57 = vld [vmem:[%s8031_s14 + $0x2c4] ss:$8 sps:$4 sm:$0xff]  }
 0x7ee   : > { %4212 = vmatpush1.bf16.msra.mxu1 %v4204_v52  ;;  %v3402_v18 = vpop.f32.mrb[130].mxu0  ;;  %v6683_v52 = vld [vmem:[%s8031_s14 + $0x280] ss:$8 sps:$4 sm:$0xff]   ;;  %v4936_v7 = vpack.c.bf16 %v7829_v39, %v7829_v39  ;;  %v6709_v39 = vld [vmem:[%s8031_s14 + $0x304] ss:$8 sps:$4 sm:$0xff]  }
 0x7ef   : > { %4285 = vmatprep.subr.bf16.mxu1 %v6634_v31  ;;  %v5012_v20 = vpack.c.bf16 %v3402_v18, %v3402_v18  ;;  %v6455_v37 = vpop.f32.mrb[131].mxu0  ;;  %v6689_v31 = vld [vmem:[%s8031_s14 + $0x290] ss:$8 sps:$4 sm:$0x1f]  }
 0x7f0   : > { %5048 = vmatpush1.bf16.msra.mxu0 %v5040_v15  ;;  %v4964_v15 = vand.u32 %v6689_v31, %v7192_v10  ;;  %v6712_v18 = vld [vmem:[%s8031_s14 + $0x314] ss:$8 sps:$4 sm:$0x1f]   ;;  %v6710_v37 = vld [vmem:[%s8031_s14 + $0x310] ss:$8 sps:$4 sm:$0x1f]  }
 0x7f1   : > { %5852 = vmatmul.mubr.msk.bf16.vlgmr.msra.gmra.mrb[128].mxu1 %vm1644_vm6, %v4176_v16  ;;  %5197 = vmatprep.subr.bf16.mxu0 %v6700_v63  ;;  %v6703_v16 = vld [vmem:[%s8031_s14 + $0x2d4] ss:$8 sps:$4 sm:$0x1f]   ;;  %v6695_v63 = vld [vmem:[%s8031_s14 + $0x2c0] ss:$8 sps:$4 sm:$0xff]   ;;  %v5268_v17 = vand.u32 %v6710_v37, %v7192_v10 }
 0x7f2   : > { %4286 = vmatpush1.bf16.msra.mxu1 %v6632_v13  ;;  %4317 = vmatprep.mubr.bf16.mxu1 %v6733_v4  ;;  %v5119_v13 = vand.u32 %v6703_v16, %v7192_v10 }
 0x7f3   : > { %4287 = vmatprep.subr.bf16.mxu1 %v4283_v19  ;;  %5951 = vmatmul.mubr.msk.bf16.vlgmr.msra.gmra.mrb[156].mxu0 %vm1644_vm6, %v5012_v20  ;;  %v6707_v20 = vld [vmem:[%s8031_s14 + $0x300] ss:$8 sps:$4 sm:$0xff]  }
 0x7f4   : > { %5198 = vmatpush1.bf16.msra.mxu0 %v6698_v38  ;;  %v7865_v25 = vpop.f32.mrb[132].mxu0  ;;  %5229 = vmatprep.mubr.bf16.mxu0 %v6733_v4  ;;  %v5271_v38 = vand.u32 %v6712_v18, %v7192_v10 }
 0x7f5   : > { %v6458_v29 = vpop.f32.mrb[133].mxu0  ;;  %5199 = vmatprep.subr.bf16.mxu0 %v5195_v40  ;;  %v5088_v19 = vpack.c.bf16 %v7865_v25, %v7865_v25 }
 0x7f6   : > { %4288 = vmatpush1.bf16.msra.mxu1 %v4280_v41  ;;  %v3410_v21 = vpop.f32.mrb[134].mxu0 }
 0x7f7   : > { %4361 = vmatprep.subr.bf16.mxu1 %v6640_v42  ;;  %v5164_v50 = vpack.c.bf16 %v3410_v21, %v3410_v21  ;;  %v6459_v34 = vpop.f32.mrb[135].mxu0 }
 0x7f8   : > { %5200 = vmatpush1.bf16.msra.mxu0 %v5192_v12 }
 0x7f9   : > { %5861 = vmatmul.mubr.msk.bf16.vlgmr.msra.gmra.mrb[132].mxu1 %vm1644_vm6, %v4252_v48 }
 0x7fa   : > { %4362 = vmatpush1.bf16.msra.mxu1 %v6638_v45  ;;  %4393 = vmatprep.mubr.bf16.mxu1 %v6733_v4 }
 0x7fb   : > { %4363 = vmatprep.subr.bf16.mxu1 %v4359_v22  ;;  %5969 = vmatmul.mubr.msk.bf16.vlgmr.msra.gmra.mrb[160].mxu0 %vm1644_vm6, %v5164_v50 }
 0x7fc   : > { %v7888_v51 = vpop.f32.mrb[136].mxu0  ;;  %5381 = vmatprep.mubr.bf16.mxu0 %v6733_v4 }
 0x7fd   : > { %v6462_v27 = vpop.f32.mrb[137].mxu0  ;;  %v5240_v40 = vpack.c.bf16 %v7888_v51, %v7888_v51 }
 0x7fe   : > { %4364 = vmatpush1.bf16.msra.mxu1 %v4356_v35  ;;  %v3418_v53 = vpop.f32.mrb[138].mxu0 }
 0x7ff   : > { %4513 = vmatprep.subr.bf16.mxu1 %v6649_v49  ;;  %v6463_v61 = vpop.f32.mrb[139].mxu0 }
 0x801   : > { %5870 = vmatmul.mubr.msk.bf16.vlgmr.msra.gmra.mrb[136].mxu1 %vm1644_vm6, %v4328_v54 }
 0x802   : > { %4514 = vmatpush1.bf16.msra.mxu1 %v6647_v55  ;;  %4545 = vmatprep.mubr.bf16.mxu1 %v6733_v4 }
 0x803   : > { %4515 = vmatprep.subr.bf16.mxu1 %v4511_v60 }
 0x806   : > { %4516 = vmatpush1.bf16.msra.mxu1 %v4508_v56 }
 0x807   : > { %4665 = vmatprep.subr.bf16.mxu1 %v6661_v62 }
 0x809   : > { %5888 = vmatmul.mubr.msk.bf16.vlgmr.msra.gmra.mrb[140].mxu1 %vm1644_vm6, %v4480_v23 }
 0x80a   : > { %4666 = vmatpush1.bf16.msra.mxu1 %v6659_v26  ;;  %4697 = vmatprep.mubr.bf16.mxu1 %v6733_v4 }
 0x80b   : > { %4667 = vmatprep.subr.bf16.mxu1 %v4663_v44 }
 0x80e   : > { %4668 = vmatpush1.bf16.msra.mxu1 %v4660_v2 }
 0x80f   : > { %4817 = vmatprep.subr.bf16.mxu1 %v6673_v0 }
 0x811   : > { %5906 = vmatmul.mubr.msk.bf16.vlgmr.msra.gmra.mrb[144].mxu1 %vm1644_vm6, %v4632_v5 }
 0x812   : > { %4818 = vmatpush1.bf16.msra.mxu1 %v6671_v6  ;;  %4849 = vmatprep.mubr.bf16.mxu1 %v6733_v4 }
 0x813   : > { %4819 = vmatprep.subr.bf16.mxu1 %v4815_v9 }
 0x816   : > { %4820 = vmatpush1.bf16.msra.mxu1 %v4812_v58 }
 0x817   : > { %4969 = vmatprep.subr.bf16.mxu1 %v6685_v46 }
 0x819   : > { %5924 = vmatmul.mubr.msk.bf16.vlgmr.msra.gmra.mrb[148].mxu1 %vm1644_vm6, %v4784_v33 }
 0x81a   : > { %4970 = vmatpush1.bf16.msra.mxu1 %v6683_v52  ;;  %5001 = vmatprep.mubr.bf16.mxu1 %v6733_v4 }
 0x81b   : > { %4971 = vmatprep.subr.bf16.mxu1 %v4967_v36 }
 0x81e   : > { %4972 = vmatpush1.bf16.msra.mxu1 %v4964_v15 }
 0x81f   : > { %5121 = vmatprep.subr.bf16.mxu1 %v6697_v57 }
 0x821   : > { %5942 = vmatmul.mubr.msk.bf16.vlgmr.msra.gmra.mrb[152].mxu1 %vm1644_vm6, %v4936_v7 }
 0x822   : > { %5122 = vmatpush1.bf16.msra.mxu1 %v6695_v63  ;;  %5153 = vmatprep.mubr.bf16.mxu1 %v6733_v4 }
 0x823   : > { %5123 = vmatprep.subr.bf16.mxu1 %v5119_v13 }
 0x826   : > { %5124 = vmatpush1.bf16.msra.mxu1 %v5116_v14 }
 0x827   : > { %5273 = vmatprep.subr.bf16.mxu1 %v6709_v39 }
 0x829   : > { %5960 = vmatmul.mubr.msk.bf16.vlgmr.msra.gmra.mrb[156].mxu1 %vm1644_vm6, %v5088_v19 }
 0x82a   : > { %5274 = vmatpush1.bf16.msra.mxu1 %v6707_v20  ;;  %5305 = vmatprep.mubr.bf16.mxu1 %v6733_v4 }
 0x82b   : > { %5275 = vmatprep.subr.bf16.mxu1 %v5271_v38 }
 0x82e   : > { %5276 = vmatpush1.bf16.msra.mxu1 %v5268_v17 }
 0x831   : > { %5978 = vmatmul.mubr.msk.bf16.vlgmr.msra.gmra.mrb[160].mxu1 %vm1644_vm6, %v5240_v40 }
 0x874   : > { %v3493_v41 = vpop.f32.mrb[88].mxu1 }
 0x875   : > { %v3495_v42 = vpop.f32.mrb[89].mxu1 }
 0x876   : > { %v3497_v24 = vpop.f32.mrb[90].mxu1 }
 0x877   : > { %v3498_v25 = vpop.f32.mrb[91].mxu1 }
 0x87c   : > { %v3561_v12 = vpop.f32.mrb[92].mxu1 }
 0x87d   : > { %v3562_v29 = vadd.f32 %v3561_v12, %v3493_v41  ;;  %v3563_v45 = vpop.f32.mrb[93].mxu1 }
 0x87e   : > { %v3564_v47 = vadd.f32 %v3563_v45, %v3495_v42  ;;  %v3565_v21 = vpop.f32.mrb[94].mxu1 }
 0x87f   : > { %v3566_v48 = vpop.f32.mrb[95].mxu1 }
 0x884   : > { %v3635_v10 = vpop.f32.mrb[96].mxu1 }
 0x885   : > { %v3642_v22 = vadd.f32 %v3635_v10, %v3562_v29  ;;  %v3637_v4 = vpop.f32.mrb[97].mxu1 }
 0x886   : > { %v3643_v50 = vadd.f32 %v3637_v4, %v3564_v47  ;;  %v3639_v34 = vpop.f32.mrb[98].mxu1 }
 0x887   : > { %v3640_v35 = vpop.f32.mrb[99].mxu1 }
 0x88c   : > { %v3711_v49 = vpop.f32.mrb[100].mxu1 }
 0x88d   : > { %v3718_v1 = vadd.f32 %v3711_v49, %v3642_v22  ;;  %v3713_v51 = vpop.f32.mrb[101].mxu1 }
 0x88e   : > { %v3719_v54 = vadd.f32 %v3713_v51, %v3643_v50  ;;  %v3715_v27 = vpop.f32.mrb[102].mxu1 }
 0x88f   : > { %v3716_v55 = vpop.f32.mrb[103].mxu1 }
 0x894   : > { %v3787_v28 = vpop.f32.mrb[104].mxu1 }
 0x895   : > { %v3794_v53 = vadd.f32 %v3787_v28, %v3718_v1  ;;  %v3789_v60 = vpop.f32.mrb[105].mxu1 }
 0x896   : > { %v3795_v61 = vadd.f32 %v3789_v60, %v3719_v54  ;;  %v3791_v56 = vpop.f32.mrb[106].mxu1 }
 0x897   : > { %v3792_v62 = vpop.f32.mrb[107].mxu1 }
 0x89c   : > { %v3863_v59 = vpop.f32.mrb[108].mxu1 }
 0x89d   : > { %v3870_v23 = vadd.f32 %v3863_v59, %v3794_v53  ;;  %v3865_v26 = vpop.f32.mrb[109].mxu1 }
 0x89e   : > { %v3871_v43 = vadd.f32 %v3865_v26, %v3795_v61  ;;  %v3867_v44 = vpop.f32.mrb[110].mxu1 }
 0x89f   : > { %v3868_v2 = vpop.f32.mrb[111].mxu1 }
 0x8a4   : > { %v3939_v0 = vpop.f32.mrb[112].mxu1  ;;  %v7996_v3 = vpop.f32.mrb[140].mxu0 }
 0x8a5   : > { %v3946_v5 = vadd.f32 %v3939_v0, %v3870_v23  ;;  %v3941_v6 = vpop.f32.mrb[113].mxu1  ;;  %v7998_v11 = vpop.f32.mrb[141].mxu0 }
 0x8a6   : > { %v3947_v9 = vadd.f32 %v3941_v6, %v3871_v43  ;;  %v3943_v58 = vpop.f32.mrb[114].mxu1  ;;  %v4475_v46 = vpop.f32.mrb[142].mxu0 }
 0x8a7   : > { %v3944_v32 = vpop.f32.mrb[115].mxu1  ;;  %v4476_v33 = vpop.f32.mrb[143].mxu0 }
 0x8ac   : > { %v4015_v52 = vpop.f32.mrb[116].mxu1 }
 0x8ad   : > { %v4022_v31 = vadd.f32 %v4015_v52, %v3946_v5  ;;  %v4017_v36 = vpop.f32.mrb[117].mxu1 }
 0x8ae   : > { %v4023_v15 = vadd.f32 %v4017_v36, %v3947_v9  ;;  %v4019_v57 = vpop.f32.mrb[118].mxu1  ;;  %v4623_v16 = vpop.f32.mrb[144].mxu0 }
 0x8af   : > { %v4020_v7 = vpop.f32.mrb[119].mxu1  ;;  %v4625_v63 = vpop.f32.mrb[145].mxu0 }
 0x8b0   : > { %v4627_v8 = vpop.f32.mrb[146].mxu0 }
 0x8b1   : > { %v4628_v13 = vpop.f32.mrb[147].mxu0 }
 0x8b4   : > { %v4091_v14 = vpop.f32.mrb[120].mxu1 }
 0x8b5   : > { %v4098_v39 = vadd.f32 %v4091_v14, %v4022_v31  ;;  %v4093_v18 = vpop.f32.mrb[121].mxu1 }
 0x8b6   : > { %v4099_v19 = vadd.f32 %v4093_v18, %v4023_v15  ;;  %v4095_v20 = vpop.f32.mrb[122].mxu1  ;;  %v4775_v37 = vpop.f32.mrb[148].mxu0 }
 0x8b7   : > { %v4096_v38 = vpop.f32.mrb[123].mxu1  ;;  %v4777_v17 = vpop.f32.mrb[149].mxu0 }
 0x8b8   : > { %v4779_v40 = vpop.f32.mrb[150].mxu0 }
 0x8b9   : > { %v4780_v41 = vpop.f32.mrb[151].mxu0 }
 0x8bc   : > { %v4167_v42 = vpop.f32.mrb[124].mxu1 }
 0x8bd   : > { %v4174_v24 = vadd.f32 %v4167_v42, %v4098_v39  ;;  %v4169_v25 = vpop.f32.mrb[125].mxu1 }
 0x8be   : > { %v4175_v12 = vadd.f32 %v4169_v25, %v4099_v19  ;;  %v4171_v29 = vpop.f32.mrb[126].mxu1  ;;  %v4927_v45 = vpop.f32.mrb[152].mxu0 }
 0x8bf   : > { %v4172_v47 = vpop.f32.mrb[127].mxu1  ;;  %v4929_v21 = vpop.f32.mrb[153].mxu0 }
 0x8c0   : > { %v4931_v48 = vpop.f32.mrb[154].mxu0 }
 0x8c1   : > { %v4932_v10 = vpop.f32.mrb[155].mxu0 }
 0x8c4   : > { %v4243_v22 = vpop.f32.mrb[128].mxu1 }
 0x8c5   : > { %v4250_v4 = vadd.f32 %v4243_v22, %v4174_v24  ;;  %v4245_v50 = vpop.f32.mrb[129].mxu1 }
 0x8c6   : > { %v4251_v34 = vadd.f32 %v4245_v50, %v4175_v12  ;;  %v4247_v35 = vpop.f32.mrb[130].mxu1  ;;  %v5079_v49 = vpop.f32.mrb[156].mxu0 }
 0x8c7   : > { %v4248_v1 = vpop.f32.mrb[131].mxu1  ;;  %v5081_v51 = vpop.f32.mrb[157].mxu0 }
 0x8c8   : > { %v5083_v54 = vpop.f32.mrb[158].mxu0 }
 0x8c9   : > { %v5084_v27 = vpop.f32.mrb[159].mxu0 }
 0x8cc   : > { %v4319_v55 = vpop.f32.mrb[132].mxu1 }
 0x8cd   : > { %v4326_v28 = vadd.f32 %v4319_v55, %v4250_v4  ;;  %v4321_v53 = vpop.f32.mrb[133].mxu1 }
 0x8ce   : > { %v4327_v60 = vadd.f32 %v4321_v53, %v4251_v34  ;;  %v4323_v61 = vpop.f32.mrb[134].mxu1  ;;  %v5231_v56 = vpop.f32.mrb[160].mxu0 }
 0x8cf   : > { %v4324_v62 = vpop.f32.mrb[135].mxu1  ;;  %v5233_v59 = vpop.f32.mrb[161].mxu0 }
 0x8d0   : > { %v5235_v23 = vpop.f32.mrb[162].mxu0 }
 0x8d1   : > { %v5236_v26 = vpop.f32.mrb[163].mxu0 }
 0x8d4   : > { %v4395_v43 = vpop.f32.mrb[136].mxu1 }
 0x8d5   : > { %v4402_v44 = vadd.f32 %v4395_v43, %v4326_v28  ;;  %v4397_v2 = vpop.f32.mrb[137].mxu1 }
 0x8d6   : > { %v4403_v0 = vadd.f32 %v4397_v2, %v4327_v60  ;;  %v4399_v5 = vpop.f32.mrb[138].mxu1 }
 0x8d7   : > { %v4478_v6 = vadd.f32 %v7996_v3, %v4402_v44  ;;  %v4400_v9 = vpop.f32.mrb[139].mxu1 }
 0x8d8   : > { %v4479_v58 = vadd.f32 %v7998_v11, %v4403_v0 }
 0x8dc   : > { %v4547_v46 = vpop.f32.mrb[140].mxu1 }
 0x8dd   : > { %v4554_v32 = vadd.f32 %v4547_v46, %v4478_v6  ;;  %v4549_v33 = vpop.f32.mrb[141].mxu1 }
 0x8de   : > { %v4555_v52 = vadd.f32 %v4549_v33, %v4479_v58  ;;  %v4551_v31 = vpop.f32.mrb[142].mxu1 }
 0x8df   : > { %v4630_v36 = vadd.f32 %v4623_v16, %v4554_v32  ;;  %v4552_v15 = vpop.f32.mrb[143].mxu1 }
 0x8e0   : > { %v4631_v57 = vadd.f32 %v4625_v63, %v4555_v52 }
 0x8e4   : > { %v4699_v7 = vpop.f32.mrb[144].mxu1 }
 0x8e5   : > { %v4706_v8 = vadd.f32 %v4699_v7, %v4630_v36  ;;  %v4701_v13 = vpop.f32.mrb[145].mxu1 }
 0x8e6   : > { %v4707_v14 = vadd.f32 %v4701_v13, %v4631_v57  ;;  %v4703_v39 = vpop.f32.mrb[146].mxu1 }
 0x8e7   : > { %v4782_v18 = vadd.f32 %v4775_v37, %v4706_v8  ;;  %v4704_v19 = vpop.f32.mrb[147].mxu1 }
 0x8e8   : > { %v4783_v20 = vadd.f32 %v4777_v17, %v4707_v14 }
 0x8ec   : > { %v4851_v3 = vpop.f32.mrb[148].mxu1 }
 0x8ed   : > { %v4858_v38 = vadd.f32 %v4851_v3, %v4782_v18  ;;  %v4853_v40 = vpop.f32.mrb[149].mxu1 }
 0x8ee   : > { %v4859_v11 = vadd.f32 %v4853_v40, %v4783_v20  ;;  %v4855_v41 = vpop.f32.mrb[150].mxu1 }
 0x8ef   : > { %v4934_v42 = vadd.f32 %v4927_v45, %v4858_v38  ;;  %v4856_v24 = vpop.f32.mrb[151].mxu1 }
 0x8f0   : > { %v4935_v25 = vadd.f32 %v4929_v21, %v4859_v11 }
 0x8f4   : > { %v5003_v12 = vpop.f32.mrb[152].mxu1 }
 0x8f5   : > { %v5010_v16 = vadd.f32 %v5003_v12, %v4934_v42  ;;  %v5005_v29 = vpop.f32.mrb[153].mxu1 }
 0x8f6   : > { %v5011_v63 = vadd.f32 %v5005_v29, %v4935_v25  ;;  %v5007_v47 = vpop.f32.mrb[154].mxu1 }
 0x8f7   : > { %v5086_v48 = vadd.f32 %v5079_v49, %v5010_v16  ;;  %v5008_v10 = vpop.f32.mrb[155].mxu1 }
 0x8f8   : > { %v5087_v22 = vadd.f32 %v5081_v51, %v5011_v63 }
 0x8fc   : > { %v5155_v4 = vpop.f32.mrb[156].mxu1 }
 0x8fd   : > { %v5162_v37 = vadd.f32 %v5155_v4, %v5086_v48  ;;  %v5157_v50 = vpop.f32.mrb[157].mxu1 }
 0x8fe   : > { %v5163_v17 = vadd.f32 %v5157_v50, %v5087_v22  ;;  %v5159_v34 = vpop.f32.mrb[158].mxu1 }
 0x8ff   : > { %v5238_v35 = vadd.f32 %v5231_v56, %v5162_v37  ;;  %v5160_v1 = vpop.f32.mrb[159].mxu1  ;;  %v5328_v56 = vld [vmem:[%s8033_s16] sm:$0x3] }
 0x900   : > { %v5239_v54 = vadd.f32 %v5233_v59, %v5163_v17  ;;  %v5337_v59 = vpop.permute.xlu0 %5336 }
 0x904   : > { %v5307_v27 = vpop.f32.mrb[160].mxu1 }
 0x905   : > { %v5314_v45 = vadd.f32 %v5307_v27, %v5238_v35  ;;  %v5309_v55 = vpop.f32.mrb[161].mxu1 }
 0x906   : > { %v5315_v21 = vadd.f32 %v5309_v55, %v5239_v54  ;;  %v5311_v28 = vpop.f32.mrb[162].mxu1 }
 0x907   : > { %v5322_v53 = vadd.f32 %v7395_v30, %v5314_v45  ;;  %v5312_v60 = vpop.f32.mrb[163].mxu1 }
 0x908   : > { %v5323_v49 = vadd.f32 %v7395_v30, %v5315_v21 }
 0x909   : > { %v5324_v61 = vmax.f32 %v5322_v53, 0.0 }
 0x90a   : > { %v5325_v51 = vmax.f32 %v5323_v49, 0.0 }
 0x90b   : > { %v5326_v62 = vpack.c.bf16 %v5324_v61, %v5324_v61 }
 0x90c   : > { %v5327_v23 = vpack.c.bf16 %v5325_v51, %v5325_v51 }
 0x90d   : > { %v5344_v26 = vsel %vm1648_vm4, %v5326_v62, 0 }
 0x90e   : > { %5980 = vmatprep.subr.msk.bf16.mxu0 %vm1648_vm4, %v5327_v23 }
 0x90f   : > { %5350 = vmatpush1.bf16.msra.mxu0 %v5344_v26 }
 0x912   : > { %5981 = vmatmul.mubr.msk.bf16.vlgmr.msra.gmra.mrb[164].mxu0 %vm5339_vm11, %v5328_v56 }
 0x9e5   : > { %v5383_v43 = vpop.f32.mrb[164].mxu0 }
 0x9e6   : > { %v5384_v44 = vadd.f32 %v5383_v43, %v5337_v59  ;;  %v5385_v2 = vpop.f32.mrb[165].mxu0 }
 0x9e7   : > { %v5386_v30 = vadd.f32 %v5385_v2, %v5337_v59  ;;  %v5387_v0 = vpop.f32.mrb[166].mxu0 }
 0x9e8   : > { %v5390_v5 = vsub.f32 0.0, %v5384_v44  ;;  %v5388_v6 = vpop.f32.mrb[167].mxu0 }
 0x9e9   : > { %v5391_v9 = vsub.f32 0.0, %v5386_v30 }
 0x9ea   : > { %v5392_v58 = vmul.f32 1.442695, %v5390_v5 }
 0x9eb   : > { %v5394_v46 = vmul.f32 1.442695, %v5391_v9 }
 0x9ec   : > { %6717 = vpow2.f32 %v5392_v58 }
 0x9ed   : > { %6719 = vpow2.f32 %v5394_v46 }
 0x9f6   : > { %v6718_v32 = vpop.eup %6717 }
 0x9f7   : > { %v6720_v33 = vpop.eup %6719  ;;  %v5396_v52 = vadd.f32 1.0, %v6718_v32 }
 0x9f8   : > { %v5397_v31 = vadd.f32 1.0, %v6720_v33 }
 0x9f9   : > { %6721 = vrcp.f32 %v5396_v52 }
 0x9fa   : > { %6723 = vrcp.f32 %v5397_v31 }
 0xa03   : > { %v6722_v36 = vpop.eup %6721 }
 0xa04   : > { %v6724_v15 = vpop.eup %6723 }
 0xa05   : > { %v5404_v57 = vcombine.low %v6722_v36, %v6724_v15 }
 0xa07   : > { %5408 = vst.msk [vmem:[%s612_s30] sm:$0xff] %vm5407_vm13, %v5404_v57 }
 0xa08 PF: > { %s34_s1 = sadd.s32 1, %s6731_s1  }
 0xa09   : > { %p31_p4 = scmp.ge.s32.totalorder %s34_s1, 4  }
 0xa0b   :  { %33 = sbr.rel (!%p31_p4) target bundleno = 5 (0x5), region = 188 }

</bundles_post_ra>
